<compile_context>
chip_gen: v7x
topology: tpu7x:2x2x1
jax: 0.10.0
libtpu: 0.0.40
codegen_flags: <defaults>
</compile_context>

<pallas_src>
import functools

import jax
import jax.numpy as jnp
from jax.experimental import pallas as pl
from jax.experimental.pallas import tpu as pltpu


_TK_CAP = 4096   # max K tile (bf16) for the conv matmuls
_TM_CAP = 256    # max M tile


def _round_up(x, m):
    return ((x + m - 1) // m) * m


def _pad_k(k):
    """Pad contraction dim: to 128 if small, else to a multiple of _TK_CAP."""
    kp = _round_up(k, 128)
    if kp > _TK_CAP:
        kp = _round_up(k, _TK_CAP)
    return kp


# ----------------------------------------------------------------------------
# Conv-as-matmul kernel:  out = [relu]((A @ W) + bias)
#   A: (M, K) bf16 im2col rows, W: (K, N) bf16 with BN scale pre-folded,
#   bias: (1, N) f32. Grid = (M tiles [parallel], K tiles [arbitrary]);
#   accumulation happens directly in the f32 output block (resident across K).
# ----------------------------------------------------------------------------
def _conv_matmul_kernel(a_ref, w_ref, bias_ref, o_ref, *, relu):
    k = pl.program_id(1)

    @pl.when(k == 0)
    def _():
        o_ref[...] = jnp.zeros_like(o_ref)

    o_ref[...] += jnp.dot(a_ref[...], w_ref[...],
                          preferred_element_type=jnp.float32)

    @pl.when(k == pl.num_programs(1) - 1)
    def _():
        y = o_ref[...] + bias_ref[...]
        if relu:
            y = jnp.maximum(y, 0.0)
        o_ref[...] = y


def conv_matmul(cols, w_p, bias_p, *, relu=True):
    """cols: (M, K) activations; w_p: (Kp, Np) bf16; bias_p: (1, Np) f32.

    Returns the padded (Mp, Np) f32 output; caller slices the real rows/cols.
    """
    M, K = cols.shape
    Kp, Np = w_p.shape
    tk = Kp if Kp <= _TK_CAP else _TK_CAP
    assert Kp % tk == 0
    tm = min(_round_up(M, 8), _TM_CAP)
    Mp = _round_up(M, tm)

    a_p = jnp.zeros((Mp, Kp), jnp.bfloat16).at[:M, :K].set(
        cols.astype(jnp.bfloat16))

    return pl.pallas_call(
        functools.partial(_conv_matmul_kernel, relu=relu),
        out_shape=jax.ShapeDtypeStruct((Mp, Np), jnp.float32),
        grid_spec=pltpu.PrefetchScalarGridSpec(
            num_scalar_prefetch=0,
            grid=(Mp // tm, Kp // tk),
            in_specs=[
                pl.BlockSpec((tm, tk), lambda i, k: (i, k)),
                pl.BlockSpec((tk, Np), lambda i, k: (k, 0)),
                pl.BlockSpec((1, Np), lambda i, k: (0, 0)),
            ],
            out_specs=pl.BlockSpec((tm, Np), lambda i, k: (i, 0)),
        ),
        compiler_params=pltpu.CompilerParams(
            dimension_semantics=("parallel", "arbitrary")),
    )(a_p, w_p, bias_p)


# ----------------------------------------------------------------------------
# Fully fused FC tail:  relu(x@W1+b1) -> relu(@W2+b2) -> @[Wpi|Wv] + [bpi|bv]
# All weights (<1 MiB padded) stay resident in VMEM; single pallas_call.
# ----------------------------------------------------------------------------
def _fc_tail_kernel(x_ref, w1_ref, b1_ref, w2_ref, b2_ref, wh_ref, bh_ref,
                    o_ref):
    h1 = jnp.dot(x_ref[...], w1_ref[...], preferred_element_type=jnp.float32)
    h1 = jnp.maximum(h1 + b1_ref[...], 0.0)
    h2 = jnp.dot(h1.astype(jnp.bfloat16), w2_ref[...],
                 preferred_element_type=jnp.float32)
    h2 = jnp.maximum(h2 + b2_ref[...], 0.0)
    o_ref[...] = jnp.dot(h2.astype(jnp.bfloat16), wh_ref[...],
                         preferred_element_type=jnp.float32) + bh_ref[...]


def fc_tail(x, w1, b1, w2, b2, wh, bh):
    """x: (B, cnn_out) f32 -> padded (Bp, NHp) f32 head outputs [pi | v | pad]."""
    B, K = x.shape
    K1p = w1.shape[0]
    NHp = wh.shape[1]
    Bp = _round_up(B, 8)
    x_p = jnp.zeros((Bp, K1p), jnp.bfloat16).at[:B, :K].set(
        x.astype(jnp.bfloat16))

    full = lambda arr: pl.BlockSpec(arr.shape, lambda i: (0,) * arr.ndim)
    return pl.pallas_call(
        _fc_tail_kernel,
        out_shape=jax.ShapeDtypeStruct((Bp, NHp), jnp.float32),
        grid_spec=pltpu.PrefetchScalarGridSpec(
            num_scalar_prefetch=0,
            grid=(1,),
            in_specs=[full(x_p), full(w1), full(b1), full(w2), full(b2),
                      full(wh), full(bh)],
            out_specs=pl.BlockSpec((Bp, NHp), lambda i: (0, 0)),
        ),
        compiler_params=pltpu.CompilerParams(
            dimension_semantics=("arbitrary",)),
    )(x_p, w1, b1, w2, b2, wh, bh)


# ----------------------------------------------------------------------------
# Layout plumbing (XLA glue): im2col, maxpool.
# ----------------------------------------------------------------------------
def im2col_gather(x, kh, kw, pad):
    """General im2col (used only for the 110x110 first conv, C=1).

    x: (B, H, W, C) NHWC -> rows (B*Ho*Wo, C*kh*kw), feature order (C, kh, kw)
    (matches PyTorch Conv2d weight flattening)."""
    B, H, W, C = x.shape
    xp = jnp.pad(x, ((0, 0), (pad, pad), (pad, pad), (0, 0)))
    Ho = H + 2 * pad - kh + 1
    Wo = W + 2 * pad - kw + 1
    ih = jnp.arange(Ho)[:, None] + jnp.arange(kh)[None, :]          # (Ho, kh)
    iw = jnp.arange(Wo)[:, None] + jnp.arange(kw)[None, :]          # (Wo, kw)
    patches = xp[:, ih[:, None, :, None], iw[None, :, None, :], :]  # (B,Ho,Wo,kh,kw,C)
    patches = jnp.transpose(patches, (0, 1, 2, 5, 3, 4))            # (B,Ho,Wo,C,kh,kw)
    return patches.reshape(B * Ho * Wo, C * kh * kw), Ho, Wo


def im2col_3x3(x):
    """3x3, pad=1 im2col via 9 static shifted slices.

    x: (B, H, W, C) -> rows (B*H*W, 9*C), feature order (kh, kw, C)."""
    B, H, W, C = x.shape
    xp = jnp.pad(x, ((0, 0), (1, 1), (1, 1), (0, 0)))
    cols = jnp.concatenate(
        [xp[:, dy:dy + H, dx:dx + W, :] for dy in range(3) for dx in range(3)],
        axis=-1)
    return cols.reshape(B * H * W, 9 * C)


def maxpool2x2(x):
    """MaxPool2d(kernel=2, stride=2), floor mode (PyTorch default). NHWC."""
    B, H, W, C = x.shape
    Ho, Wo = H // 2, W // 2
    x = x[:, :Ho * 2, :Wo * 2, :]
    x = x.reshape(B, Ho, 2, Wo, 2, C)
    return x.max(axis=(2, 4))


# ----------------------------------------------------------------------------
# One-time (hoisted) weight preparation: BN folding, padding, bf16 cast,
# fc1 column permutation to NHWC-flatten order, pi/v head concatenation.
# ----------------------------------------------------------------------------
def prepare_weights(p, *, filter_sizes, output_shape, pool_hw):
    f0, f1, f2 = filter_sizes
    Hp, Wp = pool_hw

    def fold_conv(w, b, bn, order):
        Cout, Cin, kh, kw = w.shape
        scale = bn['g'] / jnp.sqrt(bn['v'] + 1e-5)
        bias = (b - bn['m']) * scale + bn['b']
        if order == 'chw':    # rows ordered (Cin, kh, kw) — gather im2col
            wmat = w.reshape(Cout, Cin * kh * kw).T
        else:                 # rows ordered (kh, kw, Cin) — shifted-slice im2col
            wmat = jnp.transpose(w, (2, 3, 1, 0)).reshape(kh * kw * Cin, Cout)
        wmat = wmat * scale[None, :]                     # fold BN scale
        K = wmat.shape[0]
        Kp = _pad_k(K)
        Np = _round_up(Cout, 128)
        w_p = jnp.zeros((Kp, Np), jnp.bfloat16).at[:K, :Cout].set(
            wmat.astype(jnp.bfloat16))
        b_p = jnp.zeros((1, Np), jnp.float32).at[0, :Cout].set(
            bias.astype(jnp.float32))
        return w_p, b_p

    c1w, c1b = fold_conv(p['conv1_w'], p['conv1_b'], p['bn1'], 'chw')
    c2w, c2b = fold_conv(p['conv2_w'], p['conv2_b'], p['bn2'], 'hwc')
    c3w, c3b = fold_conv(p['conv3_w'], p['conv3_b'], p['bn3'], 'hwc')

    # fc1: permute columns from NCHW-flatten to NHWC-flatten order so the
    # activation transpose before flatten can be deleted from the forward.
    cnn_out = f2 * Hp * Wp
    fc1_w = p['fc1_w'].reshape(128, f2, Hp, Wp).transpose(0, 2, 3, 1)
    fc1_w = fc1_w.reshape(128, cnn_out)
    K1p = _round_up(cnn_out, 128)
    w1 = jnp.zeros((K1p, 128), jnp.bfloat16).at[:cnn_out, :].set(
        fc1_w.T.astype(jnp.bfloat16))
    b1 = p['fc1_b'].astype(jnp.float32).reshape(1, 128)

    w2 = jnp.zeros((128, 128), jnp.bfloat16).at[:, :64].set(
        p['fc2_w'].T.astype(jnp.bfloat16))
    b2 = jnp.zeros((1, 128), jnp.float32).at[0, :64].set(
        p['fc2_b'].astype(jnp.float32))

    nh = output_shape + 1
    NHp = _round_up(nh, 128)
    wh_real = jnp.concatenate([p['pi_w'].T, p['v_w'].T], axis=1)   # (64, out+1)
    wh = jnp.zeros((128, NHp), jnp.bfloat16).at[:64, :nh].set(
        wh_real.astype(jnp.bfloat16))
    bh = jnp.zeros((1, NHp), jnp.float32).at[0, :nh].set(
        jnp.concatenate([p['pi_b'], p['v_b']]).astype(jnp.float32))

    return dict(c1w=c1w, c1b=c1b, c2w=c2w, c2b=c2b, c3w=c3w, c3b=c3b,
                w1=w1, b1=b1, w2=w2, b2=b2, wh=wh, bh=bh)


# ----------------------------------------------------------------------------
# Forward pass.
# ----------------------------------------------------------------------------
def actor_critic_forward(state_nchw, w, *, filter_sizes, output_shape):
    """state (B, 1, H, W) NCHW -> (pi (B, out), v (B, 1))."""
    f0, f1, f2 = filter_sizes
    x = jnp.transpose(state_nchw, (0, 2, 3, 1)).astype(jnp.bfloat16)   # NHWC
    B = x.shape[0]

    # conv1 (k=110, p=1) + BN + ReLU
    cols, Ho, Wo = im2col_gather(x, 110, 110, 1)
    y = conv_matmul(cols, w['c1w'], w['c1b'], relu=True)
    x = y[:B * Ho * Wo, :f0].reshape(B, Ho, Wo, f0).astype(jnp.bfloat16)

    # conv2 (3x3, p=1) + BN + ReLU
    y = conv_matmul(im2col_3x3(x), w['c2w'], w['c2b'], relu=True)
    x = y[:B * Ho * Wo, :f1].reshape(B, Ho, Wo, f1).astype(jnp.bfloat16)

    # conv3 (3x3, p=1) + BN + ReLU
    y = conv_matmul(im2col_3x3(x), w['c3w'], w['c3b'], relu=True)
    x = y[:B * Ho * Wo, :f2].reshape(B, Ho, Wo, f2)

    # maxpool + flatten (NHWC order; fc1 columns were permuted to match)
    x = maxpool2x2(x).reshape(B, -1)

    # fused FC tail: fc1 -> relu -> fc2 -> relu -> [pi | v]
    out = fc_tail(x, w['w1'], w['b1'], w['w2'], w['b2'], w['wh'], w['bh'])
    pi = out[:B, :output_shape]
    v = out[:B, output_shape:output_shape + 1]
    return pi, v


# ----------------------------------------------------------------------------
# Parameter init (mirrors the PyTorch module's shapes).
# ----------------------------------------------------------------------------
def init_params(key, input_shape, output_shape, filter_sizes):
    C_in, H, W = input_shape
    f0, f1, f2 = filter_sizes
    keys = jax.random.split(key, 32)
    ki = iter(range(32))

    def randn(shape, fan_in):
        k = keys[next(ki)]
        return (jax.random.normal(k, shape, jnp.float32)
                / jnp.sqrt(jnp.float32(fan_in)))

    def bn(c):
        return dict(
            g=1.0 + 0.1 * jax.random.normal(keys[next(ki)], (c,), jnp.float32),
            b=0.1 * jax.random.normal(keys[next(ki)], (c,), jnp.float32),
            m=0.1 * jax.random.normal(keys[next(ki)], (c,), jnp.float32),
            v=1.0 + 0.1 * jnp.abs(
                jax.random.normal(keys[next(ki)], (c,), jnp.float32)),
        )

    # CNN output spatial size (mirrors the dry-run in __init__):
    Ho = H + 2 - 110 + 1          # conv1 (k=110, p=1)
    Wo = W + 2 - 110 + 1
    Hp, Wp = Ho // 2, Wo // 2     # maxpool 2x2
    cnn_out = f2 * Hp * Wp

    p = {}
    p['conv1_w'] = randn((f0, C_in, 110, 110), C_in * 110 * 110)
    p['conv1_b'] = randn((f0,), 10.0)
    p['bn1'] = bn(f0)
    p['conv2_w'] = randn((f1, f0, 3, 3), f0 * 9)
    p['conv2_b'] = randn((f1,), 10.0)
    p['bn2'] = bn(f1)
    p['conv3_w'] = randn((f2, f1, 3, 3), f1 * 9)
    p['conv3_b'] = randn((f2,), 10.0)
    p['bn3'] = bn(f2)
    p['fc1_w'] = randn((128, cnn_out), cnn_out)
    p['fc1_b'] = randn((128,), 10.0)
    p['fc2_w'] = randn((64, 128), 128)
    p['fc2_b'] = randn((64,), 10.0)
    p['pi_w'] = randn((output_shape, 64), 64)
    p['pi_b'] = randn((output_shape,), 10.0)
    p['v_w'] = randn((1, 64), 64)
    p['v_b'] = randn((1,), 10.0)
    return p


if __name__ == "__main__":
    # Smallest sensible shapes: the 110x110 first conv forces spatial >= 110;
    # 112x112 gives a 5x5 feature map -> 2x2 after pooling -> cnn_out = 8*2*2.
    input_shape = (1, 112, 112)
    output_shape = 6
    filter_sizes = (4, 8, 8)
    batch = 2

    key = jax.random.PRNGKey(0)
    pkey, xkey = jax.random.split(key)
    params = init_params(pkey, input_shape, output_shape, filter_sizes)
    state = jax.random.normal(xkey, (batch, *input_shape), jnp.float32)

    # Static geometry (mirrors the PyTorch dry run in __init__).
    H, W = input_shape[1], input_shape[2]
    Ho, Wo = H + 2 - 110 + 1, W + 2 - 110 + 1
    pool_hw = (Ho // 2, Wo // 2)

    # One-time weight prep, hoisted out of the per-step forward.
    prepped = prepare_weights(params, filter_sizes=filter_sizes,
                              output_shape=output_shape, pool_hw=pool_hw)

    fwd = jax.jit(functools.partial(actor_critic_forward,
                                    filter_sizes=filter_sizes,
                                    output_shape=output_shape))
    pi, v = fwd(state, prepped)
    jax.block_until_ready((pi, v))

    assert pi.shape == (batch, output_shape), pi.shape
    assert v.shape == (batch, 1), v.shape
    assert pi.dtype == jnp.float32 and v.dtype == jnp.float32
    print("KERNEL_OK")
</pallas_src>

<mosaic_0001>
module attributes {stable_mosaic.version = 11 : i64} {
  func.func @_conv_matmul_kernel(%arg0: i32, %arg1: i32, %arg2: memref<56x4096xbf16, #tpu.memory_space<vmem>>, %arg3: memref<4096x128xbf16, #tpu.memory_space<vmem>>, %arg4: memref<1x128xf32, #tpu.memory_space<vmem>>, %arg5: memref<56x128xf32, #tpu.memory_space<vmem>>) attributes {dimension_semantics = [#tpu.dimension_semantics<parallel>, #tpu.dimension_semantics<arbitrary>], iteration_bounds = array<i64: 1, 3>, scalar_prefetch = 0 : i64, scratch_operands = 0 : i64, tpu.core_type = #tpu.core_type<tc>, window_params = [{transform_indices = @transform_0, window_bounds = array<i64: 56, 4096>}, {transform_indices = @transform_1, window_bounds = array<i64: 4096, 128>}, {pipeline_mode = #tpu.pipeline_mode<synchronous>, transform_indices = @transform_2, window_bounds = array<i64: 1, 128>}, {transform_indices = @transform_3, window_bounds = array<i64: 56, 128>}]} {
    %c0_i32 = arith.constant 0 : i32
    %0 = arith.cmpi eq, %arg1, %c0_i32 : i32
    %1 = arith.extui %0 : i1 to i32
    %c0_i32_0 = arith.constant 0 : i32
    %2 = arith.cmpi ne, %1, %c0_i32_0 : i32
    scf.if %2 {
      %cst_9 = arith.constant 0.000000e+00 : f32
      %12 = vector.broadcast %cst_9 : f32 to vector<56x128xf32>
      %c0_10 = arith.constant 0 : index
      %c0_11 = arith.constant 0 : index
      %13 = vector.load %arg5[%c0_10, %c0_11] : memref<56x128xf32, #tpu.memory_space<vmem>>, vector<56x128xf32>
      tpu.vector_store %arg5[%c0_10, %c0_11], %12 {strides = array<i32>} : memref<56x128xf32, #tpu.memory_space<vmem>>, vector<56x128xf32>,
    } else {
    }
    %c0 = arith.constant 0 : index
    %c0_1 = arith.constant 0 : index
    %3 = vector.load %arg5[%c0, %c0_1] : memref<56x128xf32, #tpu.memory_space<vmem>>, vector<56x128xf32>
    %c0_2 = arith.constant 0 : index
    %c0_3 = arith.constant 0 : index
    %4 = vector.load %arg2[%c0_2, %c0_3] : memref<56x4096xbf16, #tpu.memory_space<vmem>>, vector<56x4096xbf16>
    %c0_4 = arith.constant 0 : index
    %c0_5 = arith.constant 0 : index
    %5 = vector.load %arg3[%c0_4, %c0_5] : memref<4096x128xbf16, #tpu.memory_space<vmem>>, vector<4096x128xbf16>
    %cst = arith.constant dense<0.000000e+00> : vector<56x128xf32>
    %6 = tpu.matmul %4, %5, %cst {dimension_numbers = #tpu.dot_dimension_numbers<[1], [0], [0], [1], [0, 0, 1, 1], [], []>} : vector<56x4096xbf16>, vector<4096x128xbf16>, vector<56x128xf32> -> vector<56x128xf32>
    %7 = arith.addf %3, %6 : vector<56x128xf32>
    %c0_6 = arith.constant 0 : index
    %c0_7 = arith.constant 0 : index
    %8 = vector.load %arg5[%c0_6, %c0_7] : memref<56x128xf32, #tpu.memory_space<vmem>>, vector<56x128xf32>
    tpu.vector_store %arg5[%c0_6, %c0_7], %7 {strides = array<i32>} : memref<56x128xf32, #tpu.memory_space<vmem>>, vector<56x128xf32>,
    %c2_i32 = arith.constant 2 : i32
    %9 = arith.cmpi eq, %arg1, %c2_i32 : i32
    %10 = arith.extui %9 : i1 to i32
    %c0_i32_8 = arith.constant 0 : i32
    %11 = arith.cmpi ne, %10, %c0_i32_8 : i32
    scf.if %11 {
      %c0_9 = arith.constant 0 : index
      %c0_10 = arith.constant 0 : index
      %12 = vector.load %arg5[%c0_9, %c0_10] : memref<56x128xf32, #tpu.memory_space<vmem>>, vector<56x128xf32>
      %c0_11 = arith.constant 0 : index
      %c0_12 = arith.constant 0 : index
      %13 = vector.load %arg4[%c0_11, %c0_12] : memref<1x128xf32, #tpu.memory_space<vmem>>, vector<1x128xf32>
      %14 = vector.broadcast %13 : vector<1x128xf32> to vector<56x128xf32>
      %15 = arith.addf %12, %14 : vector<56x128xf32>
      %cst_13 = arith.constant 0.000000e+00 : f32
      %16 = vector.broadcast %cst_13 : f32 to vector<56x128xf32>
      %17 = arith.maximumf %15, %16 : vector<56x128xf32>
      %c0_14 = arith.constant 0 : index
      %c0_15 = arith.constant 0 : index
      %18 = vector.load %arg5[%c0_14, %c0_15] : memref<56x128xf32, #tpu.memory_space<vmem>>, vector<56x128xf32>
      tpu.vector_store %arg5[%c0_14, %c0_15], %17 {strides = array<i32>} : memref<56x128xf32, #tpu.memory_space<vmem>>, vector<56x128xf32>,
    } else {
    }
    return
  }
  func.func @transform_0(%arg0: i32, %arg1: i32) -> (i32, i32) {
    %c0_i32 = arith.constant 0 : i32
    return %arg0, %arg1 : i32, i32
  }
  func.func @transform_1(%arg0: i32, %arg1: i32) -> (i32, i32) {
    %c0_i32 = arith.constant 0 : i32
    %c0_i32_0 = arith.constant 0 : i32
    return %arg1, %c0_i32 : i32, i32
  }
  func.func @transform_2(%arg0: i32, %arg1: i32) -> (i32, i32) {
    %c0_i32 = arith.constant 0 : i32
    %c0_i32_0 = arith.constant 0 : i32
    %c0_i32_1 = arith.constant 0 : i32
    return %c0_i32, %c0_i32_0 : i32, i32
  }
  func.func @transform_3(%arg0: i32, %arg1: i32) -> (i32, i32) {
    %c0_i32 = arith.constant 0 : i32
    %c0_i32_0 = arith.constant 0 : i32
    return %arg0, %c0_i32 : i32, i32
  }
}

module attributes {stable_mosaic.version = 11 : i64} {
  func.func @_conv_matmul_kernel(%arg0: i32, %arg1: i32, %arg2: memref<56x128xbf16, #tpu.memory_space<vmem>>, %arg3: memref<128x128xbf16, #tpu.memory_space<vmem>>, %arg4: memref<1x128xf32, #tpu.memory_space<vmem>>, %arg5: memref<56x128xf32, #tpu.memory_space<vmem>>) attributes {dimension_semantics = [#tpu.dimension_semantics<parallel>, #tpu.dimension_semantics<arbitrary>], iteration_bounds = array<i64: 1, 1>, scalar_prefetch = 0 : i64, scratch_operands = 0 : i64, tpu.core_type = #tpu.core_type<tc>, window_params = [{transform_indices = @transform_0, window_bounds = array<i64: 56, 128>}, {transform_indices = @transform_1, window_bounds = array<i64: 128, 128>}, {pipeline_mode = #tpu.pipeline_mode<synchronous>, transform_indices = @transform_2, window_bounds = array<i64: 1, 128>}, {transform_indices = @transform_3, window_bounds = array<i64: 56, 128>}]} {
    %c0_i32 = arith.constant 0 : i32
    %0 = arith.cmpi eq, %arg1, %c0_i32 : i32
    %1 = arith.extui %0 : i1 to i32
    %c0_i32_0 = arith.constant 0 : i32
    %2 = arith.cmpi ne, %1, %c0_i32_0 : i32
    scf.if %2 {
      %cst_10 = arith.constant 0.000000e+00 : f32
      %12 = vector.broadcast %cst_10 : f32 to vector<56x128xf32>
      %c0_11 = arith.constant 0 : index
      %c0_12 = arith.constant 0 : index
      %13 = vector.load %arg5[%c0_11, %c0_12] : memref<56x128xf32, #tpu.memory_space<vmem>>, vector<56x128xf32>
      tpu.vector_store %arg5[%c0_11, %c0_12], %12 {strides = array<i32>} : memref<56x128xf32, #tpu.memory_space<vmem>>, vector<56x128xf32>,
    } else {
    }
    %c0 = arith.constant 0 : index
    %c0_1 = arith.constant 0 : index
    %3 = vector.load %arg5[%c0, %c0_1] : memref<56x128xf32, #tpu.memory_space<vmem>>, vector<56x128xf32>
    %c0_2 = arith.constant 0 : index
    %c0_3 = arith.constant 0 : index
    %4 = vector.load %arg2[%c0_2, %c0_3] : memref<56x128xbf16, #tpu.memory_space<vmem>>, vector<56x128xbf16>
    %c0_4 = arith.constant 0 : index
    %c0_5 = arith.constant 0 : index
    %5 = vector.load %arg3[%c0_4, %c0_5] : memref<128x128xbf16, #tpu.memory_space<vmem>>, vector<128x128xbf16>
    %cst = arith.constant dense<0.000000e+00> : vector<56x128xf32>
    %6 = tpu.matmul %4, %5, %cst {dimension_numbers = #tpu.dot_dimension_numbers<[1], [0], [0], [1], [0, 0, 1, 1], [], []>} : vector<56x128xbf16>, vector<128x128xbf16>, vector<56x128xf32> -> vector<56x128xf32>
    %7 = arith.addf %3, %6 : vector<56x128xf32>
    %c0_6 = arith.constant 0 : index
    %c0_7 = arith.constant 0 : index
    %8 = vector.load %arg5[%c0_6, %c0_7] : memref<56x128xf32, #tpu.memory_space<vmem>>, vector<56x128xf32>
    tpu.vector_store %arg5[%c0_6, %c0_7], %7 {strides = array<i32>} : memref<56x128xf32, #tpu.memory_space<vmem>>, vector<56x128xf32>,
    %c0_i32_8 = arith.constant 0 : i32
    %9 = arith.cmpi eq, %arg1, %c0_i32_8 : i32
    %10 = arith.extui %9 : i1 to i32
    %c0_i32_9 = arith.constant 0 : i32
    %11 = arith.cmpi ne, %10, %c0_i32_9 : i32
    scf.if %11 {
      %c0_10 = arith.constant 0 : index
      %c0_11 = arith.constant 0 : index
      %12 = vector.load %arg5[%c0_10, %c0_11] : memref<56x128xf32, #tpu.memory_space<vmem>>, vector<56x128xf32>
      %c0_12 = arith.constant 0 : index
      %c0_13 = arith.constant 0 : index
      %13 = vector.load %arg4[%c0_12, %c0_13] : memref<1x128xf32, #tpu.memory_space<vmem>>, vector<1x128xf32>
      %14 = vector.broadcast %13 : vector<1x128xf32> to vector<56x128xf32>
      %15 = arith.addf %12, %14 : vector<56x128xf32>
      %cst_14 = arith.constant 0.000000e+00 : f32
      %16 = vector.broadcast %cst_14 : f32 to vector<56x128xf32>
      %17 = arith.maximumf %15, %16 : vector<56x128xf32>
      %c0_15 = arith.constant 0 : index
      %c0_16 = arith.constant 0 : index
      %18 = vector.load %arg5[%c0_15, %c0_16] : memref<56x128xf32, #tpu.memory_space<vmem>>, vector<56x128xf32>
      tpu.vector_store %arg5[%c0_15, %c0_16], %17 {strides = array<i32>} : memref<56x128xf32, #tpu.memory_space<vmem>>, vector<56x128xf32>,
    } else {
    }
    return
  }
  func.func @transform_0(%arg0: i32, %arg1: i32) -> (i32, i32) {
    %c0_i32 = arith.constant 0 : i32
    return %arg0, %arg1 : i32, i32
  }
  func.func @transform_1(%arg0: i32, %arg1: i32) -> (i32, i32) {
    %c0_i32 = arith.constant 0 : i32
    %c0_i32_0 = arith.constant 0 : i32
    return %arg1, %c0_i32 : i32, i32
  }
  func.func @transform_2(%arg0: i32, %arg1: i32) -> (i32, i32) {
    %c0_i32 = arith.constant 0 : i32
    %c0_i32_0 = arith.constant 0 : i32
    %c0_i32_1 = arith.constant 0 : i32
    return %c0_i32, %c0_i32_0 : i32, i32
  }
  func.func @transform_3(%arg0: i32, %arg1: i32) -> (i32, i32) {
    %c0_i32 = arith.constant 0 : i32
    %c0_i32_0 = arith.constant 0 : i32
    return %arg0, %c0_i32 : i32, i32
  }
}

module attributes {stable_mosaic.version = 11 : i64} {
  func.func @_fc_tail_kernel(%arg0: i32, %arg1: memref<8x128xbf16, #tpu.memory_space<vmem>>, %arg2: memref<128x128xbf16, #tpu.memory_space<vmem>>, %arg3: memref<1x128xf32, #tpu.memory_space<vmem>>, %arg4: memref<128x128xbf16, #tpu.memory_space<vmem>>, %arg5: memref<1x128xf32, #tpu.memory_space<vmem>>, %arg6: memref<128x128xbf16, #tpu.memory_space<vmem>>, %arg7: memref<1x128xf32, #tpu.memory_space<vmem>>, %arg8: memref<8x128xf32, #tpu.memory_space<vmem>>) attributes {dimension_semantics = [#tpu.dimension_semantics<arbitrary>], iteration_bounds = array<i64: 1>, scalar_prefetch = 0 : i64, scratch_operands = 0 : i64, tpu.core_type = #tpu.core_type<tc>, window_params = [{pipeline_mode = #tpu.pipeline_mode<synchronous>, transform_indices = @transform_0, window_bounds = array<i64: 8, 128>}, {pipeline_mode = #tpu.pipeline_mode<synchronous>, transform_indices = @transform_1, window_bounds = array<i64: 128, 128>}, {pipeline_mode = #tpu.pipeline_mode<synchronous>, transform_indices = @transform_2, window_bounds = array<i64: 1, 128>}, {pipeline_mode = #tpu.pipeline_mode<synchronous>, transform_indices = @transform_3, window_bounds = array<i64: 128, 128>}, {pipeline_mode = #tpu.pipeline_mode<synchronous>, transform_indices = @transform_4, window_bounds = array<i64: 1, 128>}, {pipeline_mode = #tpu.pipeline_mode<synchronous>, transform_indices = @transform_5, window_bounds = array<i64: 128, 128>}, {pipeline_mode = #tpu.pipeline_mode<synchronous>, transform_indices = @transform_6, window_bounds = array<i64: 1, 128>}, {pipeline_mode = #tpu.pipeline_mode<synchronous>, transform_indices = @transform_7, window_bounds = array<i64: 8, 128>}]} {
    %c0 = arith.constant 0 : index
    %c0_0 = arith.constant 0 : index
    %0 = vector.load %arg1[%c0, %c0_0] : memref<8x128xbf16, #tpu.memory_space<vmem>>, vector<8x128xbf16>
    %c0_1 = arith.constant 0 : index
    %c0_2 = arith.constant 0 : index
    %1 = vector.load %arg2[%c0_1, %c0_2] : memref<128x128xbf16, #tpu.memory_space<vmem>>, vector<128x128xbf16>
    %cst = arith.constant dense<0.000000e+00> : vector<8x128xf32>
    %2 = tpu.matmul %0, %1, %cst {dimension_numbers = #tpu.dot_dimension_numbers<[1], [0], [0], [1], [0, 0, 1, 1], [], []>} : vector<8x128xbf16>, vector<128x128xbf16>, vector<8x128xf32> -> vector<8x128xf32>
    %c0_3 = arith.constant 0 : index
    %c0_4 = arith.constant 0 : index
    %3 = vector.load %arg3[%c0_3, %c0_4] : memref<1x128xf32, #tpu.memory_space<vmem>>, vector<1x128xf32>
    %4 = vector.broadcast %3 : vector<1x128xf32> to vector<8x128xf32>
    %5 = arith.addf %2, %4 : vector<8x128xf32>
    %cst_5 = arith.constant 0.000000e+00 : f32
    %6 = vector.broadcast %cst_5 : f32 to vector<8x128xf32>
    %7 = arith.maximumf %5, %6 : vector<8x128xf32>
    %8 = arith.truncf %7 : vector<8x128xf32> to vector<8x128xbf16>
    %c0_6 = arith.constant 0 : index
    %c0_7 = arith.constant 0 : index
    %9 = vector.load %arg4[%c0_6, %c0_7] : memref<128x128xbf16, #tpu.memory_space<vmem>>, vector<128x128xbf16>
    %cst_8 = arith.constant dense<0.000000e+00> : vector<8x128xf32>
    %10 = tpu.matmul %8, %9, %cst_8 {dimension_numbers = #tpu.dot_dimension_numbers<[1], [0], [0], [1], [0, 0, 1, 1], [], []>} : vector<8x128xbf16>, vector<128x128xbf16>, vector<8x128xf32> -> vector<8x128xf32>
    %c0_9 = arith.constant 0 : index
    %c0_10 = arith.constant 0 : index
    %11 = vector.load %arg5[%c0_9, %c0_10] : memref<1x128xf32, #tpu.memory_space<vmem>>, vector<1x128xf32>
    %12 = vector.broadcast %11 : vector<1x128xf32> to vector<8x128xf32>
    %13 = arith.addf %10, %12 : vector<8x128xf32>
    %cst_11 = arith.constant 0.000000e+00 : f32
    %14 = vector.broadcast %cst_11 : f32 to vector<8x128xf32>
    %15 = arith.maximumf %13, %14 : vector<8x128xf32>
    %16 = arith.truncf %15 : vector<8x128xf32> to vector<8x128xbf16>
    %c0_12 = arith.constant 0 : index
    %c0_13 = arith.constant 0 : index
    %17 = vector.load %arg6[%c0_12, %c0_13] : memref<128x128xbf16, #tpu.memory_space<vmem>>, vector<128x128xbf16>
    %cst_14 = arith.constant dense<0.000000e+00> : vector<8x128xf32>
    %18 = tpu.matmul %16, %17, %cst_14 {dimension_numbers = #tpu.dot_dimension_numbers<[1], [0], [0], [1], [0, 0, 1, 1], [], []>} : vector<8x128xbf16>, vector<128x128xbf16>, vector<8x128xf32> -> vector<8x128xf32>
    %c0_15 = arith.constant 0 : index
    %c0_16 = arith.constant 0 : index
    %19 = vector.load %arg7[%c0_15, %c0_16] : memref<1x128xf32, #tpu.memory_space<vmem>>, vector<1x128xf32>
    %20 = vector.broadcast %19 : vector<1x128xf32> to vector<8x128xf32>
    %21 = arith.addf %18, %20 : vector<8x128xf32>
    %c0_17 = arith.constant 0 : index
    %c0_18 = arith.constant 0 : index
    %22 = vector.load %arg8[%c0_17, %c0_18] : memref<8x128xf32, #tpu.memory_space<vmem>>, vector<8x128xf32>
    tpu.vector_store %arg8[%c0_17, %c0_18], %21 {strides = array<i32>} : memref<8x128xf32, #tpu.memory_space<vmem>>, vector<8x128xf32>,
    return
  }
  func.func @transform_0(%arg0: i32) -> (i32, i32) {
    %c0_i32 = arith.constant 0 : i32
    %c0_i32_0 = arith.constant 0 : i32
    %c0_i32_1 = arith.constant 0 : i32
    return %c0_i32, %c0_i32_0 : i32, i32
  }
  func.func @transform_1(%arg0: i32) -> (i32, i32) {
    %c0_i32 = arith.constant 0 : i32
    %c0_i32_0 = arith.constant 0 : i32
    %c0_i32_1 = arith.constant 0 : i32
    return %c0_i32, %c0_i32_0 : i32, i32
  }
  func.func @transform_2(%arg0: i32) -> (i32, i32) {
    %c0_i32 = arith.constant 0 : i32
    %c0_i32_0 = arith.constant 0 : i32
    %c0_i32_1 = arith.constant 0 : i32
    return %c0_i32, %c0_i32_0 : i32, i32
  }
  func.func @transform_3(%arg0: i32) -> (i32, i32) {
    %c0_i32 = arith.constant 0 : i32
    %c0_i32_0 = arith.constant 0 : i32
    %c0_i32_1 = arith.constant 0 : i32
    return %c0_i32, %c0_i32_0 : i32, i32
  }
  func.func @transform_4(%arg0: i32) -> (i32, i32) {
    %c0_i32 = arith.constant 0 : i32
    %c0_i32_0 = arith.constant 0 : i32
    %c0_i32_1 = arith.constant 0 : i32
    return %c0_i32, %c0_i32_0 : i32, i32
  }
  func.func @transform_5(%arg0: i32) -> (i32, i32) {
    %c0_i32 = arith.constant 0 : i32
    %c0_i32_0 = arith.constant 0 : i32
    %c0_i32_1 = arith.constant 0 : i32
    return %c0_i32, %c0_i32_0 : i32, i32
  }
  func.func @transform_6(%arg0: i32) -> (i32, i32) {
    %c0_i32 = arith.constant 0 : i32
    %c0_i32_0 = arith.constant 0 : i32
    %c0_i32_1 = arith.constant 0 : i32
    return %c0_i32, %c0_i32_0 : i32, i32
  }
  func.func @transform_7(%arg0: i32) -> (i32, i32) {
    %c0_i32 = arith.constant 0 : i32
    %c0_i32_0 = arith.constant 0 : i32
    %c0_i32_1 = arith.constant 0 : i32
    return %c0_i32, %c0_i32_0 : i32, i32
  }
}

</mosaic_0001>

<bundles_post_ra>
// kernel: actor_critic_forward.4
= control target key start
LH: loop header
LB: loop body
LE: loop exit
PB: predicated region body
PF: predicated region fallthrough
CT: control target
= control target key end

     0   :  { %s5818_s12 = smov 0   ;;  %s5820_s13 = smov 0   ;;  %s6644_s0 = inlined_call_operand.vmem [shape: bf16[56,12288], index: 0, kind: input, shape index: {}]   ;;  %s6645_s1 = inlined_call_operand.vmem [shape: bf16[12288,128], index: 1, kind: input, shape index: {}]   ;;  %s6646_s2 = inlined_call_operand.vmem [shape: f32[1,128], index: 2, kind: input, shape index: {}]   ;;  %s6647_s3 = inlined_call_operand.vmem [shape: f32[56,128], index: 3, kind: output, shape index: {}]  }
   0x1   :  { %s5822_s14 = smov 0   ;;  %s5824_s15 = smov 0  }
   0x2   :  { %s5826_s16 = smov 0  }
   0x3 LB: > { %s22_s17 = sadd.s32 1, %s5791_s15  ;;  %p41_p1 = scmp.ne.s32.totalorder %s5783_s13, %s5779_s12  ;;  %s5795_s16 = sphi %s5826_s16, %s13_s16   ;;  %s5791_s15 = sphi %s5824_s15, %s6651_s15   ;;  %s5787_s14 = sphi %s5822_s14, %s6650_s14   ;;  %s5783_s13 = sphi %s5820_s13, %s6649_s13   ;;  %s5779_s12 = sphi %s5818_s12, %s6648_s12  }
   0x4   : > { %p23_p0 = scmp.ge.s32.totalorder %s22_s17, 3  ;;  %p42_p2 = scmp.eq.s32.totalorder %s5795_s16, 0 }
   0x5   : > { %s34_s19 = sadd.s32 1, %s5783_s13  ;;  %p4388_p5 = scmp.ge.s32.totalorder %s5795_s16, 3 }
   0x6   : > { %s6653_s17 = smov (%p23_p0, %s22_s17), 0  ;;  %p43_p3 = por %p42_p2, %p41_p1 }
   0x7   : > { %s30_s18 = ssub.s32 %s5791_s15, %s6653_s17  ;;  %143 = sbr.rel (%p4388_p5) target bundleno = 75 (0x4b), region = 20 }
   0x8   : > { %p32_p4 = scmp.eq.s32.totalorder %s30_s18, 0 }
   0xa   : > { %s5853_s20 = scalar_select %p32_p4, %s5783_s13, %s34_s19  }
   0xe   : > { %146 = sbr.rel (!%p43_p3) target bundleno = 75 (0x4b), region = 24  ;;  %s148_s21 = sand.u32 (%p43_p3), 1, %s5783_s13  }
   0xf   : > { %s4785_s22 = sshll.u32 (%p43_p3), %s5791_s15, 7  ;;  %s5426_s23 = smul.u32 (%p43_p3), 896, %s148_s21 }
  0x10   : > { %s5861_s26 = scalar_lea.vmem (%p43_p3), %s6644_s0, %s4785_s22 }
  0x11   : > { %v169_v0 = vld [vmem:[%s5861_s26] sm:$0xff] (%p43_p3)  ;;  %v171_v1 = vld [vmem:[%s5861_s26 + $0x8] sm:$0xff] (%p43_p3)  ;;  %v173_v2 = vld [vmem:[%s5861_s26 + $0x10] sm:$0xff] (%p43_p3)  ;;  %s5869_s27 = scalar_lea.vmem (%p43_p3), [#allocation2], %s5426_s23 }
  0x12   : > { %v175_v3 = vld [vmem:[%s5861_s26 + $0x18] sm:$0xff] (%p43_p3)  ;;  %v177_v4 = vld [vmem:[%s5861_s26 + $0x20] sm:$0xff] (%p43_p3)  ;;  %v179_v5 = vld [vmem:[%s5861_s26 + $0x28] sm:$0xff] (%p43_p3)  ;;  %170 = vst [vmem:[%s5869_s27] sm:$0xff] (%p43_p3), %v169_v0 }
  0x13   : > { %172 = vst [vmem:[%s5869_s27 + $0x8] sm:$0xff] (%p43_p3), %v171_v1  ;;  %174 = vst [vmem:[%s5869_s27 + $0x10] sm:$0xff] (%p43_p3), %v173_v2  ;;  %v181_v6 = vld [vmem:[%s5861_s26 + $0x30] sm:$0xff] (%p43_p3)  ;;  %v183_v7 = vld [vmem:[%s5861_s26 + $0x38] sm:$0xff] (%p43_p3) }
  0x14   : > { %176 = vst [vmem:[%s5869_s27 + $0x18] sm:$0xff] (%p43_p3), %v175_v3  ;;  %178 = vst [vmem:[%s5869_s27 + $0x20] sm:$0xff] (%p43_p3), %v177_v4  ;;  %v185_v8 = vld [vmem:[%s5861_s26 + $0x40] sm:$0xff] (%p43_p3)  ;;  %v187_v9 = vld [vmem:[%s5861_s26 + $0x48] sm:$0xff] (%p43_p3) }
  0x15   : > { %180 = vst [vmem:[%s5869_s27 + $0x28] sm:$0xff] %v179_v5  ;;  %182 = vst [vmem:[%s5869_s27 + $0x30] sm:$0xff] %v181_v6  ;;  %v189_v10 = vld [vmem:[%s5861_s26 + $0x50] sm:$0xff]  ;;  %v191_v11 = vld [vmem:[%s5861_s26 + $0x58] sm:$0xff] }
  0x16   : > { %184 = vst [vmem:[%s5869_s27 + $0x38] sm:$0xff] %v183_v7  ;;  %186 = vst [vmem:[%s5869_s27 + $0x40] sm:$0xff] %v185_v8  ;;  %v193_v12 = vld [vmem:[%s5861_s26 + $0x60] sm:$0xff]  ;;  %v195_v13 = vld [vmem:[%s5861_s26 + $0x68] sm:$0xff] }
  0x17   : > { %188 = vst [vmem:[%s5869_s27 + $0x48] sm:$0xff] %v187_v9  ;;  %190 = vst [vmem:[%s5869_s27 + $0x50] sm:$0xff] %v189_v10  ;;  %v197_v14 = vld [vmem:[%s5861_s26 + $0x70] sm:$0xff]  ;;  %v199_v15 = vld [vmem:[%s5861_s26 + $0x78] sm:$0xff] }
  0x18   : > { %192 = vst [vmem:[%s5869_s27 + $0x58] sm:$0xff] %v191_v11  ;;  %194 = vst [vmem:[%s5869_s27 + $0x60] sm:$0xff] %v193_v12  ;;  %v201_v16 = vld [vmem:[%s5861_s26 + $0x180] sm:$0xff]  ;;  %v203_v17 = vld [vmem:[%s5861_s26 + $0x188] sm:$0xff] }
  0x19   : > { %196 = vst [vmem:[%s5869_s27 + $0x68] sm:$0xff] %v195_v13  ;;  %198 = vst [vmem:[%s5869_s27 + $0x70] sm:$0xff] %v197_v14  ;;  %v205_v18 = vld [vmem:[%s5861_s26 + $0x190] sm:$0xff]  ;;  %v207_v19 = vld [vmem:[%s5861_s26 + $0x198] sm:$0xff] }
  0x1a   : > { %200 = vst [vmem:[%s5869_s27 + $0x78] sm:$0xff] %v199_v15  ;;  %202 = vst [vmem:[%s5869_s27 + $0x80] sm:$0xff] %v201_v16  ;;  %v209_v20 = vld [vmem:[%s5861_s26 + $0x1a0] sm:$0xff]  ;;  %v211_v21 = vld [vmem:[%s5861_s26 + $0x1a8] sm:$0xff] }
  0x1b   : > { %204 = vst [vmem:[%s5869_s27 + $0x88] sm:$0xff] %v203_v17  ;;  %206 = vst [vmem:[%s5869_s27 + $0x90] sm:$0xff] %v205_v18  ;;  %v213_v22 = vld [vmem:[%s5861_s26 + $0x1b0] sm:$0xff]  ;;  %v215_v23 = vld [vmem:[%s5861_s26 + $0x1b8] sm:$0xff] }
  0x1c   : > { %208 = vst [vmem:[%s5869_s27 + $0x98] sm:$0xff] %v207_v19  ;;  %210 = vst [vmem:[%s5869_s27 + $0xa0] sm:$0xff] %v209_v20  ;;  %v217_v24 = vld [vmem:[%s5861_s26 + $0x1c0] sm:$0xff]  ;;  %v219_v25 = vld [vmem:[%s5861_s26 + $0x1c8] sm:$0xff] }
  0x1d   : > { %212 = vst [vmem:[%s5869_s27 + $0xa8] sm:$0xff] %v211_v21  ;;  %214 = vst [vmem:[%s5869_s27 + $0xb0] sm:$0xff] %v213_v22  ;;  %v221_v26 = vld [vmem:[%s5861_s26 + $0x1d0] sm:$0xff]  ;;  %v223_v27 = vld [vmem:[%s5861_s26 + $0x1d8] sm:$0xff] }
  0x1e   : > { %216 = vst [vmem:[%s5869_s27 + $0xb8] sm:$0xff] %v215_v23  ;;  %218 = vst [vmem:[%s5869_s27 + $0xc0] sm:$0xff] %v217_v24  ;;  %v225_v28 = vld [vmem:[%s5861_s26 + $0x1e0] sm:$0xff]  ;;  %v227_v29 = vld [vmem:[%s5861_s26 + $0x1e8] sm:$0xff] }
  0x1f   : > { %220 = vst [vmem:[%s5869_s27 + $0xc8] sm:$0xff] %v219_v25  ;;  %222 = vst [vmem:[%s5869_s27 + $0xd0] sm:$0xff] %v221_v26  ;;  %v229_v30 = vld [vmem:[%s5861_s26 + $0x1f0] sm:$0xff]  ;;  %v231_v31 = vld [vmem:[%s5861_s26 + $0x1f8] sm:$0xff] }
  0x20   : > { %224 = vst [vmem:[%s5869_s27 + $0xd8] sm:$0xff] %v223_v27  ;;  %226 = vst [vmem:[%s5869_s27 + $0xe0] sm:$0xff] %v225_v28  ;;  %v233_v32 = vld [vmem:[%s5861_s26 + $0x300] sm:$0xff]  ;;  %v235_v33 = vld [vmem:[%s5861_s26 + $0x308] sm:$0xff] }
  0x21   : > { %228 = vst [vmem:[%s5869_s27 + $0xe8] sm:$0xff] %v227_v29  ;;  %230 = vst [vmem:[%s5869_s27 + $0xf0] sm:$0xff] %v229_v30  ;;  %v237_v34 = vld [vmem:[%s5861_s26 + $0x310] sm:$0xff]  ;;  %v239_v35 = vld [vmem:[%s5861_s26 + $0x318] sm:$0xff] }
  0x22   : > { %232 = vst [vmem:[%s5869_s27 + $0xf8] sm:$0xff] %v231_v31  ;;  %234 = vst [vmem:[%s5869_s27 + $0x100] sm:$0xff] %v233_v32  ;;  %v241_v36 = vld [vmem:[%s5861_s26 + $0x320] sm:$0xff]  ;;  %v243_v37 = vld [vmem:[%s5861_s26 + $0x328] sm:$0xff] }
  0x23   : > { %236 = vst [vmem:[%s5869_s27 + $0x108] sm:$0xff] %v235_v33  ;;  %238 = vst [vmem:[%s5869_s27 + $0x110] sm:$0xff] %v237_v34  ;;  %v245_v38 = vld [vmem:[%s5861_s26 + $0x330] sm:$0xff]  ;;  %v247_v39 = vld [vmem:[%s5861_s26 + $0x338] sm:$0xff] }
  0x24   : > { %240 = vst [vmem:[%s5869_s27 + $0x118] sm:$0xff] %v239_v35  ;;  %242 = vst [vmem:[%s5869_s27 + $0x120] sm:$0xff] %v241_v36  ;;  %v249_v40 = vld [vmem:[%s5861_s26 + $0x340] sm:$0xff]  ;;  %v251_v41 = vld [vmem:[%s5861_s26 + $0x348] sm:$0xff] }
  0x25   : > { %244 = vst [vmem:[%s5869_s27 + $0x128] sm:$0xff] %v243_v37  ;;  %246 = vst [vmem:[%s5869_s27 + $0x130] sm:$0xff] %v245_v38  ;;  %v253_v42 = vld [vmem:[%s5861_s26 + $0x350] sm:$0xff]  ;;  %v255_v43 = vld [vmem:[%s5861_s26 + $0x358] sm:$0xff] }
  0x26   : > { %248 = vst [vmem:[%s5869_s27 + $0x138] sm:$0xff] %v247_v39  ;;  %250 = vst [vmem:[%s5869_s27 + $0x140] sm:$0xff] %v249_v40  ;;  %v257_v44 = vld [vmem:[%s5861_s26 + $0x360] sm:$0xff]  ;;  %v259_v45 = vld [vmem:[%s5861_s26 + $0x368] sm:$0xff] }
  0x27   : > { %252 = vst [vmem:[%s5869_s27 + $0x148] sm:$0xff] %v251_v41  ;;  %254 = vst [vmem:[%s5869_s27 + $0x150] sm:$0xff] %v253_v42  ;;  %v261_v46 = vld [vmem:[%s5861_s26 + $0x370] sm:$0xff]  ;;  %v263_v47 = vld [vmem:[%s5861_s26 + $0x378] sm:$0xff] }
  0x28   : > { %256 = vst [vmem:[%s5869_s27 + $0x158] sm:$0xff] %v255_v43  ;;  %258 = vst [vmem:[%s5869_s27 + $0x160] sm:$0xff] %v257_v44  ;;  %v265_v48 = vld [vmem:[%s5861_s26 + $0x480] sm:$0xff]  ;;  %v267_v49 = vld [vmem:[%s5861_s26 + $0x488] sm:$0xff] }
  0x29   : > { %260 = vst [vmem:[%s5869_s27 + $0x168] sm:$0xff] %v259_v45  ;;  %262 = vst [vmem:[%s5869_s27 + $0x170] sm:$0xff] %v261_v46  ;;  %v269_v50 = vld [vmem:[%s5861_s26 + $0x490] sm:$0xff]  ;;  %v271_v51 = vld [vmem:[%s5861_s26 + $0x498] sm:$0xff] }
  0x2a   : > { %264 = vst [vmem:[%s5869_s27 + $0x178] sm:$0xff] %v263_v47  ;;  %266 = vst [vmem:[%s5869_s27 + $0x180] sm:$0xff] %v265_v48  ;;  %v273_v52 = vld [vmem:[%s5861_s26 + $0x4a0] sm:$0xff]  ;;  %v275_v53 = vld [vmem:[%s5861_s26 + $0x4a8] sm:$0xff] }
  0x2b   : > { %268 = vst [vmem:[%s5869_s27 + $0x188] sm:$0xff] %v267_v49  ;;  %270 = vst [vmem:[%s5869_s27 + $0x190] sm:$0xff] %v269_v50  ;;  %v277_v54 = vld [vmem:[%s5861_s26 + $0x4b0] sm:$0xff]  ;;  %v279_v55 = vld [vmem:[%s5861_s26 + $0x4b8] sm:$0xff] }
  0x2c   : > { %272 = vst [vmem:[%s5869_s27 + $0x198] sm:$0xff] %v271_v51  ;;  %274 = vst [vmem:[%s5869_s27 + $0x1a0] sm:$0xff] %v273_v52  ;;  %v281_v56 = vld [vmem:[%s5861_s26 + $0x4c0] sm:$0xff]  ;;  %v283_v57 = vld [vmem:[%s5861_s26 + $0x4c8] sm:$0xff] }
  0x2d   : > { %276 = vst [vmem:[%s5869_s27 + $0x1a8] sm:$0xff] %v275_v53  ;;  %278 = vst [vmem:[%s5869_s27 + $0x1b0] sm:$0xff] %v277_v54  ;;  %v285_v58 = vld [vmem:[%s5861_s26 + $0x4d0] sm:$0xff]  ;;  %v287_v59 = vld [vmem:[%s5861_s26 + $0x4d8] sm:$0xff] }
  0x2e   : > { %280 = vst [vmem:[%s5869_s27 + $0x1b8] sm:$0xff] %v279_v55  ;;  %282 = vst [vmem:[%s5869_s27 + $0x1c0] sm:$0xff] %v281_v56  ;;  %v289_v60 = vld [vmem:[%s5861_s26 + $0x4e0] sm:$0xff]  ;;  %v291_v61 = vld [vmem:[%s5861_s26 + $0x4e8] sm:$0xff] }
  0x2f   : > { %284 = vst [vmem:[%s5869_s27 + $0x1c8] sm:$0xff] %v283_v57  ;;  %286 = vst [vmem:[%s5869_s27 + $0x1d0] sm:$0xff] %v285_v58  ;;  %v293_v62 = vld [vmem:[%s5861_s26 + $0x4f0] sm:$0xff]  ;;  %v295_v63 = vld [vmem:[%s5861_s26 + $0x4f8] sm:$0xff] }
  0x30   : > { %288 = vst [vmem:[%s5869_s27 + $0x1d8] sm:$0xff] %v287_v59  ;;  %290 = vst [vmem:[%s5869_s27 + $0x1e0] sm:$0xff] %v289_v60  ;;  %v297_v0 = vld [vmem:[%s5861_s26 + $0x600] sm:$0xff]  ;;  %v299_v1 = vld [vmem:[%s5861_s26 + $0x608] sm:$0xff] }
  0x31   : > { %292 = vst [vmem:[%s5869_s27 + $0x1e8] sm:$0xff] %v291_v61  ;;  %294 = vst [vmem:[%s5869_s27 + $0x1f0] sm:$0xff] %v293_v62  ;;  %v301_v2 = vld [vmem:[%s5861_s26 + $0x610] sm:$0xff]  ;;  %v303_v3 = vld [vmem:[%s5861_s26 + $0x618] sm:$0xff] }
  0x32   : > { %296 = vst [vmem:[%s5869_s27 + $0x1f8] sm:$0xff] %v295_v63  ;;  %298 = vst [vmem:[%s5869_s27 + $0x200] sm:$0xff] %v297_v0  ;;  %v305_v4 = vld [vmem:[%s5861_s26 + $0x620] sm:$0xff]  ;;  %v307_v5 = vld [vmem:[%s5861_s26 + $0x628] sm:$0xff] }
  0x33   : > { %300 = vst [vmem:[%s5869_s27 + $0x208] sm:$0xff] %v299_v1  ;;  %302 = vst [vmem:[%s5869_s27 + $0x210] sm:$0xff] %v301_v2  ;;  %v309_v6 = vld [vmem:[%s5861_s26 + $0x630] sm:$0xff]  ;;  %v311_v7 = vld [vmem:[%s5861_s26 + $0x638] sm:$0xff] }
  0x34   : > { %304 = vst [vmem:[%s5869_s27 + $0x218] sm:$0xff] %v303_v3  ;;  %306 = vst [vmem:[%s5869_s27 + $0x220] sm:$0xff] %v305_v4  ;;  %v313_v8 = vld [vmem:[%s5861_s26 + $0x640] sm:$0xff]  ;;  %v315_v9 = vld [vmem:[%s5861_s26 + $0x648] sm:$0xff] }
  0x35   : > { %308 = vst [vmem:[%s5869_s27 + $0x228] sm:$0xff] %v307_v5  ;;  %310 = vst [vmem:[%s5869_s27 + $0x230] sm:$0xff] %v309_v6  ;;  %v317_v10 = vld [vmem:[%s5861_s26 + $0x650] sm:$0xff]  ;;  %v319_v11 = vld [vmem:[%s5861_s26 + $0x658] sm:$0xff] }
  0x36   : > { %312 = vst [vmem:[%s5869_s27 + $0x238] sm:$0xff] %v311_v7  ;;  %314 = vst [vmem:[%s5869_s27 + $0x240] sm:$0xff] %v313_v8  ;;  %v321_v12 = vld [vmem:[%s5861_s26 + $0x660] sm:$0xff]  ;;  %v323_v13 = vld [vmem:[%s5861_s26 + $0x668] sm:$0xff] }
  0x37   : > { %316 = vst [vmem:[%s5869_s27 + $0x248] sm:$0xff] %v315_v9  ;;  %318 = vst [vmem:[%s5869_s27 + $0x250] sm:$0xff] %v317_v10  ;;  %v325_v14 = vld [vmem:[%s5861_s26 + $0x670] sm:$0xff]  ;;  %v327_v15 = vld [vmem:[%s5861_s26 + $0x678] sm:$0xff] }
  0x38   : > { %320 = vst [vmem:[%s5869_s27 + $0x258] sm:$0xff] %v319_v11  ;;  %322 = vst [vmem:[%s5869_s27 + $0x260] sm:$0xff] %v321_v12  ;;  %v329_v16 = vld [vmem:[%s5861_s26 + $0x780] sm:$0xff]  ;;  %v331_v17 = vld [vmem:[%s5861_s26 + $0x788] sm:$0xff] }
  0x39   : > { %324 = vst [vmem:[%s5869_s27 + $0x268] sm:$0xff] %v323_v13  ;;  %326 = vst [vmem:[%s5869_s27 + $0x270] sm:$0xff] %v325_v14  ;;  %v333_v18 = vld [vmem:[%s5861_s26 + $0x790] sm:$0xff]  ;;  %v335_v19 = vld [vmem:[%s5861_s26 + $0x798] sm:$0xff] }
  0x3a   : > { %328 = vst [vmem:[%s5869_s27 + $0x278] sm:$0xff] %v327_v15  ;;  %330 = vst [vmem:[%s5869_s27 + $0x280] sm:$0xff] %v329_v16  ;;  %v337_v20 = vld [vmem:[%s5861_s26 + $0x7a0] sm:$0xff]  ;;  %v339_v21 = vld [vmem:[%s5861_s26 + $0x7a8] sm:$0xff] }
  0x3b   : > { %332 = vst [vmem:[%s5869_s27 + $0x288] sm:$0xff] %v331_v17  ;;  %334 = vst [vmem:[%s5869_s27 + $0x290] sm:$0xff] %v333_v18  ;;  %v341_v22 = vld [vmem:[%s5861_s26 + $0x7b0] sm:$0xff]  ;;  %v343_v23 = vld [vmem:[%s5861_s26 + $0x7b8] sm:$0xff] }
  0x3c   : > { %336 = vst [vmem:[%s5869_s27 + $0x298] sm:$0xff] %v335_v19  ;;  %338 = vst [vmem:[%s5869_s27 + $0x2a0] sm:$0xff] %v337_v20  ;;  %v345_v24 = vld [vmem:[%s5861_s26 + $0x7c0] sm:$0xff]  ;;  %v347_v25 = vld [vmem:[%s5861_s26 + $0x7c8] sm:$0xff] }
  0x3d   : > { %340 = vst [vmem:[%s5869_s27 + $0x2a8] sm:$0xff] %v339_v21  ;;  %342 = vst [vmem:[%s5869_s27 + $0x2b0] sm:$0xff] %v341_v22  ;;  %v349_v26 = vld [vmem:[%s5861_s26 + $0x7d0] sm:$0xff]  ;;  %v351_v27 = vld [vmem:[%s5861_s26 + $0x7d8] sm:$0xff] }
  0x3e   : > { %344 = vst [vmem:[%s5869_s27 + $0x2b8] sm:$0xff] %v343_v23  ;;  %346 = vst [vmem:[%s5869_s27 + $0x2c0] sm:$0xff] %v345_v24  ;;  %v353_v28 = vld [vmem:[%s5861_s26 + $0x7e0] sm:$0xff]  ;;  %v355_v29 = vld [vmem:[%s5861_s26 + $0x7e8] sm:$0xff] }
  0x3f   : > { %348 = vst [vmem:[%s5869_s27 + $0x2c8] sm:$0xff] %v347_v25  ;;  %350 = vst [vmem:[%s5869_s27 + $0x2d0] sm:$0xff] %v349_v26  ;;  %v357_v30 = vld [vmem:[%s5861_s26 + $0x7f0] sm:$0xff]  ;;  %v359_v31 = vld [vmem:[%s5861_s26 + $0x7f8] sm:$0xff] }
  0x40   : > { %352 = vst [vmem:[%s5869_s27 + $0x2d8] sm:$0xff] %v351_v27  ;;  %354 = vst [vmem:[%s5869_s27 + $0x2e0] sm:$0xff] %v353_v28  ;;  %v361_v32 = vld [vmem:[%s5861_s26 + $0x900] sm:$0xff]  ;;  %v363_v33 = vld [vmem:[%s5861_s26 + $0x908] sm:$0xff] }
  0x41   : > { %356 = vst [vmem:[%s5869_s27 + $0x2e8] sm:$0xff] %v355_v29  ;;  %358 = vst [vmem:[%s5869_s27 + $0x2f0] sm:$0xff] %v357_v30  ;;  %v365_v34 = vld [vmem:[%s5861_s26 + $0x910] sm:$0xff]  ;;  %v367_v35 = vld [vmem:[%s5861_s26 + $0x918] sm:$0xff] }
  0x42   : > { %360 = vst [vmem:[%s5869_s27 + $0x2f8] sm:$0xff] %v359_v31  ;;  %362 = vst [vmem:[%s5869_s27 + $0x300] sm:$0xff] %v361_v32  ;;  %v369_v36 = vld [vmem:[%s5861_s26 + $0x920] sm:$0xff]  ;;  %v371_v37 = vld [vmem:[%s5861_s26 + $0x928] sm:$0xff] }
  0x43   : > { %364 = vst [vmem:[%s5869_s27 + $0x308] sm:$0xff] %v363_v33  ;;  %366 = vst [vmem:[%s5869_s27 + $0x310] sm:$0xff] %v365_v34  ;;  %v373_v38 = vld [vmem:[%s5861_s26 + $0x930] sm:$0xff]  ;;  %v375_v39 = vld [vmem:[%s5861_s26 + $0x938] sm:$0xff] }
  0x44   : > { %368 = vst [vmem:[%s5869_s27 + $0x318] sm:$0xff] %v367_v35  ;;  %370 = vst [vmem:[%s5869_s27 + $0x320] sm:$0xff] %v369_v36  ;;  %v377_v40 = vld [vmem:[%s5861_s26 + $0x940] sm:$0xff]  ;;  %v379_v41 = vld [vmem:[%s5861_s26 + $0x948] sm:$0xff] }
  0x45   : > { %372 = vst [vmem:[%s5869_s27 + $0x328] sm:$0xff] %v371_v37  ;;  %374 = vst [vmem:[%s5869_s27 + $0x330] sm:$0xff] %v373_v38  ;;  %v381_v42 = vld [vmem:[%s5861_s26 + $0x950] sm:$0xff]  ;;  %v383_v43 = vld [vmem:[%s5861_s26 + $0x958] sm:$0xff] }
  0x46   : > { %376 = vst [vmem:[%s5869_s27 + $0x338] sm:$0xff] %v375_v39  ;;  %378 = vst [vmem:[%s5869_s27 + $0x340] sm:$0xff] %v377_v40  ;;  %v385_v44 = vld [vmem:[%s5861_s26 + $0x960] sm:$0xff]  ;;  %v387_v45 = vld [vmem:[%s5861_s26 + $0x968] sm:$0xff] }
  0x47   : > { %380 = vst [vmem:[%s5869_s27 + $0x348] sm:$0xff] %v379_v41  ;;  %382 = vst [vmem:[%s5869_s27 + $0x350] sm:$0xff] %v381_v42  ;;  %v389_v46 = vld [vmem:[%s5861_s26 + $0x970] sm:$0xff]  ;;  %v391_v47 = vld [vmem:[%s5861_s26 + $0x978] sm:$0xff] }
  0x48   : > { %384 = vst [vmem:[%s5869_s27 + $0x358] sm:$0xff] %v383_v43  ;;  %386 = vst [vmem:[%s5869_s27 + $0x360] sm:$0xff] %v385_v44 }
  0x49   : > { %388 = vst [vmem:[%s5869_s27 + $0x368] sm:$0xff] %v387_v45  ;;  %390 = vst [vmem:[%s5869_s27 + $0x370] sm:$0xff] %v389_v46 }
  0x4a   : > { %392 = vst [vmem:[%s5869_s27 + $0x378] sm:$0xff] %v391_v47 }
  0x4b PF: > { %p4391_p6 = scmp.ge.s32.totalorder %s5795_s16, 1  ;;  %p406_p7 = scmp.lt.s32.totalorder %s5795_s16, 4 }
  0x4d   : > { %p407_p8 = pnand %p4391_p6, %p406_p7 }
  0x4e   : > { %s413_s28 = sand.u32 (!%p407_p8), 1, %s5779_s12   ;;  %s4392_s29 = sshll.u32 (!%p407_p8), %s5787_s14, 9 }
  0x4f   : > { %410 = sbr.rel (%p407_p8) target bundleno = 621 (0x26d), region = 51  ;;  %p444_p9 = scmp.lt.s32.totalorder (!%p407_p8), %s4392_s29, 1535 }
  0x50   : > { %s5427_s30 = smul.u32 (!%p407_p8), 896, %s413_s28  ;;  %p4394_p10 = scmp.ne.s32.totalorder (!%p407_p8), %s5787_s14, 0 }
  0x52   : > { %s6098_s8 = scalar_lea.vmem (!%p407_p8), [#allocation2], %s5427_s30 }
  0x56   : > { %s6655_s29 = smov (!%p444_p9, %s4392_s29), 1535  ;;  %459 = sbr.rel (%p4394_p10) target bundleno = 93 (0x5d), region = 59 }
  0x57   : > { %s4393_s4 = sshll.u32 %s6655_s29, 2  ;;  %v5797_v48 = vmov (!%p4394_p10), 0.0  }
  0x58   : > { %s6096_s7 = scalar_lea.vmem %s6645_s1, %s4393_s4  ;;  %460 = vst [vmem:[%s6647_s3] sm:$0xff] (!%p4394_p10), %v5797_v48  ;;  %461 = vst [vmem:[%s6647_s3 + $0x8] sm:$0xff] (!%p4394_p10), %v5797_v48 }
  0x59   : > { %462 = vst [vmem:[%s6647_s3 + $0x10] sm:$0xff] (!%p4394_p10), %v5797_v48  ;;  %463 = vst [vmem:[%s6647_s3 + $0x18] sm:$0xff] (!%p4394_p10), %v5797_v48 }
  0x5a   : > { %464 = vst [vmem:[%s6647_s3 + $0x20] sm:$0xff] (!%p4394_p10), %v5797_v48  ;;  %465 = vst [vmem:[%s6647_s3 + $0x28] sm:$0xff] (!%p4394_p10), %v5797_v48 }
  0x5b   : > { %466 = vst [vmem:[%s6647_s3 + $0x30] sm:$0xff] (!%p4394_p10), %v5797_v48 }
  0x5d PF: > { %v5469_v49 = vld [vmem:[%s6096_s7 + $0x40] sm:$0xff]   ;;  %v5473_v53 = vld [vmem:[%s6096_s7 + $0x48] sm:$0xff]   ;;  %v5477_v57 = vld [vmem:[%s6096_s7 + $0x50] sm:$0xff]   ;;  %p4779_p11 = scmp.ne.s32.totalorder %s5787_s14, 2 }
  0x5e   : > { %v5470_v50 = vld [vmem:[%s6096_s7 + $0xc0] sm:$0xff]   ;;  %4786 = vmatprep.subr.bf16.mxu0 %v5469_v49  ;;  %v5474_v54 = vld [vmem:[%s6096_s7 + $0xc8] sm:$0xff]   ;;  %v5478_v58 = vld [vmem:[%s6096_s7 + $0xd0] sm:$0xff]  }
  0x5f   : > { %v5471_v51 = vld [vmem:[%s6096_s7] sm:$0xff]   ;;  %4826 = vmatprep.subr.bf16.mxu1 %v5470_v50  ;;  %v5475_v55 = vld [vmem:[%s6096_s7 + $0x8] sm:$0xff]   ;;  %v5479_v59 = vld [vmem:[%s6096_s7 + $0x10] sm:$0xff]  }
  0x60   : > { %v5472_v52 = vld [vmem:[%s6096_s7 + $0x80] sm:$0xff]   ;;  %4787 = vmatpush3.bf16.msra.mxu0 %v5471_v51  ;;  %v5476_v56 = vld [vmem:[%s6096_s7 + $0x88] sm:$0xff]   ;;  %v5480_v60 = vld [vmem:[%s6096_s7 + $0x90] sm:$0xff]  }
  0x61   : > { %4827 = vmatpush3.bf16.msra.mxu1 %v5472_v52  ;;  %4788 = vmatprep.subr.bf16.mxu0 %v5473_v53  ;;  %v5481_v61 = vld [vmem:[%s6096_s7 + $0x58] sm:$0xff]   ;;  %v5485_v1 = vld [vmem:[%s6096_s7 + $0x60] sm:$0xff]   ;;  %v5489_v5 = vld [vmem:[%s6096_s7 + $0x68] sm:$0xff]  }
  0x62   : > { %4828 = vmatprep.subr.bf16.mxu1 %v5474_v54  ;;  %v5482_v62 = vld [vmem:[%s6096_s7 + $0xd8] sm:$0xff]   ;;  %v5486_v2 = vld [vmem:[%s6096_s7 + $0xe0] sm:$0xff]   ;;  %v5490_v6 = vld [vmem:[%s6096_s7 + $0xe8] sm:$0xff]  }
  0x63   : > { %v5483_v63 = vld [vmem:[%s6096_s7 + $0x18] sm:$0xff]   ;;  %v5487_v3 = vld [vmem:[%s6096_s7 + $0x20] sm:$0xff]   ;;  %v5491_v7 = vld [vmem:[%s6096_s7 + $0x28] sm:$0xff]  }
  0x64   : > { %4789 = vmatpush3.bf16.msra.mxu0 %v5475_v55  ;;  %v5484_v0 = vld [vmem:[%s6096_s7 + $0x98] sm:$0xff]   ;;  %v5488_v4 = vld [vmem:[%s6096_s7 + $0xa0] sm:$0xff]   ;;  %v5492_v8 = vld [vmem:[%s6096_s7 + $0xa8] sm:$0xff]  }
  0x65   : > { %4829 = vmatpush3.bf16.msra.mxu1 %v5476_v56  ;;  %4790 = vmatprep.subr.bf16.mxu0 %v5477_v57  ;;  %v5493_v9 = vld [vmem:[%s6096_s7 + $0x70] sm:$0xff]   ;;  %v5497_v13 = vld [vmem:[%s6096_s7 + $0x78] sm:$0xff]   ;;  %v474_v17 = vld [vmem:[%s6098_s8] sm:$0xff] }
  0x66   : > { %4830 = vmatprep.subr.bf16.mxu1 %v5478_v58  ;;  %v5494_v10 = vld [vmem:[%s6096_s7 + $0xf0] sm:$0xff]   ;;  %v5498_v14 = vld [vmem:[%s6096_s7 + $0xf8] sm:$0xff]   ;;  %v490_v18 = vld [vmem:[%s6098_s8 + $0x80] sm:$0xff] }
  0x67   : > { %v5495_v11 = vld [vmem:[%s6096_s7 + $0x30] sm:$0xff]   ;;  %v5499_v15 = vld [vmem:[%s6096_s7 + $0x38] sm:$0xff]   ;;  %v475_v19 = vld [vmem:[%s6098_s8 + $0x8] sm:$0xff]  ;;  %v4395_v20 = vcombine.low %v474_v17, %v490_v18  ;;  %v4396_v21 = vcombine.high %v474_v17, %v490_v18 }
  0x68   : > { %4791 = vmatpush3.bf16.msra.mxu0 %v5479_v59  ;;  %v5496_v12 = vld [vmem:[%s6096_s7 + $0xb0] sm:$0xff]   ;;  %v5500_v16 = vld [vmem:[%s6096_s7 + $0xb8] sm:$0xff]   ;;  %v491_v22 = vld [vmem:[%s6098_s8 + $0x88] sm:$0xff] }
  0x69   : > { %4831 = vmatpush3.bf16.msra.mxu1 %v5480_v60  ;;  %4792 = vmatprep.subr.bf16.mxu0 %v5481_v61  ;;  %v4397_v23 = vcombine.low %v475_v19, %v491_v22  ;;  %v4398_v24 = vcombine.high %v475_v19, %v491_v22  ;;  %v5501_v25 = vld [vmem:[%s6096_s7 + $0x140] sm:$0xff]   ;;  %v5505_v29 = vld [vmem:[%s6096_s7 + $0x148] sm:$0xff]   ;;  %v5509_v41 = vld [vmem:[%s6096_s7 + $0x150] sm:$0xff]  }
  0x6a   : > { %4832 = vmatprep.subr.bf16.mxu1 %v5482_v62  ;;  %3258 = vmatprep.mubr.bf16.mxu0 %v4396_v21  ;;  %v5502_v26 = vld [vmem:[%s6096_s7 + $0x1c0] sm:$0xff]   ;;  %v5506_v30 = vld [vmem:[%s6096_s7 + $0x1c8] sm:$0xff]   ;;  %v5510_v42 = vld [vmem:[%s6096_s7 + $0x1d0] sm:$0xff]  }
  0x6b   : > { %3322 = vmatprep.mubr.bf16.mxu1 %v4398_v24  ;;  %v5503_v27 = vld [vmem:[%s6096_s7 + $0x100] sm:$0xff]   ;;  %v5507_v31 = vld [vmem:[%s6096_s7 + $0x108] sm:$0xff]   ;;  %v5511_v43 = vld [vmem:[%s6096_s7 + $0x110] sm:$0xff]  }
  0x6c   : > { %4793 = vmatpush3.bf16.msra.mxu0 %v5483_v63  ;;  %v5504_v28 = vld [vmem:[%s6096_s7 + $0x180] sm:$0xff]   ;;  %v5508_v32 = vld [vmem:[%s6096_s7 + $0x188] sm:$0xff]   ;;  %v5512_v44 = vld [vmem:[%s6096_s7 + $0x190] sm:$0xff]  }
  0x6d   : > { %4833 = vmatpush3.bf16.msra.mxu1 %v5484_v0  ;;  %4794 = vmatprep.subr.bf16.mxu0 %v5485_v1  ;;  %v506_v33 = vld [vmem:[%s6098_s8 + $0x100] sm:$0xff]  ;;  %v507_v36 = vld [vmem:[%s6098_s8 + $0x108] sm:$0xff]  ;;  %v5513_v45 = vld [vmem:[%s6096_s7 + $0x158] sm:$0xff]  }
  0x6e   : > { %4834 = vmatprep.subr.bf16.mxu1 %v5486_v2  ;;  %v522_v34 = vld [vmem:[%s6098_s8 + $0x180] sm:$0xff]  ;;  %v523_v37 = vld [vmem:[%s6098_s8 + $0x188] sm:$0xff]  ;;  %v5514_v46 = vld [vmem:[%s6096_s7 + $0x1d8] sm:$0xff]  }
  0x6f   : > { %v4428_v35 = vcombine.high %v506_v33, %v522_v34  ;;  %v4427_v38 = vcombine.low %v506_v33, %v522_v34  ;;  %v4430_v39 = vcombine.high %v507_v36, %v523_v37  ;;  %v4429_v40 = vcombine.low %v507_v36, %v523_v37  ;;  %v5515_v47 = vld [vmem:[%s6096_s7 + $0x118] sm:$0xff]   ;;  %v538_v49 = vld [vmem:[%s6098_s8 + $0x200] sm:$0xff]  ;;  %v539_v51 = vld [vmem:[%s6098_s8 + $0x208] sm:$0xff] }
  0x70   : > { %4795 = vmatpush3.bf16.msra.mxu0 %v5487_v3  ;;  %v5516_v48 = vld [vmem:[%s6096_s7 + $0x198] sm:$0xff]   ;;  %v554_v50 = vld [vmem:[%s6098_s8 + $0x280] sm:$0xff]  ;;  %v555_v52 = vld [vmem:[%s6098_s8 + $0x288] sm:$0xff] }
  0x71   : > { %4835 = vmatpush3.bf16.msra.mxu1 %v5488_v4  ;;  %4796 = vmatprep.subr.bf16.mxu0 %v5489_v5  ;;  %v4460_v53 = vcombine.high %v538_v49, %v554_v50  ;;  %v4462_v54 = vcombine.high %v539_v51, %v555_v52  ;;  %v4459_v55 = vcombine.low %v538_v49, %v554_v50  ;;  %v5517_v57 = vld [vmem:[%s6096_s7 + $0x160] sm:$0xff]   ;;  %v5521_v61 = vld [vmem:[%s6096_s7 + $0x168] sm:$0xff]   ;;  %v477_v17 = vld [vmem:[%s6098_s8 + $0x18] sm:$0xff] }
  0x72   : > { %4836 = vmatprep.subr.bf16.mxu1 %v5490_v6  ;;  %v4461_v56 = vcombine.low %v539_v51, %v555_v52  ;;  %v5518_v58 = vld [vmem:[%s6096_s7 + $0x1e0] sm:$0xff]   ;;  %v5522_v62 = vld [vmem:[%s6096_s7 + $0x1e8] sm:$0xff]   ;;  %v5529_v6 = vld [vmem:[%s6096_s7 + $0x170] sm:$0xff]  }
  0x73   : > { %v5519_v59 = vld [vmem:[%s6096_s7 + $0x120] sm:$0xff]   ;;  %v5523_v63 = vld [vmem:[%s6096_s7 + $0x128] sm:$0xff]   ;;  %v493_v18 = vld [vmem:[%s6098_s8 + $0x98] sm:$0xff] }
  0x74   : > { %4797 = vmatpush3.bf16.msra.mxu0 %v5491_v7  ;;  %v5520_v60 = vld [vmem:[%s6096_s7 + $0x1a0] sm:$0xff]   ;;  %v5524_v0 = vld [vmem:[%s6096_s7 + $0x1a8] sm:$0xff]   ;;  %v4401_v21 = vcombine.low %v477_v17, %v493_v18  ;;  %v509_v33 = vld [vmem:[%s6098_s8 + $0x118] sm:$0xff] }
  0x75   : > { %4837 = vmatpush3.bf16.msra.mxu1 %v5492_v8  ;;  %4798 = vmatprep.subr.bf16.mxu0 %v5493_v9  ;;  %v570_v1 = vld [vmem:[%s6098_s8 + $0x300] sm:$0xff]  ;;  %v571_v2 = vld [vmem:[%s6098_s8 + $0x308] sm:$0xff]  ;;  %v5530_v8 = vld [vmem:[%s6096_s7 + $0x1f0] sm:$0xff]  }
  0x76   : > { %4838 = vmatprep.subr.bf16.mxu1 %v5494_v10  ;;  %v4492_v3 = vcombine.high %v570_v1, %v570_v1  ;;  %v4494_v4 = vcombine.high %v571_v2, %v571_v2  ;;  %v4491_v5 = vcombine.low %v570_v1, %v570_v1  ;;  %v4493_v7 = vcombine.low %v571_v2, %v571_v2  ;;  %v5531_v9 = vld [vmem:[%s6096_s7 + $0x130] sm:$0xff]   ;;  %v5537_v22 = vld [vmem:[%s6096_s7 + $0x240] sm:$0xff]   ;;  %v541_v50 = vld [vmem:[%s6098_s8 + $0x218] sm:$0xff] }
  0x77   : > { %v5532_v10 = vld [vmem:[%s6096_s7 + $0x1b0] sm:$0xff]   ;;  %v5538_v24 = vld [vmem:[%s6096_s7 + $0x2c0] sm:$0xff]   ;;  %v557_v51 = vld [vmem:[%s6098_s8 + $0x298] sm:$0xff] }
  0x78   : > { %4799 = vmatpush3.bf16.msra.mxu0 %v5495_v11  ;;  %v5533_v11 = vld [vmem:[%s6096_s7 + $0x178] sm:$0xff]  }
  0x79   : > { %4839 = vmatpush3.bf16.msra.mxu1 %v5496_v12  ;;  %4800 = vmatprep.subr.bf16.mxu0 %v5497_v13  ;;  %v5534_v12 = vld [vmem:[%s6096_s7 + $0x1f8] sm:$0xff]  }
  0x7a   : > { %4840 = vmatprep.subr.bf16.mxu1 %v5498_v14  ;;  %v5535_v13 = vld [vmem:[%s6096_s7 + $0x138] sm:$0xff]  }
  0x7b   : > { %v5536_v14 = vld [vmem:[%s6096_s7 + $0x1b8] sm:$0xff]  }
  0x7c   : > { %4801 = vmatpush3.bf16.msra.mxu0 %v5499_v15  ;;  %v476_v15 = vld [vmem:[%s6098_s8 + $0x10] sm:$0xff]  ;;  %v573_v1 = vld [vmem:[%s6098_s8 + $0x318] sm:$0xff] }
  0x7d   : > { %4841 = vmatpush3.bf16.msra.mxu1 %v5500_v16  ;;  %4866 = vmatprep.subr.bf16.mxu0 %v5501_v25  ;;  %v492_v16 = vld [vmem:[%s6098_s8 + $0x90] sm:$0xff]  ;;  %v5539_v25 = vld [vmem:[%s6096_s7 + $0x200] sm:$0xff]  }
  0x7e   : > { %4906 = vmatprep.subr.bf16.mxu1 %v5502_v26  ;;  %v4399_v19 = vcombine.low %v476_v15, %v492_v16  ;;  %v5540_v26 = vld [vmem:[%s6096_s7 + $0x280] sm:$0xff]  }
  0x7f   : > { %3259 = vmatmul.mubr.bf16.vlgmr.msra.gmra.mrb[0].mxu0 %v4395_v20  ;;  %v4400_v20 = vcombine.high %v476_v15, %v492_v16 }
  0x80   : > { %3323 = vmatmul.mubr.bf16.vlgmr.msra.gmra.mrb[0].mxu1 %v4397_v23  ;;  %4867 = vmatpush3.bf16.msra.mxu0 %v5503_v27  ;;  %v4402_v23 = vcombine.high %v477_v17, %v493_v18  ;;  %v5541_v27 = vld [vmem:[%s6096_s7 + $0x248] sm:$0xff]  }
  0x81   : > { %4907 = vmatpush3.bf16.msra.mxu1 %v5504_v28  ;;  %4868 = vmatprep.subr.bf16.mxu0 %v5505_v29  ;;  %v5542_v28 = vld [vmem:[%s6096_s7 + $0x2c8] sm:$0xff]  }
  0x82   : > { %4908 = vmatprep.subr.bf16.mxu1 %v5506_v30  ;;  %3266 = vmatprep.mubr.bf16.mxu0 %v4428_v35  ;;  %v5543_v29 = vld [vmem:[%s6096_s7 + $0x208] sm:$0xff]   ;;  %v525_v35 = vld [vmem:[%s6098_s8 + $0x198] sm:$0xff] }
  0x83   : > { %3330 = vmatprep.mubr.bf16.mxu1 %v4430_v39  ;;  %v5544_v30 = vld [vmem:[%s6096_s7 + $0x288] sm:$0xff]   ;;  %v4434_v37 = vcombine.high %v509_v33, %v525_v35  ;;  %v5545_v39 = vld [vmem:[%s6096_s7 + $0x250] sm:$0xff]  }
  0x84   : > { %4869 = vmatpush3.bf16.msra.mxu0 %v5507_v31  ;;  %v508_v31 = vld [vmem:[%s6098_s8 + $0x110] sm:$0xff]  ;;  %v479_v17 = vld [vmem:[%s6098_s8 + $0x28] sm:$0xff] }
  0x85   : > { %4909 = vmatpush3.bf16.msra.mxu1 %v5508_v32  ;;  %4870 = vmatprep.subr.bf16.mxu0 %v5509_v41  ;;  %v524_v32 = vld [vmem:[%s6098_s8 + $0x190] sm:$0xff]  ;;  %v495_v18 = vld [vmem:[%s6098_s8 + $0xa8] sm:$0xff] }
  0x86   : > { %4910 = vmatprep.subr.bf16.mxu1 %v5510_v42  ;;  %v4432_v34 = vcombine.high %v508_v31, %v524_v32  ;;  %v4431_v36 = vcombine.low %v508_v31, %v524_v32  ;;  %v5547_v41 = vld [vmem:[%s6096_s7 + $0x210] sm:$0xff]   ;;  %v511_v31 = vld [vmem:[%s6098_s8 + $0x128] sm:$0xff] }
  0x87   : > { %3267 = vmatmul.mubr.bf16.gmra.mrb[4].mxu0 %v4427_v38  ;;  %v4433_v38 = vcombine.low %v509_v33, %v525_v35  ;;  %v5548_v42 = vld [vmem:[%s6096_s7 + $0x290] sm:$0xff]   ;;  %v527_v32 = vld [vmem:[%s6098_s8 + $0x1a8] sm:$0xff] }
  0x88   : > { %3331 = vmatmul.mubr.bf16.gmra.mrb[4].mxu1 %v4429_v40  ;;  %4871 = vmatpush3.bf16.msra.mxu0 %v5511_v43  ;;  %v5546_v40 = vld [vmem:[%s6096_s7 + $0x2d0] sm:$0xff]   ;;  %v5549_v43 = vld [vmem:[%s6096_s7 + $0x258] sm:$0xff]  }
  0x89   : > { %4911 = vmatpush3.bf16.msra.mxu1 %v5512_v44  ;;  %4872 = vmatprep.subr.bf16.mxu0 %v5513_v45  ;;  %v5550_v44 = vld [vmem:[%s6096_s7 + $0x2d8] sm:$0xff]  }
  0x8a   : > { %4912 = vmatprep.subr.bf16.mxu1 %v5514_v46  ;;  %3274 = vmatprep.mubr.bf16.mxu0 %v4460_v53  ;;  %v5551_v45 = vld [vmem:[%s6096_s7 + $0x218] sm:$0xff]   ;;  %v4466_v53 = vcombine.high %v541_v50, %v557_v51 }
  0x8b   : > { %3338 = vmatprep.mubr.bf16.mxu1 %v4462_v54  ;;  %v5552_v46 = vld [vmem:[%s6096_s7 + $0x298] sm:$0xff]   ;;  %v4465_v54 = vcombine.low %v541_v50, %v557_v51 }
  0x8c   : > { %4873 = vmatpush3.bf16.msra.mxu0 %v5515_v47  ;;  %v540_v47 = vld [vmem:[%s6098_s8 + $0x210] sm:$0xff] }
  0x8d   : > { %4913 = vmatpush3.bf16.msra.mxu1 %v5516_v48  ;;  %4874 = vmatprep.subr.bf16.mxu0 %v5517_v57  ;;  %v556_v48 = vld [vmem:[%s6098_s8 + $0x290] sm:$0xff]  ;;  %v5555_v57 = vld [vmem:[%s6096_s7 + $0x220] sm:$0xff]  }
  0x8e   : > { %4914 = vmatprep.subr.bf16.mxu1 %v5518_v58  ;;  %v4464_v49 = vcombine.high %v540_v47, %v556_v48  ;;  %v4463_v52 = vcombine.low %v540_v47, %v556_v48  ;;  %v5556_v58 = vld [vmem:[%s6096_s7 + $0x2a0] sm:$0xff]   ;;  %v543_v47 = vld [vmem:[%s6098_s8 + $0x228] sm:$0xff] }
  0x8f   : > { %3275 = vmatmul.mubr.bf16.gmra.mrb[8].mxu0 %v4459_v55  ;;  %v5553_v55 = vld [vmem:[%s6096_s7 + $0x260] sm:$0xff]  }
  0x90   : > { %3339 = vmatmul.mubr.bf16.gmra.mrb[8].mxu1 %v4461_v56  ;;  %4875 = vmatpush3.bf16.msra.mxu0 %v5519_v59  ;;  %v5554_v56 = vld [vmem:[%s6096_s7 + $0x2e0] sm:$0xff]   ;;  %v5557_v59 = vld [vmem:[%s6096_s7 + $0x268] sm:$0xff]  }
  0x91   : > { %4915 = vmatpush3.bf16.msra.mxu1 %v5520_v60  ;;  %4876 = vmatprep.subr.bf16.mxu0 %v5521_v61  ;;  %v5558_v60 = vld [vmem:[%s6096_s7 + $0x2e8] sm:$0xff]  }
  0x92   : > { %4916 = vmatprep.subr.bf16.mxu1 %v5522_v62  ;;  %3282 = vmatprep.mubr.bf16.mxu0 %v4492_v3  ;;  %v5559_v61 = vld [vmem:[%s6096_s7 + $0x228] sm:$0xff]   ;;  %v4498_v3 = vcombine.high %v573_v1, %v573_v1 }
  0x93   : > { %3346 = vmatprep.mubr.bf16.mxu1 %v4494_v4  ;;  %v5560_v62 = vld [vmem:[%s6096_s7 + $0x2a8] sm:$0xff]   ;;  %v4497_v4 = vcombine.low %v573_v1, %v573_v1 }
  0x94   : > { %4877 = vmatpush3.bf16.msra.mxu0 %v5523_v63  ;;  %v572_v63 = vld [vmem:[%s6098_s8 + $0x310] sm:$0xff] }
  0x95   : > { %4917 = vmatpush3.bf16.msra.mxu1 %v5524_v0  ;;  %4878 = vmatprep.subr.bf16.mxu0 %v5529_v6  ;;  %v4496_v0 = vcombine.high %v572_v63, %v572_v63  ;;  %v4495_v2 = vcombine.low %v572_v63, %v572_v63  ;;  %v5566_v6 = vld [vmem:[%s6096_s7 + $0x2f0] sm:$0xff]  }
  0x96   : > { %4918 = vmatprep.subr.bf16.mxu1 %v5530_v8  ;;  %v5568_v8 = vld [vmem:[%s6096_s7 + $0x2b0] sm:$0xff]  }
  0x97   : > { %3283 = vmatmul.mubr.bf16.gmra.mrb[12].mxu0 %v4491_v5  ;;  %v5565_v5 = vld [vmem:[%s6096_s7 + $0x270] sm:$0xff]  }
  0x98   : > { %3347 = vmatmul.mubr.bf16.gmra.mrb[12].mxu1 %v4493_v7  ;;  %4879 = vmatpush3.bf16.msra.mxu0 %v5531_v9  ;;  %v5567_v7 = vld [vmem:[%s6096_s7 + $0x230] sm:$0xff]   ;;  %v5569_v9 = vld [vmem:[%s6096_s7 + $0x278] sm:$0xff]  }
  0x99   : > { %4919 = vmatpush3.bf16.msra.mxu1 %v5532_v10  ;;  %4880 = vmatprep.subr.bf16.mxu0 %v5533_v11  ;;  %v5570_v10 = vld [vmem:[%s6096_s7 + $0x2f8] sm:$0xff]  }
  0x9a   : > { %4920 = vmatprep.subr.bf16.mxu1 %v5534_v12  ;;  %3386 = vmatprep.mubr.bf16.mxu0 %v4400_v20  ;;  %v5571_v11 = vld [vmem:[%s6096_s7 + $0x238] sm:$0xff]   ;;  %v4406_v20 = vcombine.high %v479_v17, %v495_v18 }
  0x9b   : > { %3450 = vmatprep.mubr.bf16.mxu1 %v4402_v23  ;;  %v5572_v12 = vld [vmem:[%s6096_s7 + $0x2b8] sm:$0xff]   ;;  %v5575_v23 = vld [vmem:[%s6096_s7 + $0x300] sm:$0xff]  }
  0x9c   : > { %4881 = vmatpush3.bf16.msra.mxu0 %v5535_v13  ;;  %v478_v13 = vld [vmem:[%s6098_s8 + $0x20] sm:$0xff] }
  0x9d   : > { %4921 = vmatpush3.bf16.msra.mxu1 %v5536_v14  ;;  %4946 = vmatprep.subr.bf16.mxu0 %v5537_v22  ;;  %v494_v14 = vld [vmem:[%s6098_s8 + $0xa0] sm:$0xff] }
  0x9e   : > { %4986 = vmatprep.subr.bf16.mxu1 %v5538_v24  ;;  %v4403_v15 = vcombine.low %v478_v13, %v494_v14  ;;  %v4404_v16 = vcombine.high %v478_v13, %v494_v14  ;;  %v5574_v22 = vld [vmem:[%s6096_s7 + $0x3c0] sm:$0xff]   ;;  %v481_v13 = vld [vmem:[%s6098_s8 + $0x38] sm:$0xff] }
  0x9f   : > { %3387 = vmatmul.mubr.bf16.vlgmr.msra.gmra.mrb[16].mxu0 %v4399_v19  ;;  %v4405_v19 = vcombine.low %v479_v17, %v495_v18  ;;  %v5576_v24 = vld [vmem:[%s6096_s7 + $0x380] sm:$0xff]  }
  0xa0   : > { %3451 = vmatmul.mubr.bf16.vlgmr.msra.gmra.mrb[16].mxu1 %v4401_v21  ;;  %4947 = vmatpush3.bf16.msra.mxu0 %v5539_v25  ;;  %v5573_v21 = vld [vmem:[%s6096_s7 + $0x340] sm:$0xff]   ;;  %v5577_v25 = vld [vmem:[%s6096_s7 + $0x348] sm:$0xff]  }
  0xa1   : > { %4987 = vmatpush3.bf16.msra.mxu1 %v5540_v26  ;;  %4948 = vmatprep.subr.bf16.mxu0 %v5541_v27  ;;  %v5578_v26 = vld [vmem:[%s6096_s7 + $0x3c8] sm:$0xff]  }
  0xa2   : > { %4988 = vmatprep.subr.bf16.mxu1 %v5542_v28  ;;  %3394 = vmatprep.mubr.bf16.mxu0 %v4432_v34  ;;  %v5579_v27 = vld [vmem:[%s6096_s7 + $0x308] sm:$0xff]   ;;  %v4438_v34 = vcombine.high %v511_v31, %v527_v32 }
  0xa3   : > { %3458 = vmatprep.mubr.bf16.mxu1 %v4434_v37  ;;  %v5580_v28 = vld [vmem:[%s6096_s7 + $0x388] sm:$0xff]   ;;  %v5581_v37 = vld [vmem:[%s6096_s7 + $0x350] sm:$0xff]  }
  0xa4   : > { %4949 = vmatpush3.bf16.msra.mxu0 %v5543_v29  ;;  %v510_v29 = vld [vmem:[%s6098_s8 + $0x120] sm:$0xff] }
  0xa5   : > { %4989 = vmatpush3.bf16.msra.mxu1 %v5544_v30  ;;  %4950 = vmatprep.subr.bf16.mxu0 %v5545_v39  ;;  %v526_v30 = vld [vmem:[%s6098_s8 + $0x1a0] sm:$0xff]  ;;  %v5583_v39 = vld [vmem:[%s6096_s7 + $0x310] sm:$0xff]  }
  0xa6   : > { %4990 = vmatprep.subr.bf16.mxu1 %v5546_v40  ;;  %v4436_v33 = vcombine.high %v510_v29, %v526_v30  ;;  %v4435_v35 = vcombine.low %v510_v29, %v526_v30  ;;  %v5584_v40 = vld [vmem:[%s6096_s7 + $0x390] sm:$0xff]   ;;  %v513_v30 = vld [vmem:[%s6098_s8 + $0x138] sm:$0xff] }
  0xa7   : > { %3395 = vmatmul.mubr.bf16.gmra.mrb[20].mxu0 %v4431_v36  ;;  %v4437_v36 = vcombine.low %v511_v31, %v527_v32  ;;  %v529_v31 = vld [vmem:[%s6098_s8 + $0x1b8] sm:$0xff] }
  0xa8   : > { %3459 = vmatmul.mubr.bf16.gmra.mrb[20].mxu1 %v4433_v38  ;;  %4951 = vmatpush3.bf16.msra.mxu0 %v5547_v41  ;;  %v5582_v38 = vld [vmem:[%s6096_s7 + $0x3d0] sm:$0xff]   ;;  %v5585_v41 = vld [vmem:[%s6096_s7 + $0x358] sm:$0xff]  }
  0xa9   : > { %4991 = vmatpush3.bf16.msra.mxu1 %v5548_v42  ;;  %4952 = vmatprep.subr.bf16.mxu0 %v5549_v43  ;;  %v5586_v42 = vld [vmem:[%s6096_s7 + $0x3d8] sm:$0xff]  }
  0xaa   : > { %4992 = vmatprep.subr.bf16.mxu1 %v5550_v44  ;;  %3402 = vmatprep.mubr.bf16.mxu0 %v4464_v49  ;;  %v5587_v43 = vld [vmem:[%s6096_s7 + $0x318] sm:$0xff]   ;;  %v559_v49 = vld [vmem:[%s6098_s8 + $0x2a8] sm:$0xff] }
  0xab   : > { %3466 = vmatprep.mubr.bf16.mxu1 %v4466_v53  ;;  %v5588_v44 = vld [vmem:[%s6096_s7 + $0x398] sm:$0xff]   ;;  %v4470_v51 = vcombine.high %v543_v47, %v559_v49  ;;  %v5589_v53 = vld [vmem:[%s6096_s7 + $0x360] sm:$0xff]  }
  0xac   : > { %4953 = vmatpush3.bf16.msra.mxu0 %v5551_v45  ;;  %v542_v45 = vld [vmem:[%s6098_s8 + $0x220] sm:$0xff] }
  0xad   : > { %4993 = vmatpush3.bf16.msra.mxu1 %v5552_v46  ;;  %4954 = vmatprep.subr.bf16.mxu0 %v5553_v55  ;;  %v558_v46 = vld [vmem:[%s6098_s8 + $0x2a0] sm:$0xff] }
  0xae   : > { %4994 = vmatprep.subr.bf16.mxu1 %v5554_v56  ;;  %v4468_v48 = vcombine.high %v542_v45, %v558_v46  ;;  %v4467_v50 = vcombine.low %v542_v45, %v558_v46  ;;  %v5591_v55 = vld [vmem:[%s6096_s7 + $0x320] sm:$0xff]   ;;  %v545_v45 = vld [vmem:[%s6098_s8 + $0x238] sm:$0xff] }
  0xaf   : > { %3403 = vmatmul.mubr.bf16.gmra.mrb[24].mxu0 %v4463_v52  ;;  %v4469_v52 = vcombine.low %v543_v47, %v559_v49  ;;  %v5592_v56 = vld [vmem:[%s6096_s7 + $0x3a0] sm:$0xff]   ;;  %v561_v46 = vld [vmem:[%s6098_s8 + $0x2b8] sm:$0xff] }
  0xb0   : > { %3467 = vmatmul.mubr.bf16.gmra.mrb[24].mxu1 %v4465_v54  ;;  %4955 = vmatpush3.bf16.msra.mxu0 %v5555_v57  ;;  %v5590_v54 = vld [vmem:[%s6096_s7 + $0x3e0] sm:$0xff]   ;;  %v5593_v57 = vld [vmem:[%s6096_s7 + $0x368] sm:$0xff]  }
  0xb1   : > { %4995 = vmatpush3.bf16.msra.mxu1 %v5556_v58  ;;  %4956 = vmatprep.subr.bf16.mxu0 %v5557_v59  ;;  %v5594_v58 = vld [vmem:[%s6096_s7 + $0x3e8] sm:$0xff]  }
  0xb2   : > { %4996 = vmatprep.subr.bf16.mxu1 %v5558_v60  ;;  %3410 = vmatprep.mubr.bf16.mxu0 %v4496_v0  ;;  %v5595_v59 = vld [vmem:[%s6096_s7 + $0x328] sm:$0xff]  }
  0xb3   : > { %3474 = vmatprep.mubr.bf16.mxu1 %v4498_v3  ;;  %v5596_v60 = vld [vmem:[%s6096_s7 + $0x3a8] sm:$0xff]   ;;  %v5601_v3 = vld [vmem:[%s6096_s7 + $0x370] sm:$0xff]  }
  0xb4   : > { %4957 = vmatpush3.bf16.msra.mxu0 %v5559_v61  ;;  %v574_v61 = vld [vmem:[%s6098_s8 + $0x320] sm:$0xff] }
  0xb5   : > { %4997 = vmatpush3.bf16.msra.mxu1 %v5560_v62  ;;  %4958 = vmatprep.subr.bf16.mxu0 %v5565_v5  ;;  %v575_v62 = vld [vmem:[%s6098_s8 + $0x328] sm:$0xff]  ;;  %v4500_v63 = vcombine.high %v574_v61, %v574_v61  ;;  %v4499_v1 = vcombine.low %v574_v61, %v574_v61  ;;  %v5603_v5 = vld [vmem:[%s6096_s7 + $0x330] sm:$0xff]  }
  0xb6   : > { %4998 = vmatprep.subr.bf16.mxu1 %v5566_v6  ;;  %v4502_v0 = vcombine.high %v575_v62, %v575_v62  ;;  %v5604_v6 = vld [vmem:[%s6096_s7 + $0x3b0] sm:$0xff]  }
  0xb7   : > { %3411 = vmatmul.mubr.bf16.gmra.mrb[28].mxu0 %v4495_v2  ;;  %v4501_v2 = vcombine.low %v575_v62, %v575_v62 }
  0xb8   : > { %3475 = vmatmul.mubr.bf16.gmra.mrb[28].mxu1 %v4497_v4  ;;  %4959 = vmatpush3.bf16.msra.mxu0 %v5567_v7  ;;  %v5602_v4 = vld [vmem:[%s6096_s7 + $0x3f0] sm:$0xff]   ;;  %v5605_v7 = vld [vmem:[%s6096_s7 + $0x378] sm:$0xff]  }
  0xb9   : > { %4999 = vmatpush3.bf16.msra.mxu1 %v5568_v8  ;;  %4960 = vmatprep.subr.bf16.mxu0 %v5569_v9  ;;  %v5606_v8 = vld [vmem:[%s6096_s7 + $0x3f8] sm:$0xff]  }
  0xba   : > { %5000 = vmatprep.subr.bf16.mxu1 %v5570_v10  ;;  %3514 = vmatprep.mubr.bf16.mxu0 %v4404_v16  ;;  %v5607_v9 = vld [vmem:[%s6096_s7 + $0x338] sm:$0xff]  }
  0xbb   : > { %3578 = vmatprep.mubr.bf16.mxu1 %v4406_v20  ;;  %v5608_v10 = vld [vmem:[%s6096_s7 + $0x3b8] sm:$0xff]   ;;  %v5610_v20 = vld [vmem:[%s6096_s7 + $0x4c0] sm:$0xff]  }
  0xbc   : > { %4961 = vmatpush3.bf16.msra.mxu0 %v5571_v11  ;;  %v480_v11 = vld [vmem:[%s6098_s8 + $0x30] sm:$0xff]  ;;  %v497_v16 = vld [vmem:[%s6098_s8 + $0xb8] sm:$0xff] }
  0xbd   : > { %5001 = vmatpush3.bf16.msra.mxu1 %v5572_v12  ;;  %5026 = vmatprep.subr.bf16.mxu0 %v5573_v21  ;;  %v496_v12 = vld [vmem:[%s6098_s8 + $0xb0] sm:$0xff]  ;;  %v4409_v17 = vcombine.low %v481_v13, %v497_v16  ;;  %v4410_v18 = vcombine.high %v481_v13, %v497_v16  ;;  %v5611_v21 = vld [vmem:[%s6096_s7 + $0x400] sm:$0xff]  }
  0xbe   : > { %5066 = vmatprep.subr.bf16.mxu1 %v5574_v22  ;;  %v4407_v14 = vcombine.low %v480_v11, %v496_v12  ;;  %v5612_v22 = vld [vmem:[%s6096_s7 + $0x480] sm:$0xff]  }
  0xbf   : > { %3515 = vmatmul.mubr.bf16.vlgmr.msra.gmra.mrb[32].mxu0 %v4403_v15  ;;  %v4408_v15 = vcombine.high %v480_v11, %v496_v12  ;;  %v483_v11 = vld [vmem:[%s6098_s8 + $0x48] sm:$0xff]  ;;  %v5645_v16 = vld [vmem:[%s6096_s7 + $0x540] sm:$0xff]  }
  0xc0   : > { %3579 = vmatmul.mubr.bf16.vlgmr.msra.gmra.mrb[32].mxu1 %v4405_v19  ;;  %5027 = vmatpush3.bf16.msra.mxu0 %v5575_v23  ;;  %v5609_v19 = vld [vmem:[%s6096_s7 + $0x440] sm:$0xff]   ;;  %v5613_v23 = vld [vmem:[%s6096_s7 + $0x448] sm:$0xff]  }
  0xc1   : > { %5067 = vmatpush3.bf16.msra.mxu1 %v5576_v24  ;;  %5028 = vmatprep.subr.bf16.mxu0 %v5577_v25  ;;  %v5614_v24 = vld [vmem:[%s6096_s7 + $0x4c8] sm:$0xff]  }
  0xc2   : > { %5068 = vmatprep.subr.bf16.mxu1 %v5578_v26  ;;  %3522 = vmatprep.mubr.bf16.mxu0 %v4436_v33  ;;  %v5615_v25 = vld [vmem:[%s6096_s7 + $0x408] sm:$0xff]   ;;  %v4442_v33 = vcombine.high %v513_v30, %v529_v31 }
  0xc3   : > { %3586 = vmatprep.mubr.bf16.mxu1 %v4438_v34  ;;  %v5616_v26 = vld [vmem:[%s6096_s7 + $0x488] sm:$0xff]   ;;  %v4441_v34 = vcombine.low %v513_v30, %v529_v31 }
  0xc4   : > { %5029 = vmatpush3.bf16.msra.mxu0 %v5579_v27  ;;  %v512_v27 = vld [vmem:[%s6098_s8 + $0x130] sm:$0xff]  ;;  %v499_v12 = vld [vmem:[%s6098_s8 + $0xc8] sm:$0xff] }
  0xc5   : > { %5069 = vmatpush3.bf16.msra.mxu1 %v5580_v28  ;;  %5030 = vmatprep.subr.bf16.mxu0 %v5581_v37  ;;  %v528_v28 = vld [vmem:[%s6098_s8 + $0x1b0] sm:$0xff] }
  0xc6   : > { %5070 = vmatprep.subr.bf16.mxu1 %v5582_v38  ;;  %v4440_v29 = vcombine.high %v512_v27, %v528_v28  ;;  %v4439_v32 = vcombine.low %v512_v27, %v528_v28  ;;  %v5619_v37 = vld [vmem:[%s6096_s7 + $0x410] sm:$0xff]   ;;  %v515_v27 = vld [vmem:[%s6098_s8 + $0x148] sm:$0xff] }
  0xc7   : > { %3523 = vmatmul.mubr.bf16.gmra.mrb[36].mxu0 %v4435_v35  ;;  %v5617_v35 = vld [vmem:[%s6096_s7 + $0x450] sm:$0xff]  }
  0xc8   : > { %3587 = vmatmul.mubr.bf16.gmra.mrb[36].mxu1 %v4437_v36  ;;  %5031 = vmatpush3.bf16.msra.mxu0 %v5583_v39  ;;  %v5618_v36 = vld [vmem:[%s6096_s7 + $0x4d0] sm:$0xff]   ;;  %v5621_v39 = vld [vmem:[%s6096_s7 + $0x458] sm:$0xff]  }
  0xc9   : > { %5071 = vmatpush3.bf16.msra.mxu1 %v5584_v40  ;;  %5032 = vmatprep.subr.bf16.mxu0 %v5585_v41  ;;  %v5620_v38 = vld [vmem:[%s6096_s7 + $0x490] sm:$0xff]   ;;  %v5622_v40 = vld [vmem:[%s6096_s7 + $0x4d8] sm:$0xff]  }
  0xca   : > { %5072 = vmatprep.subr.bf16.mxu1 %v5586_v42  ;;  %3530 = vmatprep.mubr.bf16.mxu0 %v4468_v48  ;;  %v5623_v41 = vld [vmem:[%s6096_s7 + $0x418] sm:$0xff]   ;;  %v4474_v48 = vcombine.high %v545_v45, %v561_v46 }
  0xcb   : > { %3594 = vmatprep.mubr.bf16.mxu1 %v4470_v51  ;;  %v5624_v42 = vld [vmem:[%s6096_s7 + $0x498] sm:$0xff]   ;;  %v5625_v51 = vld [vmem:[%s6096_s7 + $0x460] sm:$0xff]  }
  0xcc   : > { %5033 = vmatpush3.bf16.msra.mxu0 %v5587_v43  ;;  %v544_v43 = vld [vmem:[%s6098_s8 + $0x230] sm:$0xff] }
  0xcd   : > { %5073 = vmatpush3.bf16.msra.mxu1 %v5588_v44  ;;  %5034 = vmatprep.subr.bf16.mxu0 %v5589_v53  ;;  %v560_v44 = vld [vmem:[%s6098_s8 + $0x2b0] sm:$0xff]  ;;  %v5627_v53 = vld [vmem:[%s6096_s7 + $0x420] sm:$0xff]  }
  0xce   : > { %5074 = vmatprep.subr.bf16.mxu1 %v5590_v54  ;;  %v4472_v47 = vcombine.high %v544_v43, %v560_v44  ;;  %v4471_v49 = vcombine.low %v544_v43, %v560_v44  ;;  %v5628_v54 = vld [vmem:[%s6096_s7 + $0x4a0] sm:$0xff]   ;;  %v547_v44 = vld [vmem:[%s6098_s8 + $0x248] sm:$0xff] }
  0xcf   : > { %3531 = vmatmul.mubr.bf16.gmra.mrb[40].mxu0 %v4467_v50  ;;  %v4473_v50 = vcombine.low %v545_v45, %v561_v46  ;;  %v563_v45 = vld [vmem:[%s6098_s8 + $0x2c8] sm:$0xff] }
  0xd0   : > { %3595 = vmatmul.mubr.bf16.gmra.mrb[40].mxu1 %v4469_v52  ;;  %5035 = vmatpush3.bf16.msra.mxu0 %v5591_v55  ;;  %v5626_v52 = vld [vmem:[%s6096_s7 + $0x4e0] sm:$0xff]   ;;  %v5629_v55 = vld [vmem:[%s6096_s7 + $0x468] sm:$0xff]  }
  0xd1   : > { %5075 = vmatpush3.bf16.msra.mxu1 %v5592_v56  ;;  %5036 = vmatprep.subr.bf16.mxu0 %v5593_v57  ;;  %v5630_v56 = vld [vmem:[%s6096_s7 + $0x4e8] sm:$0xff]  }
  0xd2   : > { %5076 = vmatprep.subr.bf16.mxu1 %v5594_v58  ;;  %3538 = vmatprep.mubr.bf16.mxu0 %v4500_v63  ;;  %v5631_v57 = vld [vmem:[%s6096_s7 + $0x428] sm:$0xff]  }
  0xd3   : > { %3602 = vmatprep.mubr.bf16.mxu1 %v4502_v0  ;;  %v5632_v58 = vld [vmem:[%s6096_s7 + $0x4a8] sm:$0xff]   ;;  %v5637_v0 = vld [vmem:[%s6096_s7 + $0x470] sm:$0xff]  }
  0xd4   : > { %5037 = vmatpush3.bf16.msra.mxu0 %v5595_v59  ;;  %v576_v59 = vld [vmem:[%s6098_s8 + $0x330] sm:$0xff] }
  0xd5   : > { %5077 = vmatpush3.bf16.msra.mxu1 %v5596_v60  ;;  %5038 = vmatprep.subr.bf16.mxu0 %v5601_v3  ;;  %v577_v60 = vld [vmem:[%s6098_s8 + $0x338] sm:$0xff]  ;;  %v4504_v61 = vcombine.high %v576_v59, %v576_v59  ;;  %v4503_v63 = vcombine.low %v576_v59, %v576_v59  ;;  %v5639_v3 = vld [vmem:[%s6096_s7 + $0x430] sm:$0xff]   ;;  %v579_v59 = vld [vmem:[%s6098_s8 + $0x348] sm:$0xff] }
  0xd6   : > { %5078 = vmatprep.subr.bf16.mxu1 %v5602_v4  ;;  %v4506_v62 = vcombine.high %v577_v60, %v577_v60  ;;  %v5640_v4 = vld [vmem:[%s6096_s7 + $0x4b0] sm:$0xff]  }
  0xd7   : > { %3539 = vmatmul.mubr.bf16.gmra.mrb[44].mxu0 %v4499_v1  ;;  %v4505_v1 = vcombine.low %v577_v60, %v577_v60 }
  0xd8   : > { %3603 = vmatmul.mubr.bf16.gmra.mrb[44].mxu1 %v4501_v2  ;;  %5039 = vmatpush3.bf16.msra.mxu0 %v5603_v5  ;;  %v5638_v2 = vld [vmem:[%s6096_s7 + $0x4f0] sm:$0xff]   ;;  %v5641_v5 = vld [vmem:[%s6096_s7 + $0x478] sm:$0xff]  }
  0xd9   : > { %5079 = vmatpush3.bf16.msra.mxu1 %v5604_v6  ;;  %5040 = vmatprep.subr.bf16.mxu0 %v5605_v7  ;;  %v5642_v6 = vld [vmem:[%s6096_s7 + $0x4f8] sm:$0xff]  }
  0xda   : > { %5080 = vmatprep.subr.bf16.mxu1 %v5606_v8  ;;  %3642 = vmatprep.mubr.bf16.mxu0 %v4408_v15  ;;  %v5643_v7 = vld [vmem:[%s6096_s7 + $0x438] sm:$0xff]   ;;  %v4413_v15 = vcombine.low %v483_v11, %v499_v12 }
  0xdb   : > { %3706 = vmatprep.mubr.bf16.mxu1 %v4410_v18  ;;  %v5644_v8 = vld [vmem:[%s6096_s7 + $0x4b8] sm:$0xff]   ;;  %v5646_v18 = vld [vmem:[%s6096_s7 + $0x5c0] sm:$0xff]  }
  0xdc   : > { %5041 = vmatpush3.bf16.msra.mxu0 %v5607_v9  ;;  %v482_v9 = vld [vmem:[%s6098_s8 + $0x40] sm:$0xff] }
  0xdd   : > { %5081 = vmatpush3.bf16.msra.mxu1 %v5608_v10  ;;  %5106 = vmatprep.subr.bf16.mxu0 %v5609_v19  ;;  %v498_v10 = vld [vmem:[%s6098_s8 + $0xc0] sm:$0xff] }
  0xde   : > { %5146 = vmatprep.subr.bf16.mxu1 %v5610_v20  ;;  %v4411_v13 = vcombine.low %v482_v9, %v498_v10  ;;  %v5647_v19 = vld [vmem:[%s6096_s7 + $0x500] sm:$0xff]  }
  0xdf   : > { %3643 = vmatmul.mubr.bf16.vlgmr.msra.gmra.mrb[48].mxu0 %v4407_v14  ;;  %v4412_v14 = vcombine.high %v482_v9, %v498_v10  ;;  %v5648_v20 = vld [vmem:[%s6096_s7 + $0x580] sm:$0xff]  }
  0xe0   : > { %3707 = vmatmul.mubr.bf16.vlgmr.msra.gmra.mrb[48].mxu1 %v4409_v17  ;;  %5107 = vmatpush3.bf16.msra.mxu0 %v5611_v21  ;;  %v4414_v17 = vcombine.high %v483_v11, %v499_v12  ;;  %v5649_v21 = vld [vmem:[%s6096_s7 + $0x548] sm:$0xff]   ;;  %v485_v11 = vld [vmem:[%s6098_s8 + $0x58] sm:$0xff] }
  0xe1   : > { %5147 = vmatpush3.bf16.msra.mxu1 %v5612_v22  ;;  %5108 = vmatprep.subr.bf16.mxu0 %v5613_v23  ;;  %v5650_v22 = vld [vmem:[%s6096_s7 + $0x5c8] sm:$0xff]   ;;  %v501_v12 = vld [vmem:[%s6098_s8 + $0xd8] sm:$0xff] }
  0xe2   : > { %5148 = vmatprep.subr.bf16.mxu1 %v5614_v24  ;;  %3650 = vmatprep.mubr.bf16.mxu0 %v4440_v29  ;;  %v5651_v23 = vld [vmem:[%s6096_s7 + $0x508] sm:$0xff]  }
  0xe3   : > { %3714 = vmatprep.mubr.bf16.mxu1 %v4442_v33  ;;  %v5652_v24 = vld [vmem:[%s6096_s7 + $0x588] sm:$0xff]   ;;  %v5653_v33 = vld [vmem:[%s6096_s7 + $0x550] sm:$0xff]  }
  0xe4   : > { %5109 = vmatpush3.bf16.msra.mxu0 %v5615_v25  ;;  %v514_v25 = vld [vmem:[%s6098_s8 + $0x140] sm:$0xff]  ;;  %v531_v29 = vld [vmem:[%s6098_s8 + $0x1c8] sm:$0xff] }
  0xe5   : > { %5149 = vmatpush3.bf16.msra.mxu1 %v5616_v26  ;;  %5110 = vmatprep.subr.bf16.mxu0 %v5617_v35  ;;  %v530_v26 = vld [vmem:[%s6098_s8 + $0x1c0] sm:$0xff]  ;;  %v4446_v31 = vcombine.high %v515_v27, %v531_v29  ;;  %v5655_v35 = vld [vmem:[%s6096_s7 + $0x510] sm:$0xff]  }
  0xe6   : > { %5150 = vmatprep.subr.bf16.mxu1 %v5618_v36  ;;  %v4444_v28 = vcombine.high %v514_v25, %v530_v26  ;;  %v4443_v30 = vcombine.low %v514_v25, %v530_v26  ;;  %v5656_v36 = vld [vmem:[%s6096_s7 + $0x590] sm:$0xff]   ;;  %v517_v25 = vld [vmem:[%s6098_s8 + $0x158] sm:$0xff] }
  0xe7   : > { %3651 = vmatmul.mubr.bf16.gmra.mrb[52].mxu0 %v4439_v32  ;;  %v4445_v32 = vcombine.low %v515_v27, %v531_v29  ;;  %v533_v26 = vld [vmem:[%s6098_s8 + $0x1d8] sm:$0xff] }
  0xe8   : > { %3715 = vmatmul.mubr.bf16.gmra.mrb[52].mxu1 %v4441_v34  ;;  %5111 = vmatpush3.bf16.msra.mxu0 %v5619_v37  ;;  %v5654_v34 = vld [vmem:[%s6096_s7 + $0x5d0] sm:$0xff]   ;;  %v5657_v37 = vld [vmem:[%s6096_s7 + $0x558] sm:$0xff]  }
  0xe9   : > { %5151 = vmatpush3.bf16.msra.mxu1 %v5620_v38  ;;  %5112 = vmatprep.subr.bf16.mxu0 %v5621_v39  ;;  %v5658_v38 = vld [vmem:[%s6096_s7 + $0x5d8] sm:$0xff]  }
  0xea   : > { %5152 = vmatprep.subr.bf16.mxu1 %v5622_v40  ;;  %3658 = vmatprep.mubr.bf16.mxu0 %v4472_v47  ;;  %v5659_v39 = vld [vmem:[%s6096_s7 + $0x518] sm:$0xff]   ;;  %v4478_v47 = vcombine.high %v547_v44, %v563_v45 }
  0xeb   : > { %3722 = vmatprep.mubr.bf16.mxu1 %v4474_v48  ;;  %v5660_v40 = vld [vmem:[%s6096_s7 + $0x598] sm:$0xff]   ;;  %v4477_v48 = vcombine.low %v547_v44, %v563_v45 }
  0xec   : > { %5113 = vmatpush3.bf16.msra.mxu0 %v5623_v41  ;;  %v546_v41 = vld [vmem:[%s6098_s8 + $0x240] sm:$0xff] }
  0xed   : > { %5153 = vmatpush3.bf16.msra.mxu1 %v5624_v42  ;;  %5114 = vmatprep.subr.bf16.mxu0 %v5625_v51  ;;  %v562_v42 = vld [vmem:[%s6098_s8 + $0x2c0] sm:$0xff] }
  0xee   : > { %5154 = vmatprep.subr.bf16.mxu1 %v5626_v52  ;;  %v4476_v43 = vcombine.high %v546_v41, %v562_v42  ;;  %v4475_v46 = vcombine.low %v546_v41, %v562_v42  ;;  %v5663_v51 = vld [vmem:[%s6096_s7 + $0x520] sm:$0xff]   ;;  %v549_v41 = vld [vmem:[%s6098_s8 + $0x258] sm:$0xff] }
  0xef   : > { %3659 = vmatmul.mubr.bf16.gmra.mrb[56].mxu0 %v4471_v49  ;;  %v5661_v49 = vld [vmem:[%s6096_s7 + $0x560] sm:$0xff]  }
  0xf0   : > { %3723 = vmatmul.mubr.bf16.gmra.mrb[56].mxu1 %v4473_v50  ;;  %5115 = vmatpush3.bf16.msra.mxu0 %v5627_v53  ;;  %v5662_v50 = vld [vmem:[%s6096_s7 + $0x5e0] sm:$0xff]   ;;  %v5665_v53 = vld [vmem:[%s6096_s7 + $0x568] sm:$0xff]  }
  0xf1   : > { %5155 = vmatpush3.bf16.msra.mxu1 %v5628_v54  ;;  %5116 = vmatprep.subr.bf16.mxu0 %v5629_v55  ;;  %v5664_v52 = vld [vmem:[%s6096_s7 + $0x5a0] sm:$0xff]   ;;  %v5666_v54 = vld [vmem:[%s6096_s7 + $0x5e8] sm:$0xff]  }
  0xf2   : > { %5156 = vmatprep.subr.bf16.mxu1 %v5630_v56  ;;  %3666 = vmatprep.mubr.bf16.mxu0 %v4504_v61  ;;  %v5667_v55 = vld [vmem:[%s6096_s7 + $0x528] sm:$0xff]   ;;  %v4510_v61 = vcombine.high %v579_v59, %v579_v59 }
  0xf3   : > { %3730 = vmatprep.mubr.bf16.mxu1 %v4506_v62  ;;  %v5668_v56 = vld [vmem:[%s6096_s7 + $0x5a8] sm:$0xff]   ;;  %v4509_v62 = vcombine.low %v579_v59, %v579_v59 }
  0xf4   : > { %5117 = vmatpush3.bf16.msra.mxu0 %v5631_v57  ;;  %v578_v57 = vld [vmem:[%s6098_s8 + $0x340] sm:$0xff] }
  0xf5   : > { %5157 = vmatpush3.bf16.msra.mxu1 %v5632_v58  ;;  %5118 = vmatprep.subr.bf16.mxu0 %v5637_v0  ;;  %v4508_v58 = vcombine.high %v578_v57, %v578_v57  ;;  %v4507_v60 = vcombine.low %v578_v57, %v578_v57  ;;  %v5674_v0 = vld [vmem:[%s6096_s7 + $0x5f0] sm:$0xff]  }
  0xf6   : > { %5158 = vmatprep.subr.bf16.mxu1 %v5638_v2  ;;  %v5676_v2 = vld [vmem:[%s6096_s7 + $0x5b0] sm:$0xff]  }
  0xf7   : > { %3667 = vmatmul.mubr.bf16.gmra.mrb[60].mxu0 %v4503_v63  ;;  %v5673_v63 = vld [vmem:[%s6096_s7 + $0x570] sm:$0xff]  }
  0xf8   : > { %3731 = vmatmul.mubr.bf16.gmra.mrb[60].mxu1 %v4505_v1  ;;  %5119 = vmatpush3.bf16.msra.mxu0 %v5639_v3  ;;  %v5675_v1 = vld [vmem:[%s6096_s7 + $0x530] sm:$0xff]   ;;  %v5677_v3 = vld [vmem:[%s6096_s7 + $0x578] sm:$0xff]  }
  0xf9   : > { %5159 = vmatpush3.bf16.msra.mxu1 %v5640_v4  ;;  %5120 = vmatprep.subr.bf16.mxu0 %v5641_v5  ;;  %v5678_v4 = vld [vmem:[%s6096_s7 + $0x5f8] sm:$0xff]  }
  0xfa   : > { %5160 = vmatprep.subr.bf16.mxu1 %v5642_v6  ;;  %3770 = vmatprep.mubr.bf16.mxu0 %v4412_v14  ;;  %v5679_v5 = vld [vmem:[%s6096_s7 + $0x538] sm:$0xff]   ;;  %v4418_v14 = vcombine.high %v485_v11, %v501_v12 }
  0xfb   : > { %3834 = vmatprep.mubr.bf16.mxu1 %v4414_v17  ;;  %v5680_v6 = vld [vmem:[%s6096_s7 + $0x5b8] sm:$0xff]   ;;  %v5683_v17 = vld [vmem:[%s6096_s7 + $0x600] sm:$0xff]  }
  0xfc   : > { %5121 = vmatpush3.bf16.msra.mxu0 %v5643_v7  ;;  %v484_v7 = vld [vmem:[%s6098_s8 + $0x50] sm:$0xff] }
  0xfd   : > { %5161 = vmatpush3.bf16.msra.mxu1 %v5644_v8  ;;  %5186 = vmatprep.subr.bf16.mxu0 %v5645_v16  ;;  %v500_v8 = vld [vmem:[%s6098_s8 + $0xd0] sm:$0xff]  ;;  %v5682_v16 = vld [vmem:[%s6096_s7 + $0x6c0] sm:$0xff]  }
  0xfe   : > { %5226 = vmatprep.subr.bf16.mxu1 %v5646_v18  ;;  %v4415_v9 = vcombine.low %v484_v7, %v500_v8  ;;  %v4416_v10 = vcombine.high %v484_v7, %v500_v8  ;;  %v5684_v18 = vld [vmem:[%s6096_s7 + $0x680] sm:$0xff]  }
  0xff   : > { %3771 = vmatmul.mubr.bf16.vlgmr.msra.gmra.mrb[64].mxu0 %v4411_v13  ;;  %v4417_v13 = vcombine.low %v485_v11, %v501_v12  ;;  %v486_v12 = vld [vmem:[%s6098_s8 + $0x60] sm:$0xff] }
 0x100   : > { %3835 = vmatmul.mubr.bf16.vlgmr.msra.gmra.mrb[64].mxu1 %v4413_v15  ;;  %5187 = vmatpush3.bf16.msra.mxu0 %v5647_v19  ;;  %v5681_v15 = vld [vmem:[%s6096_s7 + $0x640] sm:$0xff]   ;;  %v5685_v19 = vld [vmem:[%s6096_s7 + $0x648] sm:$0xff]  }
 0x101   : > { %5227 = vmatpush3.bf16.msra.mxu1 %v5648_v20  ;;  %5188 = vmatprep.subr.bf16.mxu0 %v5649_v21  ;;  %v5686_v20 = vld [vmem:[%s6096_s7 + $0x6c8] sm:$0xff]  }
 0x102   : > { %5228 = vmatprep.subr.bf16.mxu1 %v5650_v22  ;;  %3778 = vmatprep.mubr.bf16.mxu0 %v4444_v28  ;;  %v5687_v21 = vld [vmem:[%s6096_s7 + $0x608] sm:$0xff]   ;;  %v4450_v28 = vcombine.high %v517_v25, %v533_v26 }
 0x103   : > { %3842 = vmatprep.mubr.bf16.mxu1 %v4446_v31  ;;  %v5688_v22 = vld [vmem:[%s6096_s7 + $0x688] sm:$0xff]   ;;  %v5689_v31 = vld [vmem:[%s6096_s7 + $0x650] sm:$0xff]  }
 0x104   : > { %5189 = vmatpush3.bf16.msra.mxu0 %v5651_v23  ;;  %v516_v23 = vld [vmem:[%s6098_s8 + $0x150] sm:$0xff] }
 0x105   : > { %5229 = vmatpush3.bf16.msra.mxu1 %v5652_v24  ;;  %5190 = vmatprep.subr.bf16.mxu0 %v5653_v33  ;;  %v532_v24 = vld [vmem:[%s6098_s8 + $0x1d0] sm:$0xff] }
 0x106   : > { %5230 = vmatprep.subr.bf16.mxu1 %v5654_v34  ;;  %v4448_v27 = vcombine.high %v516_v23, %v532_v24  ;;  %v4447_v29 = vcombine.low %v516_v23, %v532_v24  ;;  %v5691_v33 = vld [vmem:[%s6096_s7 + $0x610] sm:$0xff]   ;;  %v5717_v24 = vld [vmem:[%s6096_s7 + $0x740] sm:$0xff]  }
 0x107   : > { %3779 = vmatmul.mubr.bf16.gmra.mrb[68].mxu0 %v4443_v30  ;;  %v4449_v30 = vcombine.low %v517_v25, %v533_v26  ;;  %v5692_v34 = vld [vmem:[%s6096_s7 + $0x690] sm:$0xff]  }
 0x108   : > { %3843 = vmatmul.mubr.bf16.gmra.mrb[68].mxu1 %v4445_v32  ;;  %5191 = vmatpush3.bf16.msra.mxu0 %v5655_v35  ;;  %v5690_v32 = vld [vmem:[%s6096_s7 + $0x6d0] sm:$0xff]   ;;  %v5693_v35 = vld [vmem:[%s6096_s7 + $0x658] sm:$0xff]  }
 0x109   : > { %5231 = vmatpush3.bf16.msra.mxu1 %v5656_v36  ;;  %5192 = vmatprep.subr.bf16.mxu0 %v5657_v37  ;;  %v5694_v36 = vld [vmem:[%s6096_s7 + $0x6d8] sm:$0xff]  }
 0x10a   : > { %5232 = vmatprep.subr.bf16.mxu1 %v5658_v38  ;;  %3786 = vmatprep.mubr.bf16.mxu0 %v4476_v43  ;;  %v5695_v37 = vld [vmem:[%s6096_s7 + $0x618] sm:$0xff]  }
 0x10b   : > { %3850 = vmatprep.mubr.bf16.mxu1 %v4478_v47  ;;  %v5696_v38 = vld [vmem:[%s6096_s7 + $0x698] sm:$0xff]   ;;  %v5697_v47 = vld [vmem:[%s6096_s7 + $0x660] sm:$0xff]  }
 0x10c   : > { %5193 = vmatpush3.bf16.msra.mxu0 %v5659_v39  ;;  %v548_v39 = vld [vmem:[%s6098_s8 + $0x250] sm:$0xff]  ;;  %v565_v43 = vld [vmem:[%s6098_s8 + $0x2d8] sm:$0xff] }
 0x10d   : > { %5233 = vmatpush3.bf16.msra.mxu1 %v5660_v40  ;;  %5194 = vmatprep.subr.bf16.mxu0 %v5661_v49  ;;  %v564_v40 = vld [vmem:[%s6098_s8 + $0x2d0] sm:$0xff]  ;;  %v4482_v45 = vcombine.high %v549_v41, %v565_v43  ;;  %v5699_v49 = vld [vmem:[%s6096_s7 + $0x620] sm:$0xff]  }
 0x10e   : > { %5234 = vmatprep.subr.bf16.mxu1 %v5662_v50  ;;  %v4480_v42 = vcombine.high %v548_v39, %v564_v40  ;;  %v4479_v44 = vcombine.low %v548_v39, %v564_v40  ;;  %v5700_v50 = vld [vmem:[%s6096_s7 + $0x6a0] sm:$0xff]  }
 0x10f   : > { %3787 = vmatmul.mubr.bf16.gmra.mrb[72].mxu0 %v4475_v46  ;;  %v4481_v46 = vcombine.low %v549_v41, %v565_v43  ;;  %v5724_v41 = vld [vmem:[%s6096_s7 + $0x788] sm:$0xff]   ;;  %v534_v43 = vld [vmem:[%s6098_s8 + $0x1e0] sm:$0xff] }
 0x110   : > { %3851 = vmatmul.mubr.bf16.gmra.mrb[72].mxu1 %v4477_v48  ;;  %5195 = vmatpush3.bf16.msra.mxu0 %v5663_v51  ;;  %v5698_v48 = vld [vmem:[%s6096_s7 + $0x6e0] sm:$0xff]   ;;  %v5701_v51 = vld [vmem:[%s6096_s7 + $0x668] sm:$0xff]  }
 0x111   : > { %5235 = vmatpush3.bf16.msra.mxu1 %v5664_v52  ;;  %5196 = vmatprep.subr.bf16.mxu0 %v5665_v53  ;;  %v5702_v52 = vld [vmem:[%s6096_s7 + $0x6e8] sm:$0xff]  }
 0x112   : > { %5236 = vmatprep.subr.bf16.mxu1 %v5666_v54  ;;  %3794 = vmatprep.mubr.bf16.mxu0 %v4508_v58  ;;  %v5703_v53 = vld [vmem:[%s6096_s7 + $0x628] sm:$0xff]  }
 0x113   : > { %3858 = vmatprep.mubr.bf16.mxu1 %v4510_v61  ;;  %v5704_v54 = vld [vmem:[%s6096_s7 + $0x6a8] sm:$0xff]   ;;  %v5709_v61 = vld [vmem:[%s6096_s7 + $0x670] sm:$0xff]  }
 0x114   : > { %5197 = vmatpush3.bf16.msra.mxu0 %v5667_v55  ;;  %v580_v55 = vld [vmem:[%s6098_s8 + $0x350] sm:$0xff] }
 0x115   : > { %5237 = vmatpush3.bf16.msra.mxu1 %v5668_v56  ;;  %5198 = vmatprep.subr.bf16.mxu0 %v5673_v63  ;;  %v581_v56 = vld [vmem:[%s6098_s8 + $0x358] sm:$0xff]  ;;  %v4512_v57 = vcombine.high %v580_v55, %v580_v55  ;;  %v4511_v59 = vcombine.low %v580_v55, %v580_v55  ;;  %v5711_v63 = vld [vmem:[%s6096_s7 + $0x630] sm:$0xff]  }
 0x116   : > { %5238 = vmatprep.subr.bf16.mxu1 %v5674_v0  ;;  %v4514_v58 = vcombine.high %v581_v56, %v581_v56  ;;  %v5712_v0 = vld [vmem:[%s6096_s7 + $0x6b0] sm:$0xff]  }
 0x117   : > { %3795 = vmatmul.mubr.bf16.gmra.mrb[76].mxu0 %v4507_v60  ;;  %v4513_v60 = vcombine.low %v581_v56, %v581_v56  ;;  %v5725_v55 = vld [vmem:[%s6096_s7 + $0x750] sm:$0xff]  }
 0x118   : > { %3859 = vmatmul.mubr.bf16.gmra.mrb[76].mxu1 %v4509_v62  ;;  %5199 = vmatpush3.bf16.msra.mxu0 %v5675_v1  ;;  %v5710_v62 = vld [vmem:[%s6096_s7 + $0x6f0] sm:$0xff]  }
 0x119   : > { %5239 = vmatpush3.bf16.msra.mxu1 %v5676_v2  ;;  %5200 = vmatprep.subr.bf16.mxu0 %v5677_v3  ;;  %v5713_v2 = vld [vmem:[%s6096_s7 + $0x678] sm:$0xff]  }
 0x11a   : > { %5240 = vmatprep.subr.bf16.mxu1 %v5678_v4  ;;  %3898 = vmatprep.mubr.bf16.mxu0 %v4416_v10  ;;  %v5714_v4 = vld [vmem:[%s6096_s7 + $0x6f8] sm:$0xff]  }
 0x11b   : > { %3962 = vmatprep.mubr.bf16.mxu1 %v4418_v14  ;;  %v487_v14 = vld [vmem:[%s6098_s8 + $0x68] sm:$0xff] }
 0x11c   : > { %5201 = vmatpush3.bf16.msra.mxu0 %v5679_v5 }
 0x11d   : > { %5241 = vmatpush3.bf16.msra.mxu1 %v5680_v6  ;;  %5266 = vmatprep.subr.bf16.mxu0 %v5681_v15  ;;  %v5715_v6 = vld [vmem:[%s6096_s7 + $0x638] sm:$0xff]  }
 0x11e   : > { %5306 = vmatprep.subr.bf16.mxu1 %v5682_v16 }
 0x11f   : > { %3899 = vmatmul.mubr.bf16.vlgmr.msra.gmra.mrb[80].mxu0 %v4415_v9  ;;  %v5716_v9 = vld [vmem:[%s6096_s7 + $0x6b8] sm:$0xff]  }
 0x120   : > { %3963 = vmatmul.mubr.bf16.vlgmr.msra.gmra.mrb[80].mxu1 %v4417_v13  ;;  %5267 = vmatpush3.bf16.msra.mxu0 %v5683_v17  ;;  %v502_v13 = vld [vmem:[%s6098_s8 + $0xe0] sm:$0xff] }
 0x121   : > { %5307 = vmatpush3.bf16.msra.mxu1 %v5684_v18  ;;  %5268 = vmatprep.subr.bf16.mxu0 %v5685_v19  ;;  %v4419_v17 = vcombine.low %v486_v12, %v502_v13  ;;  %v4420_v18 = vcombine.high %v486_v12, %v502_v13  ;;  %v503_v19 = vld [vmem:[%s6098_s8 + $0xe8] sm:$0xff] }
 0x122   : > { %5308 = vmatprep.subr.bf16.mxu1 %v5686_v20  ;;  %3906 = vmatprep.mubr.bf16.mxu0 %v4448_v27  ;;  %v4422_v23 = vcombine.high %v487_v14, %v503_v19  ;;  %v5718_v27 = vld [vmem:[%s6096_s7 + $0x7c0] sm:$0xff]   ;;  %v567_v12 = vld [vmem:[%s6098_s8 + $0x2e8] sm:$0xff] }
 0x123   : > { %3970 = vmatprep.mubr.bf16.mxu1 %v4450_v28  ;;  %v5719_v28 = vld [vmem:[%s6096_s7 + $0x700] sm:$0xff]  }
 0x124   : > { %5269 = vmatpush3.bf16.msra.mxu0 %v5687_v21 }
 0x125   : > { %5309 = vmatpush3.bf16.msra.mxu1 %v5688_v22  ;;  %5270 = vmatprep.subr.bf16.mxu0 %v5689_v31  ;;  %v4421_v22 = vcombine.low %v487_v14, %v503_v19  ;;  %v5720_v31 = vld [vmem:[%s6096_s7 + $0x780] sm:$0xff]  }
 0x126   : > { %5310 = vmatprep.subr.bf16.mxu1 %v5690_v32  ;;  %v5733_v19 = vld [vmem:[%s6096_s7 + $0x760] sm:$0xff]  }
 0x127   : > { %3907 = vmatmul.mubr.bf16.gmra.mrb[84].mxu0 %v4447_v29 }
 0x128   : > { %3971 = vmatmul.mubr.bf16.gmra.mrb[84].mxu1 %v4449_v30  ;;  %5271 = vmatpush3.bf16.msra.mxu0 %v5691_v33  ;;  %v5721_v33 = vld [vmem:[%s6096_s7 + $0x748] sm:$0xff]  }
 0x129   : > { %5311 = vmatpush3.bf16.msra.mxu1 %v5692_v34  ;;  %5272 = vmatprep.subr.bf16.mxu0 %v5693_v35  ;;  %v5722_v35 = vld [vmem:[%s6096_s7 + $0x7c8] sm:$0xff]  }
 0x12a   : > { %5312 = vmatprep.subr.bf16.mxu1 %v5694_v36  ;;  %3914 = vmatprep.mubr.bf16.mxu0 %v4480_v42  ;;  %v518_v42 = vld [vmem:[%s6098_s8 + $0x160] sm:$0xff] }
 0x12b   : > { %3978 = vmatprep.mubr.bf16.mxu1 %v4482_v45 }
 0x12c   : > { %5273 = vmatpush3.bf16.msra.mxu0 %v5695_v37 }
 0x12d   : > { %5313 = vmatpush3.bf16.msra.mxu1 %v5696_v38  ;;  %5274 = vmatprep.subr.bf16.mxu0 %v5697_v47  ;;  %v5723_v38 = vld [vmem:[%s6096_s7 + $0x708] sm:$0xff]  }
 0x12e   : > { %5314 = vmatprep.subr.bf16.mxu1 %v5698_v48  ;;  %v519_v47 = vld [vmem:[%s6098_s8 + $0x168] sm:$0xff] }
 0x12f   : > { %3915 = vmatmul.mubr.bf16.gmra.mrb[88].mxu0 %v4479_v44  ;;  %v535_v48 = vld [vmem:[%s6098_s8 + $0x1e8] sm:$0xff] }
 0x130   : > { %3979 = vmatmul.mubr.bf16.gmra.mrb[88].mxu1 %v4481_v46  ;;  %5275 = vmatpush3.bf16.msra.mxu0 %v5699_v49  ;;  %v4452_v46 = vcombine.high %v518_v42, %v534_v43  ;;  %v4451_v49 = vcombine.low %v518_v42, %v534_v43 }
 0x131   : > { %5315 = vmatpush3.bf16.msra.mxu1 %v5700_v50  ;;  %5276 = vmatprep.subr.bf16.mxu0 %v5701_v51 }
 0x132   : > { %5316 = vmatprep.subr.bf16.mxu1 %v5702_v52  ;;  %3922 = vmatprep.mubr.bf16.mxu0 %v4512_v57  ;;  %v5726_v57 = vld [vmem:[%s6096_s7 + $0x7d0] sm:$0xff]  }
 0x133   : > { %3986 = vmatprep.mubr.bf16.mxu1 %v4514_v58  ;;  %v5727_v58 = vld [vmem:[%s6096_s7 + $0x710] sm:$0xff]  }
 0x134   : > { %5277 = vmatpush3.bf16.msra.mxu0 %v5703_v53  ;;  %v4454_v53 = vcombine.high %v519_v47, %v535_v48 }
 0x135   : > { %5317 = vmatpush3.bf16.msra.mxu1 %v5704_v54  ;;  %5278 = vmatprep.subr.bf16.mxu0 %v5709_v61  ;;  %v4453_v54 = vcombine.low %v519_v47, %v535_v48  ;;  %v5745_v47 = vld [vmem:[%s6096_s7 + $0x770] sm:$0xff]  }
 0x136   : > { %5318 = vmatprep.subr.bf16.mxu1 %v5710_v62  ;;  %v5729_v62 = vld [vmem:[%s6096_s7 + $0x758] sm:$0xff]  }
 0x137   : > { %3923 = vmatmul.mubr.bf16.gmra.mrb[92].mxu0 %v4511_v59 }
 0x138   : > { %3987 = vmatmul.mubr.bf16.gmra.mrb[92].mxu1 %v4513_v60  ;;  %5279 = vmatpush3.bf16.msra.mxu0 %v5711_v63  ;;  %v5728_v60 = vld [vmem:[%s6096_s7 + $0x790] sm:$0xff]  }
 0x139   : > { %5319 = vmatpush3.bf16.msra.mxu1 %v5712_v0  ;;  %5280 = vmatprep.subr.bf16.mxu0 %v5713_v2  ;;  %v5730_v0 = vld [vmem:[%s6096_s7 + $0x7d8] sm:$0xff]  }
 0x13a   : > { %5320 = vmatprep.subr.bf16.mxu1 %v5714_v4  ;;  %4026 = vmatprep.mubr.bf16.mxu0 %v4420_v18  ;;  %v5731_v2 = vld [vmem:[%s6096_s7 + $0x718] sm:$0xff]  }
 0x13b   : > { %4090 = vmatprep.mubr.bf16.mxu1 %v4422_v23 }
 0x13c   : > { %5281 = vmatpush3.bf16.msra.mxu0 %v5715_v6  ;;  %v550_v6 = vld [vmem:[%s6098_s8 + $0x260] sm:$0xff] }
 0x13d   : > { %5321 = vmatpush3.bf16.msra.mxu1 %v5716_v9  ;;  %5346 = vmatprep.subr.bf16.mxu0 %v5717_v24 }
 0x13e   : > { %5386 = vmatprep.subr.bf16.mxu1 %v5718_v27 }
 0x13f   : > { %4027 = vmatmul.mubr.bf16.vlgmr.msra.gmra.mrb[96].mxu0 %v4419_v17 }
 0x140   : > { %4091 = vmatmul.mubr.bf16.vlgmr.msra.gmra.mrb[96].mxu1 %v4421_v22  ;;  %5347 = vmatpush3.bf16.msra.mxu0 %v5719_v28 }
 0x141   : > { %5387 = vmatpush3.bf16.msra.mxu1 %v5720_v31  ;;  %5348 = vmatprep.subr.bf16.mxu0 %v5721_v33 }
 0x142   : > { %5388 = vmatprep.subr.bf16.mxu1 %v5722_v35  ;;  %4034 = vmatprep.mubr.bf16.mxu0 %v4452_v46 }
 0x143   : > { %4098 = vmatprep.mubr.bf16.mxu1 %v4454_v53  ;;  %v5747_v53 = vld [vmem:[%s6096_s7 + $0x730] sm:$0xff]  }
 0x144   : > { %5349 = vmatpush3.bf16.msra.mxu0 %v5723_v38 }
 0x145   : > { %5389 = vmatpush3.bf16.msra.mxu1 %v5724_v41  ;;  %5350 = vmatprep.subr.bf16.mxu0 %v5725_v55  ;;  %v583_v41 = vld [vmem:[%s6098_s8 + $0x368] sm:$0xff] }
 0x146   : > { %5390 = vmatprep.subr.bf16.mxu1 %v5726_v57 }
 0x147   : > { %4035 = vmatmul.mubr.bf16.gmra.mrb[100].mxu0 %v4451_v49  ;;  %v4517_v49 = vcombine.low %v583_v41, %v583_v41 }
 0x148   : > { %4099 = vmatmul.mubr.bf16.gmra.mrb[100].mxu1 %v4453_v54  ;;  %5351 = vmatpush3.bf16.msra.mxu0 %v5727_v58  ;;  %v5748_v54 = vld [vmem:[%s6096_s7 + $0x7b0] sm:$0xff]   ;;  %v5750_v58 = vld [vmem:[%s6096_s7 + $0x7f8] sm:$0xff]  }
 0x149   : > { %5391 = vmatpush3.bf16.msra.mxu1 %v5728_v60  ;;  %5352 = vmatprep.subr.bf16.mxu0 %v5729_v62 }
 0x14a   : > { %5392 = vmatprep.subr.bf16.mxu1 %v5730_v0  ;;  %v5752_v0 = vld [vmem:[%s6096_s7 + $0x7b8] sm:$0xff]  }
 0x14c   : > { %5353 = vmatpush3.bf16.msra.mxu0 %v5731_v2 }
 0x14d   : > { %5354 = vmatprep.subr.bf16.mxu0 %v5733_v19  ;;  %v537_v19 = vld [vmem:[%s6098_s8 + $0x1f8] sm:$0xff] }
 0x152   : > { %v4802_v1 = vpop.f32.mrb[0].mxu0 }
 0x153   : > { %v4842_v3 = vpop.f32.mrb[0].mxu1  ;;  %v4803_v5 = vpop.f32.mrb[1].mxu0 }
 0x154   : > { %v4804_v7 = vadd.f32 %v4803_v5, %v4802_v1  ;;  %v4843_v8 = vpop.f32.mrb[1].mxu1  ;;  %v4805_v11 = vpop.f32.mrb[2].mxu0  ;;  %v5732_v5 = vld [vmem:[%s6096_s7 + $0x798] sm:$0xff]  }
 0x155   : > { %v4844_v10 = vadd.f32 %v4843_v8, %v4842_v3  ;;  %v4845_v15 = vpop.f32.mrb[2].mxu1  ;;  %v4806_v16 = vpop.f32.mrb[3].mxu0  ;;  %5393 = vmatpush3.bf16.msra.mxu1 %v5732_v5  ;;  %v504_v5 = vld [vmem:[%s6098_s8 + $0xf0] sm:$0xff] }
 0x156   : > { %v4846_v21 = vpop.f32.mrb[3].mxu1  ;;  %v4807_v25 = vadd.f32 %v4806_v16, %v4805_v11  ;;  %v551_v11 = vld [vmem:[%s6098_s8 + $0x268] sm:$0xff] }
 0x157   : > { %v6434_v20 = vadd.f32 %v4844_v10, %v4804_v7  ;;  %v4847_v26 = vadd.f32 %v4846_v21, %v4845_v15  ;;  %v566_v10 = vld [vmem:[%s6098_s8 + $0x2e0] sm:$0xff]  ;;  %v4486_v16 = vcombine.high %v551_v11, %v567_v12  ;;  %v4485_v18 = vcombine.low %v551_v11, %v567_v12 }
 0x158   : > { %v4484_v15 = vcombine.high %v550_v6, %v566_v10  ;;  %v4483_v17 = vcombine.low %v550_v6, %v566_v10  ;;  %v5734_v21 = vld [vmem:[%s6096_s7 + $0x7e0] sm:$0xff]   ;;  %v489_v6 = vld [vmem:[%s6098_s8 + $0x78] sm:$0xff] }
 0x159   : > { %v6439_v29 = vadd.f32 %v4847_v26, %v4807_v25  ;;  %4106 = vmatprep.mubr.bf16.mxu1 %v4486_v16  ;;  %v5735_v25 = vld [vmem:[%s6096_s7 + $0x720] sm:$0xff]   ;;  %5394 = vmatprep.subr.bf16.mxu1 %v5734_v21  ;;  %v521_v16 = vld [vmem:[%s6098_s8 + $0x178] sm:$0xff] }
 0x15a   : > { %v4808_v30 = vpop.f32.mrb[4].mxu0  ;;  %4042 = vmatprep.mubr.bf16.mxu0 %v4484_v15  ;;  %4107 = vmatmul.mubr.bf16.gmra.mrb[104].mxu1 %v4485_v18  ;;  %v5736_v26 = vld [vmem:[%s6096_s7 + $0x7a0] sm:$0xff]   ;;  %v536_v15 = vld [vmem:[%s6098_s8 + $0x1f0] sm:$0xff] }
 0x15b   : > { %v4848_v32 = vpop.f32.mrb[4].mxu1  ;;  %v4809_v34 = vpop.f32.mrb[5].mxu0  ;;  %4043 = vmatmul.mubr.bf16.gmra.mrb[104].mxu0 %v4483_v17  ;;  %5395 = vmatpush3.bf16.msra.mxu1 %v5736_v26 }
 0x15c   : > { %v4810_v36 = vadd.f32 %v4809_v34, %v4808_v30  ;;  %v4849_v37 = vpop.f32.mrb[5].mxu1  ;;  %v4811_v40 = vpop.f32.mrb[6].mxu0  ;;  %v5737_v30 = vld [vmem:[%s6096_s7 + $0x768] sm:$0xff]   ;;  %5355 = vmatpush3.bf16.msra.mxu0 %v5735_v25 }
 0x15d   : > { %v4850_v39 = vadd.f32 %v4849_v37, %v4848_v32  ;;  %v4851_v44 = vpop.f32.mrb[6].mxu1  ;;  %v4812_v45 = vpop.f32.mrb[7].mxu0  ;;  %v5738_v32 = vld [vmem:[%s6096_s7 + $0x7e8] sm:$0xff]   ;;  %5356 = vmatprep.subr.bf16.mxu0 %v5737_v30  ;;  %v552_v30 = vld [vmem:[%s6098_s8 + $0x270] sm:$0xff] }
 0x15e   : > { %v4813_v51 = vadd.f32 %v4812_v45, %v4811_v40  ;;  %v4852_v52 = vpop.f32.mrb[7].mxu1  ;;  %v5739_v34 = vld [vmem:[%s6096_s7 + $0x728] sm:$0xff]   ;;  %5396 = vmatprep.subr.bf16.mxu1 %v5738_v32  ;;  %v582_v40 = vld [vmem:[%s6098_s8 + $0x360] sm:$0xff]  ;;  %v4518_v45 = vcombine.high %v583_v41, %v583_v41 }
 0x15f   : > { %v6450_v50 = vadd.f32 %v4850_v39, %v4810_v36  ;;  %v4853_v56 = vadd.f32 %v4852_v52, %v4851_v44  ;;  %v5740_v37 = vld [vmem:[%s6096_s7 + $0x7a8] sm:$0xff]   ;;  %v4516_v44 = vcombine.high %v582_v40, %v582_v40  ;;  %v4515_v46 = vcombine.low %v582_v40, %v582_v40 }
 0x160   : > { %5357 = vmatpush3.bf16.msra.mxu0 %v5739_v34  ;;  %5397 = vmatpush3.bf16.msra.mxu1 %v5740_v37  ;;  %v569_v37 = vld [vmem:[%s6098_s8 + $0x2f8] sm:$0xff] }
 0x161   : > { %v6455_v59 = vadd.f32 %v4853_v56, %v4813_v51  ;;  %v5746_v51 = vld [vmem:[%s6096_s7 + $0x7f0] sm:$0xff]   ;;  %4050 = vmatprep.mubr.bf16.mxu0 %v4516_v44  ;;  %4114 = vmatprep.mubr.bf16.mxu1 %v4518_v45  ;;  %v5749_v56 = vld [vmem:[%s6096_s7 + $0x778] sm:$0xff]  }
 0x162   : > { %v4814_v61 = vpop.f32.mrb[8].mxu0  ;;  %4115 = vmatmul.mubr.bf16.gmra.mrb[108].mxu1 %v4517_v49  ;;  %5358 = vmatprep.subr.bf16.mxu0 %v5745_v47 }
 0x163   : > { %v4854_v63 = vpop.f32.mrb[8].mxu1  ;;  %v4815_v1 = vpop.f32.mrb[9].mxu0  ;;  %4051 = vmatmul.mubr.bf16.gmra.mrb[108].mxu0 %v4515_v46  ;;  %5398 = vmatprep.subr.bf16.mxu1 %v5746_v51  ;;  %v4457_v46 = vcombine.low %v521_v16, %v537_v19 }
 0x164   : > { %v4816_v3 = vadd.f32 %v4815_v1, %v4814_v61  ;;  %v4855_v4 = vpop.f32.mrb[9].mxu1  ;;  %v4817_v8 = vpop.f32.mrb[10].mxu0  ;;  %5359 = vmatpush3.bf16.msra.mxu0 %v5747_v53  ;;  %5399 = vmatpush3.bf16.msra.mxu1 %v5748_v54  ;;  %v5751_v61 = vld [vmem:[%s6096_s7 + $0x738] sm:$0xff]   ;;  %v488_v1 = vld [vmem:[%s6098_s8 + $0x70] sm:$0xff] }
 0x165   : > { %v4856_v7 = vadd.f32 %v4855_v4, %v4854_v63  ;;  %v4857_v9 = vpop.f32.mrb[10].mxu1  ;;  %v4818_v13 = vpop.f32.mrb[11].mxu0  ;;  %5360 = vmatprep.subr.bf16.mxu0 %v5749_v56  ;;  %5400 = vmatprep.subr.bf16.mxu1 %v5750_v58  ;;  %v4423_v11 = vcombine.low %v488_v1, %v504_v5  ;;  %v4424_v12 = vcombine.high %v488_v1, %v504_v5 }
 0x166   : > { %v4858_v14 = vpop.f32.mrb[11].mxu1  ;;  %v4819_v23 = vadd.f32 %v4818_v13, %v4817_v8 }
 0x167   : > { %v6468_v22 = vadd.f32 %v4856_v7, %v4816_v3  ;;  %v4859_v24 = vadd.f32 %v4858_v14, %v4857_v9  ;;  %v505_v7 = vld [vmem:[%s6098_s8 + $0xf8] sm:$0xff]  ;;  %v520_v14 = vld [vmem:[%s6098_s8 + $0x170] sm:$0xff]  ;;  %4154 = vmatprep.mubr.bf16.mxu0 %v4424_v12 }
 0x168   : > { %5361 = vmatpush3.bf16.msra.mxu0 %v5751_v61  ;;  %5401 = vmatpush3.bf16.msra.mxu1 %v5752_v0  ;;  %v4425_v13 = vcombine.low %v489_v6, %v505_v7  ;;  %v4426_v17 = vcombine.high %v489_v6, %v505_v7  ;;  %v4456_v18 = vcombine.high %v520_v14, %v536_v15 }
 0x169   : > { %v6472_v27 = vadd.f32 %v4859_v24, %v4819_v23  ;;  %v4458_v23 = vcombine.high %v521_v16, %v537_v19  ;;  %v4455_v41 = vcombine.low %v520_v14, %v536_v15 }
 0x16a   : > { %v4820_v28 = vpop.f32.mrb[12].mxu0  ;;  %4218 = vmatprep.mubr.bf16.mxu1 %v4426_v17 }
 0x16b   : > { %v4860_v31 = vpop.f32.mrb[12].mxu1  ;;  %v4821_v33 = vpop.f32.mrb[13].mxu0  ;;  %4155 = vmatmul.mubr.bf16.vlgmr.msra.gmra.mrb[112].mxu0 %v4423_v11  ;;  %4219 = vmatmul.mubr.bf16.vlgmr.msra.gmra.mrb[112].mxu1 %v4425_v13 }
 0x16c   : > { %v4822_v35 = vadd.f32 %v4821_v33, %v4820_v28  ;;  %v4861_v36 = vpop.f32.mrb[13].mxu1  ;;  %v4823_v39 = vpop.f32.mrb[14].mxu0  ;;  %4162 = vmatprep.mubr.bf16.mxu0 %v4456_v18  ;;  %4226 = vmatprep.mubr.bf16.mxu1 %v4458_v23 }
 0x16d   : > { %v4862_v38 = vadd.f32 %v4861_v36, %v4860_v31  ;;  %v4863_v42 = vpop.f32.mrb[14].mxu1  ;;  %v4824_v43 = vpop.f32.mrb[15].mxu0  ;;  %v568_v31 = vld [vmem:[%s6098_s8 + $0x2f0] sm:$0xff]  ;;  %v553_v36 = vld [vmem:[%s6098_s8 + $0x278] sm:$0xff] }
 0x16e   : > { %v4864_v48 = vpop.f32.mrb[15].mxu1  ;;  %v4488_v47 = vcombine.high %v552_v30, %v568_v31 }
 0x16f   : > { %v6482_v52 = vadd.f32 %v4862_v38, %v4822_v35  ;;  %v4490_v48 = vcombine.high %v553_v36, %v569_v37 }
 0x172   : > { %v4882_v55 = vpop.f32.mrb[16].mxu0 }
 0x173   : > { %v4922_v57 = vpop.f32.mrb[16].mxu1  ;;  %v4883_v60 = vpop.f32.mrb[17].mxu0  ;;  %4163 = vmatmul.mubr.bf16.gmra.mrb[116].mxu0 %v4455_v41  ;;  %4227 = vmatmul.mubr.bf16.gmra.mrb[116].mxu1 %v4457_v46 }
 0x174   : > { %v4884_v62 = vadd.f32 %v4883_v60, %v4882_v55  ;;  %v4923_v63 = vpop.f32.mrb[17].mxu1  ;;  %v4885_v3 = vpop.f32.mrb[18].mxu0  ;;  %4170 = vmatprep.mubr.bf16.mxu0 %v4488_v47  ;;  %4234 = vmatprep.mubr.bf16.mxu1 %v4490_v48  ;;  %v584_v55 = vld [vmem:[%s6098_s8 + $0x370] sm:$0xff] }
 0x175   : > { %v4924_v2 = vadd.f32 %v4923_v63, %v4922_v57  ;;  %v4925_v4 = vpop.f32.mrb[18].mxu1  ;;  %v4886_v9 = vpop.f32.mrb[19].mxu0  ;;  %v585_v57 = vld [vmem:[%s6098_s8 + $0x378] sm:$0xff]  ;;  %v4519_v14 = vcombine.low %v584_v55, %v584_v55 }
 0x176   : > { %v3389_v8 = vadd.f32 %v4884_v62, %v6434_v20  ;;  %v4926_v10 = vpop.f32.mrb[19].mxu1  ;;  %v4887_v20 = vadd.f32 %v4886_v9, %v4885_v3  ;;  %v4487_v62 = vcombine.low %v552_v30, %v568_v31  ;;  %v4522_v6 = vcombine.high %v585_v57, %v585_v57 }
 0x177   : > { %v4927_v25 = vadd.f32 %v4926_v10, %v4925_v4  ;;  %v4521_v17 = vcombine.low %v585_v57, %v585_v57 }
 0x178   : > { %v6499_v21 = vadd.f32 %v4924_v2, %v3389_v8  ;;  %v3392_v32 = vadd.f32 %v4887_v20, %v6439_v29  ;;  %v4489_v2 = vcombine.low %v553_v36, %v569_v37 }
 0x17a   : > { %v4888_v24 = vpop.f32.mrb[20].mxu0  ;;  %v6506_v42 = vadd.f32 %v4927_v25, %v3392_v32 }
 0x17b   : > { %v4928_v26 = vpop.f32.mrb[20].mxu1  ;;  %v4889_v28 = vpop.f32.mrb[21].mxu0  ;;  %4171 = vmatmul.mubr.bf16.gmra.mrb[120].mxu0 %v4487_v62  ;;  %4235 = vmatmul.mubr.bf16.gmra.mrb[120].mxu1 %v4489_v2 }
 0x17c   : > { %v4890_v33 = vadd.f32 %v4889_v28, %v4888_v24  ;;  %v4929_v34 = vpop.f32.mrb[21].mxu1  ;;  %v4891_v35 = vpop.f32.mrb[22].mxu0  ;;  %4242 = vmatprep.mubr.bf16.mxu1 %v4522_v6 }
 0x17d   : > { %v4930_v38 = vadd.f32 %v4929_v34, %v4928_v26  ;;  %v4931_v39 = vpop.f32.mrb[22].mxu1  ;;  %v4892_v40 = vpop.f32.mrb[23].mxu0 }
 0x17e   : > { %v3397_v43 = vadd.f32 %v4890_v33, %v6450_v50  ;;  %v4893_v44 = vadd.f32 %v4892_v40, %v4891_v35  ;;  %v4932_v45 = vpop.f32.mrb[23].mxu1 }
 0x17f   : > { %v4933_v29 = vadd.f32 %v4932_v45, %v4931_v39 }
 0x180   : > { %v6509_v49 = vadd.f32 %v4930_v38, %v3397_v43  ;;  %v3400_v51 = vadd.f32 %v4893_v44, %v6455_v59  ;;  %v4520_v59 = vcombine.high %v584_v55, %v584_v55 }
 0x182   : > { %v6512_v53 = vadd.f32 %v4933_v29, %v3400_v51  ;;  %v4894_v54 = vpop.f32.mrb[24].mxu0  ;;  %4178 = vmatprep.mubr.bf16.mxu0 %v4520_v59 }
 0x183   : > { %v4934_v50 = vpop.f32.mrb[24].mxu1  ;;  %v4895_v56 = vpop.f32.mrb[25].mxu0  ;;  %4179 = vmatmul.mubr.bf16.gmra.mrb[124].mxu0 %v4519_v14  ;;  %4243 = vmatmul.mubr.bf16.gmra.mrb[124].mxu1 %v4521_v17 }
 0x184   : > { %v4896_v58 = vadd.f32 %v4895_v56, %v4894_v54  ;;  %v4935_v60 = vpop.f32.mrb[25].mxu1  ;;  %v4897_v61 = vpop.f32.mrb[26].mxu0 }
 0x185   : > { %v4936_v63 = vadd.f32 %v4935_v60, %v4934_v50  ;;  %v4937_v0 = vpop.f32.mrb[26].mxu1  ;;  %v4898_v1 = vpop.f32.mrb[27].mxu0 }
 0x186   : > { %v3405_v3 = vadd.f32 %v4896_v58, %v6468_v22  ;;  %v4899_v4 = vadd.f32 %v4898_v1, %v4897_v61  ;;  %v4938_v5 = vpop.f32.mrb[27].mxu1 }
 0x187   : > { %v4939_v7 = vadd.f32 %v4938_v5, %v4937_v0 }
 0x188   : > { %v6517_v8 = vadd.f32 %v4936_v63, %v3405_v3  ;;  %v3408_v9 = vadd.f32 %v4899_v4, %v6472_v27 }
 0x18a   : > { %v6520_v10 = vadd.f32 %v4939_v7, %v3408_v9  ;;  %v4900_v11 = vpop.f32.mrb[28].mxu0 }
 0x18b   : > { %v4940_v12 = vpop.f32.mrb[28].mxu1  ;;  %v4901_v13 = vpop.f32.mrb[29].mxu0 }
 0x18c   : > { %v4902_v15 = vadd.f32 %v4901_v13, %v4900_v11  ;;  %v4941_v22 = vpop.f32.mrb[29].mxu1  ;;  %v4903_v16 = vpop.f32.mrb[30].mxu0 }
 0x18d   : > { %v4942_v18 = vadd.f32 %v4941_v22, %v4940_v12  ;;  %v4943_v19 = vpop.f32.mrb[30].mxu1  ;;  %v4904_v23 = vpop.f32.mrb[31].mxu0 }
 0x18e   : > { %v3413_v20 = vadd.f32 %v4902_v15, %v6482_v52  ;;  %v4944_v27 = vpop.f32.mrb[31].mxu1 }
 0x190   : > { %v3477_v24 = vadd.f32 %v4942_v18, %v3413_v20 }
 0x192   : > { %v4962_v25 = vpop.f32.mrb[32].mxu0 }
 0x193   : > { %v5002_v26 = vpop.f32.mrb[32].mxu1  ;;  %v4963_v28 = vpop.f32.mrb[33].mxu0 }
 0x194   : > { %v4964_v30 = vadd.f32 %v4963_v28, %v4962_v25  ;;  %v5003_v31 = vpop.f32.mrb[33].mxu1  ;;  %v4965_v32 = vpop.f32.mrb[34].mxu0 }
 0x195   : > { %v5004_v33 = vadd.f32 %v5003_v31, %v5002_v26  ;;  %v5005_v34 = vpop.f32.mrb[34].mxu1  ;;  %v4966_v35 = vpop.f32.mrb[35].mxu0 }
 0x196   : > { %v3517_v36 = vadd.f32 %v4964_v30, %v6499_v21  ;;  %v4967_v37 = vadd.f32 %v4966_v35, %v4965_v32  ;;  %v5006_v38 = vpop.f32.mrb[35].mxu1 }
 0x197   : > { %v5007_v39 = vadd.f32 %v5006_v38, %v5005_v34 }
 0x198   : > { %v3581_v40 = vadd.f32 %v5004_v33, %v3517_v36  ;;  %v3520_v52 = vadd.f32 %v4967_v37, %v6506_v42 }
 0x19a   : > { %v3584_v41 = vadd.f32 %v5007_v39, %v3520_v52  ;;  %v4968_v43 = vpop.f32.mrb[36].mxu0 }
 0x19b   : > { %v5008_v44 = vpop.f32.mrb[36].mxu1  ;;  %v4969_v45 = vpop.f32.mrb[37].mxu0 }
 0x19c   : > { %v5009_v46 = vpop.f32.mrb[37].mxu1  ;;  %v4970_v47 = vadd.f32 %v4969_v45, %v4968_v43  ;;  %v4971_v48 = vpop.f32.mrb[38].mxu0 }
 0x19d   : > { %v5010_v29 = vadd.f32 %v5009_v46, %v5008_v44  ;;  %v5011_v51 = vpop.f32.mrb[38].mxu1  ;;  %v4972_v54 = vpop.f32.mrb[39].mxu0 }
 0x19e   : > { %v5012_v55 = vpop.f32.mrb[39].mxu1  ;;  %v3525_v50 = vadd.f32 %v4970_v47, %v6509_v49  ;;  %v4973_v21 = vadd.f32 %v4972_v54, %v4971_v48 }
 0x19f   : > { %v5013_v56 = vadd.f32 %v5012_v55, %v5011_v51 }
 0x1a0   : > { %v3589_v57 = vadd.f32 %v5010_v29, %v3525_v50  ;;  %v3528_v58 = vadd.f32 %v4973_v21, %v6512_v53 }
 0x1a2   : > { %v3592_v60 = vadd.f32 %v5013_v56, %v3528_v58  ;;  %v4974_v42 = vpop.f32.mrb[40].mxu0 }
 0x1a3   : > { %v5014_v61 = vpop.f32.mrb[40].mxu1  ;;  %v4975_v62 = vpop.f32.mrb[41].mxu0 }
 0x1a4   : > { %v4976_v63 = vadd.f32 %v4975_v62, %v4974_v42  ;;  %v5015_v0 = vpop.f32.mrb[41].mxu1  ;;  %v4977_v1 = vpop.f32.mrb[42].mxu0 }
 0x1a5   : > { %v5016_v2 = vadd.f32 %v5015_v0, %v5014_v61  ;;  %v5017_v59 = vpop.f32.mrb[42].mxu1  ;;  %v4978_v3 = vpop.f32.mrb[43].mxu0 }
 0x1a6   : > { %v3533_v4 = vadd.f32 %v4976_v63, %v6517_v8  ;;  %v4979_v5 = vadd.f32 %v4978_v3, %v4977_v1  ;;  %v5018_v6 = vpop.f32.mrb[43].mxu1 }
 0x1a7   : > { %v5019_v49 = vadd.f32 %v5018_v6, %v5017_v59 }
 0x1a8   : > { %v3597_v7 = vadd.f32 %v5016_v2, %v3533_v4  ;;  %v3536_v9 = vadd.f32 %v4979_v5, %v6520_v10 }
 0x1aa   : > { %v3600_v11 = vadd.f32 %v5019_v49, %v3536_v9  ;;  %v4980_v53 = vpop.f32.mrb[44].mxu0 }
 0x1ab   : > { %v5020_v12 = vpop.f32.mrb[44].mxu1  ;;  %v4981_v13 = vpop.f32.mrb[45].mxu0 }
 0x1ac   : > { %v5021_v14 = vpop.f32.mrb[45].mxu1  ;;  %v4982_v15 = vadd.f32 %v4981_v13, %v4980_v53  ;;  %v4983_v16 = vpop.f32.mrb[46].mxu0 }
 0x1ad   : > { %v5022_v22 = vadd.f32 %v5021_v14, %v5020_v12  ;;  %v5023_v17 = vpop.f32.mrb[46].mxu1  ;;  %v4984_v18 = vpop.f32.mrb[47].mxu0 }
 0x1ae   : > { %v5024_v19 = vpop.f32.mrb[47].mxu1  ;;  %v3541_v23 = vadd.f32 %v4982_v15, %v3477_v24 }
 0x1b0   : > { %v3605_v20 = vadd.f32 %v5022_v22, %v3541_v23 }
 0x1b2   : > { %v5042_v8 = vpop.f32.mrb[48].mxu0 }
 0x1b3   : > { %v5082_v27 = vpop.f32.mrb[48].mxu1  ;;  %v5043_v25 = vpop.f32.mrb[49].mxu0 }
 0x1b4   : > { %v5044_v26 = vadd.f32 %v5043_v25, %v5042_v8  ;;  %v5083_v28 = vpop.f32.mrb[49].mxu1  ;;  %v5045_v30 = vpop.f32.mrb[50].mxu0 }
 0x1b5   : > { %v5084_v10 = vadd.f32 %v5083_v28, %v5082_v27  ;;  %v5085_v31 = vpop.f32.mrb[50].mxu1  ;;  %v5046_v32 = vpop.f32.mrb[51].mxu0 }
 0x1b6   : > { %v3645_v33 = vadd.f32 %v5044_v26, %v3581_v40  ;;  %v5047_v34 = vadd.f32 %v5046_v32, %v5045_v30  ;;  %v5086_v35 = vpop.f32.mrb[51].mxu1 }
 0x1b7   : > { %v5087_v36 = vadd.f32 %v5086_v35, %v5085_v31 }
 0x1b8   : > { %v3709_v37 = vadd.f32 %v5084_v10, %v3645_v33  ;;  %v3648_v38 = vadd.f32 %v5047_v34, %v3584_v41 }
 0x1ba   : > { %v3712_v39 = vadd.f32 %v5087_v36, %v3648_v38  ;;  %v5048_v52 = vpop.f32.mrb[52].mxu0 }
 0x1bb   : > { %v5088_v43 = vpop.f32.mrb[52].mxu1  ;;  %v5049_v24 = vpop.f32.mrb[53].mxu0 }
 0x1bc   : > { %v5050_v44 = vadd.f32 %v5049_v24, %v5048_v52  ;;  %v5089_v45 = vpop.f32.mrb[53].mxu1  ;;  %v5051_v46 = vpop.f32.mrb[54].mxu0 }
 0x1bd   : > { %v5090_v47 = vadd.f32 %v5089_v45, %v5088_v43  ;;  %v5091_v29 = vpop.f32.mrb[54].mxu1  ;;  %v5052_v48 = vpop.f32.mrb[55].mxu0 }
 0x1be   : > { %v3653_v51 = vadd.f32 %v5050_v44, %v3589_v57  ;;  %v5053_v54 = vadd.f32 %v5052_v48, %v5051_v46  ;;  %v5092_v55 = vpop.f32.mrb[55].mxu1 }
 0x1bf   : > { %v5093_v50 = vadd.f32 %v5092_v55, %v5091_v29 }
 0x1c0   : > { %v3717_v40 = vadd.f32 %v5090_v47, %v3653_v51  ;;  %v3656_v21 = vadd.f32 %v5053_v54, %v3592_v60 }
 0x1c2   : > { %v3720_v56 = vadd.f32 %v5093_v50, %v3656_v21  ;;  %v5054_v58 = vpop.f32.mrb[56].mxu0 }
 0x1c3   : > { %v5094_v42 = vpop.f32.mrb[56].mxu1  ;;  %v5055_v41 = vpop.f32.mrb[57].mxu0 }
 0x1c4   : > { %v5095_v61 = vpop.f32.mrb[57].mxu1  ;;  %v5056_v62 = vadd.f32 %v5055_v41, %v5054_v58  ;;  %v5057_v0 = vpop.f32.mrb[58].mxu0 }
 0x1c5   : > { %v5096_v63 = vadd.f32 %v5095_v61, %v5094_v42  ;;  %v5097_v1 = vpop.f32.mrb[58].mxu1  ;;  %v5058_v2 = vpop.f32.mrb[59].mxu0 }
 0x1c6   : > { %v5098_v59 = vpop.f32.mrb[59].mxu1  ;;  %v3661_v3 = vadd.f32 %v5056_v62, %v3597_v7  ;;  %v5059_v4 = vadd.f32 %v5058_v2, %v5057_v0 }
 0x1c7   : > { %v5099_v5 = vadd.f32 %v5098_v59, %v5097_v1 }
 0x1c8   : > { %v3725_v57 = vadd.f32 %v5096_v63, %v3661_v3  ;;  %v3664_v6 = vadd.f32 %v5059_v4, %v3600_v11 }
 0x1ca   : > { %v3728_v49 = vadd.f32 %v5099_v5, %v3664_v6  ;;  %v5060_v9 = vpop.f32.mrb[60].mxu0 }
 0x1cb   : > { %v5100_v53 = vpop.f32.mrb[60].mxu1  ;;  %v5061_v60 = vpop.f32.mrb[61].mxu0 }
 0x1cc   : > { %v5101_v12 = vpop.f32.mrb[61].mxu1  ;;  %v5062_v13 = vadd.f32 %v5061_v60, %v5060_v9  ;;  %v5063_v15 = vpop.f32.mrb[62].mxu0 }
 0x1cd   : > { %v5102_v14 = vadd.f32 %v5101_v12, %v5100_v53  ;;  %v5103_v22 = vpop.f32.mrb[62].mxu1  ;;  %v5064_v16 = vpop.f32.mrb[63].mxu0 }
 0x1ce   : > { %v5104_v17 = vpop.f32.mrb[63].mxu1  ;;  %v3669_v18 = vadd.f32 %v5062_v13, %v3605_v20 }
 0x1d0   : > { %v3733_v19 = vadd.f32 %v5102_v14, %v3669_v18 }
 0x1d2   : > { %v5122_v23 = vpop.f32.mrb[64].mxu0 }
 0x1d3   : > { %v5162_v8 = vpop.f32.mrb[64].mxu1  ;;  %v5123_v7 = vpop.f32.mrb[65].mxu0 }
 0x1d4   : > { %v5124_v27 = vadd.f32 %v5123_v7, %v5122_v23  ;;  %v5163_v25 = vpop.f32.mrb[65].mxu1  ;;  %v5125_v26 = vpop.f32.mrb[66].mxu0 }
 0x1d5   : > { %v5164_v11 = vadd.f32 %v5163_v25, %v5162_v8  ;;  %v5165_v28 = vpop.f32.mrb[66].mxu1  ;;  %v5126_v30 = vpop.f32.mrb[67].mxu0 }
 0x1d6   : > { %v3773_v10 = vadd.f32 %v5124_v27, %v3709_v37  ;;  %v5127_v31 = vadd.f32 %v5126_v30, %v5125_v26  ;;  %v5166_v32 = vpop.f32.mrb[67].mxu1 }
 0x1d7   : > { %v5167_v33 = vadd.f32 %v5166_v32, %v5165_v28 }
 0x1d8   : > { %v3837_v34 = vadd.f32 %v5164_v11, %v3773_v10  ;;  %v3776_v35 = vadd.f32 %v5127_v31, %v3712_v39 }
 0x1da   : > { %v3840_v36 = vadd.f32 %v5167_v33, %v3776_v35  ;;  %v5128_v38 = vpop.f32.mrb[68].mxu0 }
 0x1db   : > { %v5168_v52 = vpop.f32.mrb[68].mxu1  ;;  %v5129_v20 = vpop.f32.mrb[69].mxu0 }
 0x1dc   : > { %v5130_v43 = vadd.f32 %v5129_v20, %v5128_v38  ;;  %v5169_v24 = vpop.f32.mrb[69].mxu1  ;;  %v5131_v44 = vpop.f32.mrb[70].mxu0 }
 0x1dd   : > { %v5170_v45 = vadd.f32 %v5169_v24, %v5168_v52  ;;  %v5171_v46 = vpop.f32.mrb[70].mxu1  ;;  %v5132_v47 = vpop.f32.mrb[71].mxu0 }
 0x1de   : > { %v3781_v29 = vadd.f32 %v5130_v43, %v3717_v40  ;;  %v5133_v48 = vadd.f32 %v5132_v47, %v5131_v44  ;;  %v5172_v51 = vpop.f32.mrb[71].mxu1 }
 0x1df   : > { %v5173_v54 = vadd.f32 %v5172_v51, %v5171_v46 }
 0x1e0   : > { %v3845_v37 = vadd.f32 %v5170_v45, %v3781_v29  ;;  %v3784_v55 = vadd.f32 %v5133_v48, %v3720_v56 }
 0x1e2   : > { %v3848_v50 = vadd.f32 %v5173_v54, %v3784_v55  ;;  %v5134_v21 = vpop.f32.mrb[72].mxu0 }
 0x1e3   : > { %v5174_v58 = vpop.f32.mrb[72].mxu1  ;;  %v5135_v39 = vpop.f32.mrb[73].mxu0 }
 0x1e4   : > { %v5136_v42 = vadd.f32 %v5135_v39, %v5134_v21  ;;  %v5175_v41 = vpop.f32.mrb[73].mxu1  ;;  %v5137_v61 = vpop.f32.mrb[74].mxu0 }
 0x1e5   : > { %v5176_v62 = vadd.f32 %v5175_v41, %v5174_v58  ;;  %v5177_v63 = vpop.f32.mrb[74].mxu1  ;;  %v5138_v0 = vpop.f32.mrb[75].mxu0 }
 0x1e6   : > { %v3789_v1 = vadd.f32 %v5136_v42, %v3725_v57  ;;  %v5139_v2 = vadd.f32 %v5138_v0, %v5137_v61  ;;  %v5178_v59 = vpop.f32.mrb[75].mxu1 }
 0x1e7   : > { %v5179_v3 = vadd.f32 %v5178_v59, %v5177_v63 }
 0x1e8   : > { %v3853_v40 = vadd.f32 %v5176_v62, %v3789_v1  ;;  %v3792_v4 = vadd.f32 %v5139_v2, %v3728_v49 }
 0x1ea   : > { %v3856_v5 = vadd.f32 %v5179_v3, %v3792_v4  ;;  %v5140_v6 = vpop.f32.mrb[76].mxu0 }
 0x1eb   : > { %v5180_v9 = vpop.f32.mrb[76].mxu1  ;;  %v5141_v56 = vpop.f32.mrb[77].mxu0 }
 0x1ec   : > { %v5142_v53 = vadd.f32 %v5141_v56, %v5140_v6  ;;  %v5181_v60 = vpop.f32.mrb[77].mxu1  ;;  %v5143_v12 = vpop.f32.mrb[78].mxu0 }
 0x1ed   : > { %v5182_v13 = vadd.f32 %v5181_v60, %v5180_v9  ;;  %v5183_v14 = vpop.f32.mrb[78].mxu1  ;;  %v5144_v15 = vpop.f32.mrb[79].mxu0 }
 0x1ee   : > { %v3797_v22 = vadd.f32 %v5142_v53, %v3733_v19  ;;  %v5184_v16 = vpop.f32.mrb[79].mxu1 }
 0x1f0   : > { %v3861_v17 = vadd.f32 %v5182_v13, %v3797_v22 }
 0x1f2   : > { %v5202_v18 = vpop.f32.mrb[80].mxu0 }
 0x1f3   : > { %v5242_v57 = vpop.f32.mrb[80].mxu1  ;;  %v5203_v23 = vpop.f32.mrb[81].mxu0 }
 0x1f4   : > { %v5204_v8 = vadd.f32 %v5203_v23, %v5202_v18  ;;  %v5243_v7 = vpop.f32.mrb[81].mxu1  ;;  %v5205_v27 = vpop.f32.mrb[82].mxu0 }
 0x1f5   : > { %v5244_v49 = vadd.f32 %v5243_v7, %v5242_v57  ;;  %v5245_v25 = vpop.f32.mrb[82].mxu1  ;;  %v5206_v26 = vpop.f32.mrb[83].mxu0 }
 0x1f6   : > { %v3901_v11 = vadd.f32 %v5204_v8, %v3837_v34  ;;  %v5207_v28 = vadd.f32 %v5206_v26, %v5205_v27  ;;  %v5246_v30 = vpop.f32.mrb[83].mxu1 }
 0x1f7   : > { %v5247_v10 = vadd.f32 %v5246_v30, %v5245_v25 }
 0x1f8   : > { %v3965_v31 = vadd.f32 %v5244_v49, %v3901_v11  ;;  %v3904_v32 = vadd.f32 %v5207_v28, %v3840_v36 }
 0x1fa   : > { %v3968_v33 = vadd.f32 %v5247_v10, %v3904_v32  ;;  %v5208_v35 = vpop.f32.mrb[84].mxu0 }
 0x1fb   : > { %v5248_v19 = vpop.f32.mrb[84].mxu1  ;;  %v5209_v38 = vpop.f32.mrb[85].mxu0 }
 0x1fc   : > { %v5249_v52 = vpop.f32.mrb[85].mxu1  ;;  %v5210_v20 = vadd.f32 %v5209_v38, %v5208_v35  ;;  %v5211_v24 = vpop.f32.mrb[86].mxu0 }
 0x1fd   : > { %v5250_v43 = vadd.f32 %v5249_v52, %v5248_v19  ;;  %v5251_v44 = vpop.f32.mrb[86].mxu1  ;;  %v5212_v45 = vpop.f32.mrb[87].mxu0 }
 0x1fe   : > { %v5252_v46 = vpop.f32.mrb[87].mxu1  ;;  %v3909_v47 = vadd.f32 %v5210_v20, %v3845_v37  ;;  %v5213_v29 = vadd.f32 %v5212_v45, %v5211_v24 }
 0x1ff   : > { %v5253_v48 = vadd.f32 %v5252_v46, %v5251_v44 }
 0x200   : > { %v3973_v34 = vadd.f32 %v5250_v43, %v3909_v47  ;;  %v3912_v51 = vadd.f32 %v5213_v29, %v3848_v50 }
 0x202   : > { %v3976_v54 = vadd.f32 %v5253_v48, %v3912_v51  ;;  %v5214_v55 = vpop.f32.mrb[88].mxu0 }
 0x203   : > { %v5254_v21 = vpop.f32.mrb[88].mxu1  ;;  %v5215_v36 = vpop.f32.mrb[89].mxu0 }
 0x204   : > { %v5216_v58 = vadd.f32 %v5215_v36, %v5214_v55  ;;  %v5255_v39 = vpop.f32.mrb[89].mxu1  ;;  %v5217_v42 = vpop.f32.mrb[90].mxu0 }
 0x205   : > { %v5256_v41 = vadd.f32 %v5255_v39, %v5254_v21  ;;  %v5257_v61 = vpop.f32.mrb[90].mxu1  ;;  %v5218_v62 = vpop.f32.mrb[91].mxu0 }
 0x206   : > { %v3917_v63 = vadd.f32 %v5216_v58, %v3853_v40  ;;  %v5219_v0 = vadd.f32 %v5218_v62, %v5217_v42  ;;  %v5258_v1 = vpop.f32.mrb[91].mxu1 }
 0x207   : > { %v5259_v2 = vadd.f32 %v5258_v1, %v5257_v61 }
 0x208   : > { %v3981_v59 = vadd.f32 %v5256_v41, %v3917_v63  ;;  %v3920_v37 = vadd.f32 %v5219_v0, %v3856_v5 }
 0x20a   : > { %v3984_v3 = vadd.f32 %v5259_v2, %v3920_v37  ;;  %v5220_v4 = vpop.f32.mrb[92].mxu0 }
 0x20b   : > { %v5260_v6 = vpop.f32.mrb[92].mxu1  ;;  %v5221_v50 = vpop.f32.mrb[93].mxu0 }
 0x20c   : > { %v5261_v9 = vpop.f32.mrb[93].mxu1  ;;  %v5222_v56 = vadd.f32 %v5221_v50, %v5220_v4  ;;  %v5223_v60 = vpop.f32.mrb[94].mxu0 }
 0x20d   : > { %v5262_v53 = vadd.f32 %v5261_v9, %v5260_v6  ;;  %v5263_v12 = vpop.f32.mrb[94].mxu1  ;;  %v5224_v13 = vpop.f32.mrb[95].mxu0 }
 0x20e   : > { %v5264_v14 = vpop.f32.mrb[95].mxu1  ;;  %v3925_v15 = vadd.f32 %v5222_v56, %v3861_v17 }
 0x210   : > { %v3989_v22 = vadd.f32 %v5262_v53, %v3925_v15 }
 0x212   : > { %v5282_v16 = vpop.f32.mrb[96].mxu0 }
 0x213   : > { %v5322_v40 = vpop.f32.mrb[96].mxu1  ;;  %v5283_v18 = vpop.f32.mrb[97].mxu0 }
 0x214   : > { %v5284_v57 = vadd.f32 %v5283_v18, %v5282_v16  ;;  %v5323_v23 = vpop.f32.mrb[97].mxu1  ;;  %v5285_v8 = vpop.f32.mrb[98].mxu0 }
 0x215   : > { %v5324_v5 = vadd.f32 %v5323_v23, %v5322_v40  ;;  %v5325_v7 = vpop.f32.mrb[98].mxu1  ;;  %v5286_v27 = vpop.f32.mrb[99].mxu0 }
 0x216   : > { %v4029_v49 = vadd.f32 %v5284_v57, %v3965_v31  ;;  %v5287_v25 = vadd.f32 %v5286_v27, %v5285_v8  ;;  %v5326_v26 = vpop.f32.mrb[99].mxu1 }
 0x217   : > { %v5327_v11 = vadd.f32 %v5326_v26, %v5325_v7 }
 0x218   : > { %v4093_v28 = vadd.f32 %v5324_v5, %v4029_v49  ;;  %v4032_v30 = vadd.f32 %v5287_v25, %v3968_v33  ;;  %v467_v49 = vld [vmem:[%s6647_s3] sm:$0xff] }
 0x21a   : > { %v4096_v10 = vadd.f32 %v5327_v11, %v4032_v30  ;;  %v5288_v32 = vpop.f32.mrb[100].mxu0  ;;  %v468_v11 = vld [vmem:[%s6647_s3 + $0x8] sm:$0xff] }
 0x21b   : > { %v5328_v35 = vpop.f32.mrb[100].mxu1  ;;  %v5289_v17 = vpop.f32.mrb[101].mxu0 }
 0x21c   : > { %v5290_v19 = vadd.f32 %v5289_v17, %v5288_v32  ;;  %v5329_v38 = vpop.f32.mrb[101].mxu1  ;;  %v5291_v52 = vpop.f32.mrb[102].mxu0 }
 0x21d   : > { %v5330_v20 = vadd.f32 %v5329_v38, %v5328_v35  ;;  %v5331_v43 = vpop.f32.mrb[102].mxu1  ;;  %v5292_v24 = vpop.f32.mrb[103].mxu0 }
 0x21e   : > { %v4037_v44 = vadd.f32 %v5290_v19, %v3973_v34  ;;  %v5293_v45 = vadd.f32 %v5292_v24, %v5291_v52  ;;  %v5332_v46 = vpop.f32.mrb[103].mxu1 }
 0x21f   : > { %v5333_v47 = vadd.f32 %v5332_v46, %v5331_v43 }
 0x220   : > { %v4101_v31 = vadd.f32 %v5330_v20, %v4037_v44  ;;  %v4040_v29 = vadd.f32 %v5293_v45, %v3976_v54 }
 0x222   : > { %v6529_v48 = vadd.f32 %v5333_v47, %v4040_v29  ;;  %v469_v47 = vld [vmem:[%s6647_s3 + $0x10] sm:$0xff] }
 0x22d   : > { %v5334_v33 = vpop.f32.mrb[104].mxu1 }
 0x22e   : > { %v5294_v51 = vpop.f32.mrb[104].mxu0  ;;  %v5335_v21 = vpop.f32.mrb[105].mxu1 }
 0x22f   : > { %v5295_v55 = vpop.f32.mrb[105].mxu0  ;;  %v5336_v58 = vadd.f32 %v5335_v21, %v5334_v33  ;;  %v5337_v42 = vpop.f32.mrb[106].mxu1 }
 0x230   : > { %v5296_v36 = vadd.f32 %v5295_v55, %v5294_v51  ;;  %v5297_v39 = vpop.f32.mrb[106].mxu0  ;;  %v5338_v61 = vpop.f32.mrb[107].mxu1  ;;  %v470_v55 = vld [vmem:[%s6647_s3 + $0x18] sm:$0xff] }
 0x231   : > { %v5298_v41 = vpop.f32.mrb[107].mxu0  ;;  %v5339_v34 = vadd.f32 %v5338_v61, %v5337_v42 }
 0x232   : > { %v4045_v62 = vadd.f32 %v5296_v36, %v3981_v59  ;;  %v5299_v63 = vadd.f32 %v5298_v41, %v5297_v39 }
 0x234   : > { %v6531_v0 = vadd.f32 %v5336_v58, %v4045_v62  ;;  %v4048_v1 = vadd.f32 %v5299_v63, %v3984_v3 }
 0x235   : > { %v5340_v37 = vpop.f32.mrb[108].mxu1 }
 0x236   : > { %v6533_v2 = vadd.f32 %v5339_v34, %v4048_v1  ;;  %v5300_v54 = vpop.f32.mrb[108].mxu0  ;;  %v5341_v6 = vpop.f32.mrb[109].mxu1 }
 0x237   : > { %v5301_v4 = vpop.f32.mrb[109].mxu0  ;;  %v5342_v9 = vadd.f32 %v5341_v6, %v5340_v37  ;;  %v5343_v53 = vpop.f32.mrb[110].mxu1 }
 0x238   : > { %v5302_v50 = vadd.f32 %v5301_v4, %v5300_v54  ;;  %v5303_v56 = vpop.f32.mrb[110].mxu0  ;;  %v5344_v12 = vpop.f32.mrb[111].mxu1  ;;  %v471_v4 = vld [vmem:[%s6647_s3 + $0x20] sm:$0xff] }
 0x239   : > { %v5304_v60 = vpop.f32.mrb[111].mxu0  ;;  %v472_v56 = vld [vmem:[%s6647_s3 + $0x28] sm:$0xff] }
 0x23a   : > { %v4053_v13 = vadd.f32 %v5302_v50, %v3989_v22 }
 0x23c   : > { %v6535_v14 = vadd.f32 %v5342_v9, %v4053_v13 }
 0x23e   : > { %v5362_v59 = vpop.f32.mrb[112].mxu0  ;;  %v5402_v15 = vpop.f32.mrb[112].mxu1 }
 0x23f   : > { %v5363_v16 = vpop.f32.mrb[113].mxu0  ;;  %v5403_v3 = vpop.f32.mrb[113].mxu1 }
 0x240   : > { %v5364_v40 = vadd.f32 %v5363_v16, %v5362_v59  ;;  %v5365_v18 = vpop.f32.mrb[114].mxu0  ;;  %v5404_v57 = vadd.f32 %v5403_v3, %v5402_v15  ;;  %v5405_v23 = vpop.f32.mrb[114].mxu1 }
 0x241   : > { %v5366_v8 = vpop.f32.mrb[115].mxu0  ;;  %v5406_v27 = vpop.f32.mrb[115].mxu1 }
 0x242   : > { %v4157_v5 = vadd.f32 %v5364_v40, %v4093_v28  ;;  %v5367_v7 = vadd.f32 %v5366_v8, %v5365_v18  ;;  %v5407_v25 = vadd.f32 %v5406_v27, %v5405_v23  ;;  %v473_v8 = vld [vmem:[%s6647_s3 + $0x30] sm:$0xff] }
 0x244   : > { %v4221_v22 = vadd.f32 %v5404_v57, %v4157_v5  ;;  %v4160_v26 = vadd.f32 %v5367_v7, %v4096_v10 }
 0x246   : > { %v4250_v30 = vadd.f32 %v4221_v22, %v467_v49  ;;  %v4224_v32 = vadd.f32 %v5407_v25, %v4160_v26  ;;  %v5368_v35 = vpop.f32.mrb[116].mxu0  ;;  %v5408_v17 = vpop.f32.mrb[116].mxu1 }
 0x247   : > { %v5369_v19 = vpop.f32.mrb[117].mxu0  ;;  %v5409_v52 = vpop.f32.mrb[117].mxu1 }
 0x248   : > { %4257 = vst [vmem:[%s6647_s3] sm:$0xff] %v4250_v30  ;;  %v4251_v28 = vadd.f32 %v4224_v32, %v468_v11  ;;  %v5370_v38 = vadd.f32 %v5369_v19, %v5368_v35  ;;  %v5371_v20 = vpop.f32.mrb[118].mxu0  ;;  %v5410_v43 = vadd.f32 %v5409_v52, %v5408_v17  ;;  %v5411_v24 = vpop.f32.mrb[118].mxu1 }
 0x249   : > { %v5372_v10 = vpop.f32.mrb[119].mxu0  ;;  %v5412_v46 = vpop.f32.mrb[119].mxu1 }
 0x24a   : > { %4258 = vst [vmem:[%s6647_s3 + $0x8] sm:$0xff] %v4251_v28  ;;  %v4165_v44 = vadd.f32 %v5370_v38, %v4101_v31  ;;  %v5373_v45 = vadd.f32 %v5372_v10, %v5371_v20  ;;  %v5413_v29 = vadd.f32 %v5412_v46, %v5411_v24 }
 0x24c   : > { %v4229_v51 = vadd.f32 %v5410_v43, %v4165_v44  ;;  %v4168_v33 = vadd.f32 %v5373_v45, %v6529_v48 }
 0x24e   : > { %v4252_v21 = vadd.f32 %v4229_v51, %v469_v47  ;;  %v4232_v36 = vadd.f32 %v5413_v29, %v4168_v33  ;;  %v5374_v58 = vpop.f32.mrb[120].mxu0  ;;  %v5414_v39 = vpop.f32.mrb[120].mxu1 }
 0x24f   : > { %v5375_v42 = vpop.f32.mrb[121].mxu0  ;;  %v5415_v61 = vpop.f32.mrb[121].mxu1  ;;  %v4268_v27 = vld [vmem:[%s6647_s3] sm:$0xff] (!%p4779_p11) }
 0x250   : > { %4259 = vst [vmem:[%s6647_s3 + $0x10] sm:$0xff] %v4252_v21  ;;  %v4253_v31 = vadd.f32 %v4232_v36, %v470_v55  ;;  %v5376_v41 = vadd.f32 %v5375_v42, %v5374_v58  ;;  %v5377_v62 = vpop.f32.mrb[122].mxu0  ;;  %v5416_v63 = vadd.f32 %v5415_v61, %v5414_v39  ;;  %v5417_v34 = vpop.f32.mrb[122].mxu1 }
 0x251   : > { %v5378_v48 = vpop.f32.mrb[123].mxu0  ;;  %v5418_v37 = vpop.f32.mrb[123].mxu1  ;;  %v4269_v49 = vld [vmem:[%s6647_s3 + $0x8] sm:$0xff] (!%p4779_p11) }
 0x252   : > { %4260 = vst [vmem:[%s6647_s3 + $0x18] sm:$0xff] %v4253_v31  ;;  %v4173_v1 = vadd.f32 %v5376_v41, %v6531_v0  ;;  %v5379_v54 = vadd.f32 %v5378_v48, %v5377_v62  ;;  %v5419_v6 = vadd.f32 %v5418_v37, %v5417_v34 }
 0x254   : > { %v4237_v50 = vadd.f32 %v5416_v63, %v4173_v1  ;;  %v4176_v9 = vadd.f32 %v5379_v54, %v6533_v2 }
 0x256   : > { %v4254_v53 = vadd.f32 %v4237_v50, %v471_v4  ;;  %v4240_v60 = vadd.f32 %v5419_v6, %v4176_v9  ;;  %v5380_v12 = vpop.f32.mrb[124].mxu0  ;;  %v5420_v13 = vpop.f32.mrb[124].mxu1 }
 0x257   : > { %v5381_v59 = vpop.f32.mrb[125].mxu0  ;;  %v5421_v16 = vpop.f32.mrb[125].mxu1  ;;  %v4270_v26 = vld [vmem:[%s6647_s3 + $0x10] sm:$0xff] (!%p4779_p11) }
 0x258   : > { %4261 = vst [vmem:[%s6647_s3 + $0x20] sm:$0xff] %v4254_v53  ;;  %v4255_v0 = vadd.f32 %v4240_v60, %v472_v56  ;;  %v5382_v15 = vadd.f32 %v5381_v59, %v5380_v12  ;;  %v5383_v40 = vpop.f32.mrb[126].mxu0  ;;  %v5422_v3 = vadd.f32 %v5421_v16, %v5420_v13  ;;  %v5423_v18 = vpop.f32.mrb[126].mxu1 }
 0x259   : > { %v5384_v2 = vpop.f32.mrb[127].mxu0  ;;  %v5424_v23 = vpop.f32.mrb[127].mxu1  ;;  %v4271_v11 = vld [vmem:[%s6647_s3 + $0x18] sm:$0xff] (!%p4779_p11) }
 0x25a   : > { %4262 = vst [vmem:[%s6647_s3 + $0x28] sm:$0xff] %v4255_v0  ;;  %v4181_v57 = vadd.f32 %v5382_v15, %v6535_v14  ;;  %4267 = sbr.rel (%p4779_p11) target bundleno = 621 (0x26d), region = 63  ;;  %v4780_v14 = vld [vmem:[%s6646_s2] ss:$0 sm:$0xff] (!%p4779_p11) }
 0x25b   : > { %v4282_v25 = vadd.f32 (!%p4779_p11), %v4780_v14, %v4268_v27  ;;  %v4283_v22 = vadd.f32 (!%p4779_p11), %v4780_v14, %v4269_v49  ;;  %v4284_v32 = vadd.f32 (!%p4779_p11), %v4780_v14, %v4270_v26  ;;  %v4285_v35 = vadd.f32 (!%p4779_p11), %v4780_v14, %v4271_v11 }
 0x25c   : > { %v4245_v5 = vadd.f32 %v5422_v3, %v4181_v57 }
 0x25d   : > { %v4289_v38 = vmax.f32 (!%p4779_p11), %v4282_v25, 0.0  ;;  %v4290_v52 = vmax.f32 (!%p4779_p11), %v4283_v22, 0.0  ;;  %v4291_v24 = vmax.f32 (!%p4779_p11), %v4284_v32, 0.0  ;;  %v4292_v10 = vmax.f32 (!%p4779_p11), %v4285_v35, 0.0 }
 0x25e   : > { %v4256_v7 = vadd.f32 %v4245_v5, %v473_v8 }
 0x25f   : > { %v4272_v30 = vld [vmem:[%s6647_s3 + $0x20] sm:$0xff] (!%p4779_p11)  ;;  %4296 = vst [vmem:[%s6647_s3] sm:$0xff] (!%p4779_p11), %v4289_v38  ;;  %4297 = vst [vmem:[%s6647_s3 + $0x8] sm:$0xff] (!%p4779_p11), %v4290_v52 }
 0x260   : > { %4263 = vst [vmem:[%s6647_s3 + $0x30] sm:$0xff] %v4256_v7  ;;  %v4286_v17 = vadd.f32 (!%p4779_p11), %v4780_v14, %v4272_v30  ;;  %4298 = vst [vmem:[%s6647_s3 + $0x10] sm:$0xff] (!%p4779_p11), %v4291_v24 }
 0x261   : > { %v4273_v19 = vld [vmem:[%s6647_s3 + $0x28] sm:$0xff]  ;;  %4299 = vst [vmem:[%s6647_s3 + $0x18] sm:$0xff] %v4292_v10 }
 0x262   : > { %v4287_v20 = vadd.f32 %v4780_v14, %v4273_v19  ;;  %v4293_v44 = vmax.f32 %v4286_v17, 0.0 }
 0x264   : > { %v4294_v45 = vmax.f32 %v4287_v20, 0.0  ;;  %4300 = vst [vmem:[%s6647_s3 + $0x20] sm:$0xff] %v4293_v44 }
 0x266   : > { %4301 = vst [vmem:[%s6647_s3 + $0x28] sm:$0xff] %v4294_v45 }
 0x267   : > { %v4274_v28 = vld [vmem:[%s6647_s3 + $0x30] sm:$0xff] }
 0x268   : > { %v4288_v43 = vadd.f32 %v4780_v14, %v4274_v28 }
 0x26a   : > { %v4295_v46 = vmax.f32 %v4288_v43, 0.0 }
 0x26c   : > { %4302 = vst [vmem:[%s6647_s3 + $0x30] sm:$0xff] %v4295_v46 }
 0x26d PF: > { %s13_s16 = sadd.s32 1, %s5795_s16   ;;  %s6648_s12 = smov %s5783_s13 }
 0x26e   : > { %p10_p12 = scmp.ge.s32.totalorder %s13_s16, 5   ;;  %s6649_s13 = smov %s5853_s20 }
 0x26f   : > { %s6650_s14 = smov %s5791_s15  ;;  %s6651_s15 = smov %s6653_s17 }
 0x270   :  { %12 = sbr.rel (!%p10_p12) target bundleno = 3 (0x3), region = 101 }

// kernel: actor_critic_forward.5
= control target key start
LH: loop header
LB: loop body
LE: loop exit
PB: predicated region body
PF: predicated region fallthrough
CT: control target
= control target key end

     0   :  { %s404_s1 = inlined_call_operand.vmem [shape: bf16[128,128], index: 1, kind: input, shape index: {}]   ;;  %s405_s0 = inlined_call_operand.vmem [shape: bf16[56,128], index: 0, kind: input, shape index: {}]   ;;  %s406_s2 = inlined_call_operand.vmem [shape: f32[1,128], index: 2, kind: input, shape index: {}]   ;;  %s407_s3 = inlined_call_operand.vmem [shape: f32[56,128], index: 3, kind: output, shape index: {}]  }
   0x1   :  { %v312_v0 = vld [vmem:[%s404_s1] sm:$0xff]   ;;  %v313_v1 = vld [vmem:[%s404_s1 + $0x8] sm:$0xff]   ;;  %v314_v2 = vld [vmem:[%s404_s1 + $0x10] sm:$0xff]  }
   0x2   :  { %271 = vmatprep.subr.bf16.mxu0 %v312_v0  ;;  %295 = vmatprep.subr.bf16.mxu1 %v312_v0  ;;  %v315_v3 = vld [vmem:[%s404_s1 + $0x18] sm:$0xff]   ;;  %v320_v4 = vld [vmem:[%s405_s0] sm:$0xff]   ;;  %v321_v5 = vld [vmem:[%s405_s0 + $0x10] sm:$0xff]  }
   0x3   :  { %272 = vmatpush3.bf16.msra.mxu0 %v312_v0  ;;  %303 = vmatpush3.bf16.msra.mxu1 %v312_v0  ;;  %v316_v6 = vld [vmem:[%s404_s1 + $0x20] sm:$0xff]   ;;  %v317_v7 = vld [vmem:[%s404_s1 + $0x28] sm:$0xff]   ;;  %v318_v8 = vld [vmem:[%s404_s1 + $0x30] sm:$0xff]  }
   0x4   :  { %273 = vmatprep.subr.bf16.mxu0 %v313_v1  ;;  %296 = vmatprep.subr.bf16.mxu1 %v313_v1  ;;  %v319_v9 = vld [vmem:[%s404_s1 + $0x38] sm:$0xff]   ;;  %v322_v10 = vld [vmem:[%s405_s0 + $0x8] sm:$0xff]   ;;  %v258_v13 = vld [vmem:[%s406_s2] ss:$0 sm:$0xff] }
   0x5   :  { %287 = vmatprep.mubr.bf16.mxu0 %v320_v4  ;;  %291 = vmatprep.mubr.bf16.mxu1 %v321_v5  ;;  %v323_v11 = vld [vmem:[%s405_s0 + $0x18] ss:$0 sps:$4 sm:$0xff]  }
   0x7   :  { %274 = vmatpush3.bf16.msra.mxu0 %v313_v1  ;;  %304 = vmatpush3.bf16.msra.mxu1 %v313_v1 }
   0x8   :  { %275 = vmatprep.subr.bf16.mxu0 %v314_v2  ;;  %297 = vmatprep.subr.bf16.mxu1 %v314_v2 }
   0xb   :  { %276 = vmatpush3.bf16.msra.mxu0 %v314_v2  ;;  %305 = vmatpush3.bf16.msra.mxu1 %v314_v2 }
   0xc   :  { %277 = vmatprep.subr.bf16.mxu0 %v315_v3  ;;  %298 = vmatprep.subr.bf16.mxu1 %v315_v3 }
   0xf   :  { %278 = vmatpush3.bf16.msra.mxu0 %v315_v3  ;;  %306 = vmatpush3.bf16.msra.mxu1 %v315_v3 }
  0x10   :  { %279 = vmatprep.subr.bf16.mxu0 %v316_v6  ;;  %299 = vmatprep.subr.bf16.mxu1 %v316_v6 }
  0x13   :  { %280 = vmatpush3.bf16.msra.mxu0 %v316_v6  ;;  %307 = vmatpush3.bf16.msra.mxu1 %v316_v6 }
  0x14   :  { %281 = vmatprep.subr.bf16.mxu0 %v317_v7  ;;  %300 = vmatprep.subr.bf16.mxu1 %v317_v7 }
  0x17   :  { %282 = vmatpush3.bf16.msra.mxu0 %v317_v7  ;;  %308 = vmatpush3.bf16.msra.mxu1 %v317_v7 }
  0x18   :  { %283 = vmatprep.subr.bf16.mxu0 %v318_v8  ;;  %301 = vmatprep.subr.bf16.mxu1 %v318_v8 }
  0x1b   :  { %284 = vmatpush3.bf16.msra.mxu0 %v318_v8  ;;  %309 = vmatpush3.bf16.msra.mxu1 %v318_v8 }
  0x1c   :  { %285 = vmatprep.subr.bf16.mxu0 %v319_v9  ;;  %302 = vmatprep.subr.bf16.mxu1 %v319_v9 }
  0x1f   :  { %286 = vmatpush3.bf16.msra.mxu0 %v319_v9  ;;  %310 = vmatpush3.bf16.msra.mxu1 %v319_v9 }
  0x22   :  { %288 = vmatmul.mubr.bf16.vlgmr.msra.gmra.mrb[0].mxu0 %v322_v10  ;;  %292 = vmatmul.mubr.bf16.vlgmr.msra.gmra.mrb[0].mxu1 %v323_v11 }
  0xf5   :  { %v289_v12 = vpop.f32.mrb[0].mxu0  ;;  %v293_v14 = vpop.f32.mrb[0].mxu1 }
  0xf6   :  { %v160_v15 = vpop.f32.mrb[1].mxu0  ;;  %v176_v16 = vpop.f32.mrb[1].mxu1  ;;  %v223_v19 = vadd.f32 %v289_v12, %v258_v13  ;;  %v227_v20 = vadd.f32 %v293_v14, %v258_v13 }
  0xf7   :  { %v290_v17 = vpop.f32.mrb[2].mxu0  ;;  %v294_v18 = vpop.f32.mrb[2].mxu1  ;;  %v221_v23 = vadd.f32 %v258_v13, %v160_v15  ;;  %v225_v24 = vadd.f32 %v258_v13, %v176_v16 }
  0xf8   :  { %v163_v21 = vpop.f32.mrb[3].mxu0  ;;  %v179_v22 = vpop.f32.mrb[3].mxu1  ;;  %v230_v25 = vmax.f32 %v223_v19, 0.0  ;;  %v234_v26 = vmax.f32 %v227_v20, 0.0  ;;  %v224_v27 = vadd.f32 %v290_v17, %v258_v13 }
  0xf9   :  { %v228_v28 = vmax.f32 %v221_v23, 0.0  ;;  %v232_v29 = vmax.f32 %v225_v24, 0.0  ;;  %v222_v30 = vadd.f32 %v258_v13, %v163_v21  ;;  %v226_v31 = vadd.f32 %v258_v13, %v179_v22 }
  0xfa   :  { %237 = vst [vmem:[%s407_s3 + $0x10] sm:$0xff] %v230_v25  ;;  %241 = vst [vmem:[%s407_s3 + $0x30] sm:$0xff] %v234_v26  ;;  %v231_v32 = vmax.f32 %v224_v27, 0.0 }
  0xfb   :  { %235 = vst [vmem:[%s407_s3] sm:$0xff] %v228_v28  ;;  %239 = vst [vmem:[%s407_s3 + $0x20] sm:$0xff] %v232_v29  ;;  %v229_v33 = vmax.f32 %v222_v30, 0.0  ;;  %v233_v34 = vmax.f32 %v226_v31, 0.0 }
  0xfc   :  { %238 = vst [vmem:[%s407_s3 + $0x18] sm:$0xff] %v231_v32 }
  0xfd   :  { %236 = vst [vmem:[%s407_s3 + $0x8] sm:$0xff] %v229_v33  ;;  %240 = vst [vmem:[%s407_s3 + $0x28] sm:$0xff] %v233_v34 }

// kernel: actor_critic_forward.7
= control target key start
LH: loop header
LB: loop body
LE: loop exit
PB: predicated region body
PF: predicated region fallthrough
CT: control target
= control target key end

     0   :  { %v510_v0 = vmov 0.0   ;;  %vm511_vm0 = vmmov 0   ;;  %s669_s1 = inlined_call_operand.vmem [shape: bf16[128,128], index: 1, kind: input, shape index: {}]   ;;  %s670_s3 = inlined_call_operand.vmem [shape: bf16[128,128], index: 3, kind: input, shape index: {}]   ;;  %s671_s0 = inlined_call_operand.vmem [shape: bf16[8,128], index: 0, kind: input, shape index: {}]   ;;  %s672_s5 = inlined_call_operand.vmem [shape: bf16[128,128], index: 5, kind: input, shape index: {}]   ;;  %s673_s2 = inlined_call_operand.vmem [shape: f32[1,128], index: 2, kind: input, shape index: {}]   ;;  %s674_s4 = inlined_call_operand.vmem [shape: f32[1,128], index: 4, kind: input, shape index: {}]   ;;  %s675_s6 = inlined_call_operand.vmem [shape: f32[1,128], index: 6, kind: input, shape index: {}]   ;;  %s676_s7 = inlined_call_operand.vmem [shape: f32[8,128], index: 7, kind: output, shape index: {}]  }
   0x1   :  { %424 = vmatprep.subr.bf16.mxu0 %v510_v0  ;;  %v486_v1 = vld [vmem:[%s669_s1] sm:$0xff]   ;;  %440 = vmatprep.mubr.msk.bf16.mxu0 %vm511_vm0, %v510_v0  ;;  %v487_v2 = vld [vmem:[%s669_s1 + $0x8] sm:$0xff]   ;;  %v488_v3 = vld [vmem:[%s669_s1 + $0x10] sm:$0xff]  }
   0x2   :  { %444 = vmatprep.subr.bf16.mxu1 %v510_v0  ;;  %460 = vmatprep.mubr.msk.bf16.mxu1 %vm511_vm0, %v510_v0  ;;  %v494_v4 = vld [vmem:[%s670_s3] sm:$0xff]   ;;  %v489_v5 = vld [vmem:[%s669_s1 + $0x18] sm:$0xff]   ;;  %v495_v6 = vld [vmem:[%s670_s3 + $0x8] sm:$0xff]  }
   0x3   :  { %425 = vmatpush3.bf16.msra.mxu0 %v486_v1  ;;  %445 = vmatpush3.bf16.msra.mxu1 %v494_v4  ;;  %v490_v7 = vld [vmem:[%s669_s1 + $0x20] sm:$0xff]   ;;  %v496_v8 = vld [vmem:[%s670_s3 + $0x10] sm:$0xff]   ;;  %v491_v9 = vld [vmem:[%s669_s1 + $0x28] sm:$0xff]  }
   0x4   :  { %426 = vmatprep.subr.bf16.mxu0 %v510_v0  ;;  %446 = vmatprep.subr.bf16.mxu1 %v510_v0  ;;  %v497_v10 = vld [vmem:[%s670_s3 + $0x18] sm:$0xff]   ;;  %v492_v11 = vld [vmem:[%s669_s1 + $0x30] sm:$0xff]   ;;  %v498_v12 = vld [vmem:[%s670_s3 + $0x20] sm:$0xff]  }
   0x5   :  { %v493_v13 = vld [vmem:[%s669_s1 + $0x38] sm:$0xff]   ;;  %v499_v14 = vld [vmem:[%s670_s3 + $0x28] sm:$0xff]   ;;  %v27_v15 = vld [vmem:[%s671_s0] sm:$0xf] }
   0x6   :  { %v500_v16 = vld [vmem:[%s670_s3 + $0x30] sm:$0xff]   ;;  %v501_v17 = vld [vmem:[%s670_s3 + $0x38] sm:$0xff]   ;;  %v502_v18 = vld [vmem:[%s672_s5] sm:$0xff]  }
   0x7   :  { %427 = vmatpush3.bf16.msra.mxu0 %v487_v2  ;;  %447 = vmatpush3.bf16.msra.mxu1 %v495_v6  ;;  %v503_v19 = vld [vmem:[%s672_s5 + $0x8] sm:$0xff]   ;;  %v504_v20 = vld [vmem:[%s672_s5 + $0x10] sm:$0xff]   ;;  %v505_v21 = vld [vmem:[%s672_s5 + $0x18] sm:$0xff]  }
   0x8   :  { %428 = vmatprep.subr.bf16.mxu0 %v510_v0  ;;  %448 = vmatprep.subr.bf16.mxu1 %v510_v0  ;;  %v506_v22 = vld [vmem:[%s672_s5 + $0x20] sm:$0xff]   ;;  %v507_v23 = vld [vmem:[%s672_s5 + $0x28] sm:$0xff]   ;;  %v508_v32 = vld [vmem:[%s672_s5 + $0x30] sm:$0xff]  }
   0x9   :  { %v370_v24 = vld [vmem:[%s673_s2] ss:$0 sm:$0xff]  ;;  %v509_v33 = vld [vmem:[%s672_s5 + $0x38] sm:$0xff]  }
   0xa   :  { %v379_v34 = vld [vmem:[%s674_s4] ss:$0 sm:$0xff] }
   0xb   :  { %429 = vmatpush3.bf16.msra.mxu0 %v488_v3  ;;  %449 = vmatpush3.bf16.msra.mxu1 %v496_v8  ;;  %v388_v42 = vld [vmem:[%s675_s6] ss:$0 sm:$0xff] }
   0xc   :  { %430 = vmatprep.subr.bf16.mxu0 %v510_v0  ;;  %450 = vmatprep.subr.bf16.mxu1 %v510_v0 }
   0xf   :  { %431 = vmatpush3.bf16.msra.mxu0 %v489_v5  ;;  %451 = vmatpush3.bf16.msra.mxu1 %v497_v10 }
  0x10   :  { %432 = vmatprep.subr.bf16.mxu0 %v510_v0  ;;  %452 = vmatprep.subr.bf16.mxu1 %v510_v0 }
  0x13   :  { %433 = vmatpush3.bf16.msra.mxu0 %v490_v7  ;;  %453 = vmatpush3.bf16.msra.mxu1 %v498_v12 }
  0x14   :  { %434 = vmatprep.subr.bf16.mxu0 %v510_v0  ;;  %454 = vmatprep.subr.bf16.mxu1 %v510_v0 }
  0x17   :  { %435 = vmatpush3.bf16.msra.mxu0 %v491_v9  ;;  %455 = vmatpush3.bf16.msra.mxu1 %v499_v14 }
  0x18   :  { %436 = vmatprep.subr.bf16.mxu0 %v510_v0  ;;  %456 = vmatprep.subr.bf16.mxu1 %v510_v0 }
  0x1b   :  { %437 = vmatpush3.bf16.msra.mxu0 %v492_v11  ;;  %457 = vmatpush3.bf16.msra.mxu1 %v500_v16 }
  0x1c   :  { %438 = vmatprep.subr.bf16.mxu0 %v510_v0  ;;  %458 = vmatprep.subr.bf16.mxu1 %v510_v0 }
  0x1f   :  { %439 = vmatpush3.bf16.msra.mxu0 %v493_v13  ;;  %459 = vmatpush3.bf16.msra.mxu1 %v501_v17 }
  0x20   :  { %464 = vmatprep.subr.bf16.mxu0 %v510_v0 }
  0x22   :  { %441 = vmatmul.mubr.bf16.vlgmr.msra.gmra.mrb[0].mxu0 %v27_v15 }
  0x23   :  { %480 = vmatprep.mubr.msk.bf16.mxu0 %vm511_vm0, %v510_v0  ;;  %465 = vmatpush3.bf16.msra.mxu0 %v502_v18 }
  0x24   :  { %466 = vmatprep.subr.bf16.mxu0 %v510_v0 }
  0x27   :  { %467 = vmatpush3.bf16.msra.mxu0 %v503_v19 }
  0x28   :  { %468 = vmatprep.subr.bf16.mxu0 %v510_v0 }
  0x2b   :  { %469 = vmatpush3.bf16.msra.mxu0 %v504_v20 }
  0x2c   :  { %470 = vmatprep.subr.bf16.mxu0 %v510_v0 }
  0x2f   :  { %471 = vmatpush3.bf16.msra.mxu0 %v505_v21 }
  0x30   :  { %472 = vmatprep.subr.bf16.mxu0 %v510_v0 }
  0x33   :  { %473 = vmatpush3.bf16.msra.mxu0 %v506_v22 }
  0x34   :  { %474 = vmatprep.subr.bf16.mxu0 %v510_v0 }
  0x37   :  { %475 = vmatpush3.bf16.msra.mxu0 %v507_v23 }
  0x38   :  { %476 = vmatprep.subr.bf16.mxu0 %v510_v0 }
  0x3b   :  { %477 = vmatpush3.bf16.msra.mxu0 %v508_v32 }
  0x3c   :  { %478 = vmatprep.subr.bf16.mxu0 %v510_v0 }
  0x3f   :  { %479 = vmatpush3.bf16.msra.mxu0 %v509_v33 }
  0xf5   :  { %v133_v25 = vpop.f32.mrb[0].mxu0 }
  0xf6   :  { %v134_v26 = vadd.f32 %v370_v24, %v133_v25  ;;  %v442_v27 = vpop.f32.mrb[1].mxu0 }
  0xf7   :  { %v136_v28 = vpop.f32.mrb[2].mxu0 }
  0xf8   :  { %v139_v29 = vmax.f32 %v134_v26, 0.0  ;;  %v443_v30 = vpop.f32.mrb[3].mxu0 }
  0xfa   :  { %v140_v31 = vpack.c.bf16 %v139_v29, %v139_v29 }
  0xfc   :  { %461 = vmatmul.mubr.bf16.vlgmr.msra.gmra.mrb[0].mxu1 %v140_v31 }
 0x1cf   :  { %v246_v35 = vpop.f32.mrb[0].mxu1 }
 0x1d0   :  { %v247_v36 = vadd.f32 %v379_v34, %v246_v35  ;;  %v462_v37 = vpop.f32.mrb[1].mxu1 }
 0x1d1   :  { %v249_v38 = vpop.f32.mrb[2].mxu1 }
 0x1d2   :  { %v252_v39 = vmax.f32 %v247_v36, 0.0  ;;  %v463_v40 = vpop.f32.mrb[3].mxu1 }
 0x1d4   :  { %v253_v41 = vpack.c.bf16 %v252_v39, %v252_v39 }
 0x1d6   :  { %481 = vmatmul.mubr.bf16.vlgmr.msra.gmra.mrb[4].mxu0 %v253_v41 }
 0x2a9   :  { %v359_v43 = vpop.f32.mrb[4].mxu0 }
 0x2aa   :  { %v360_v44 = vadd.f32 %v388_v42, %v359_v43  ;;  %v482_v45 = vpop.f32.mrb[5].mxu0 }
 0x2ab   :  { %v362_v46 = vpop.f32.mrb[6].mxu0 }
 0x2ac   :  { %365 = vst [vmem:[%s676_s7] sm:$0xff] %v360_v44  ;;  %v483_v47 = vpop.f32.mrb[7].mxu0 }

</bundles_post_ra>
